<compile_context>
chip_gen: v5e
topology: v5e:2x2
jax: 0.10.0
libtpu: 0.0.40
codegen_flags: <defaults>
</compile_context>

<pallas_src>
import numpy as np
import jax
import jax.numpy as jnp
from jax import lax
from jax.experimental import pallas as pl
from jax.experimental.pallas import tpu as pltpu

# ----------------- configuration (mirrors Mulit_Augmentation.__init__) -----------------
LEARNING_COLOR_LIST = ['Brightness', 'Color', 'Contrast', 'Sharpness', 'Posterize', 'Solarize']
NO_LEARNING_COLOR_LIST = ['Equalize', 'Invert']
LEARNING_STN_LIST = ['ShearX', 'ShearY', 'TranslateX', 'TranslateY', 'Rotate']
OTHER_LIST = ['CUTMIX']            # in forward this slot is the Cutout(128) op

NUM_COLOR = len(LEARNING_COLOR_LIST)                       # 6
NUM_STN = len(LEARNING_STN_LIST)                           # 5
LEN_POLICIES = NUM_COLOR + NUM_STN                         # 11
NUM_P = LEN_POLICIES + len(NO_LEARNING_COLOR_LIST) + len(OTHER_LIST)   # 14
IDX_EQUALIZE = LEN_POLICIES                                # 11
IDX_INVERT = LEN_POLICIES + 1                              # 12
IDX_CUTOUT = LEN_POLICIES + 2                              # 13

MEAN = jnp.array([123.675 / 255.0, 116.28 / 255.0, 103.53 / 255.0], jnp.float32)
STD = jnp.array([58.395 / 255.0, 57.12 / 255.0, 57.375 / 255.0], jnp.float32)


def _pick_tile(n, cap):
    """Largest multiple of 128 that divides n (<= cap); falls back to full extent."""
    start = (min(cap, n) // 128) * 128
    for t in range(start, 0, -128):
        if n % t == 0:
            return t
    return n


# ======================= Kernel A: color / no-learning fusion ==========================
def _color_fuse_kernel(img_ref, s_ref, t_ref, cinv_ref, m255_ref, s255_ref, cut_ref,
                       out_ref):
    # img: (R, TN) f32, rows = batch*channel, lanes = flattened spatial (lane-dense).
    # Learned color ops + Invert + Cutout pre-folded (wrapper) into:
    #   out = img * (s_row + cut_lane) + t_row + cinv_row * x255
    # One load, ~8 VPU ops/elem, exactly one store -> pure HBM roofline.
    img = img_ref[...]
    # x255 = pre_tran(img): denormalize -> *255 -> floor(+0.5) -> clip (Invert input)
    x255 = jnp.clip(jnp.floor(img * s255_ref[...] + m255_ref[...] + 0.5), 0.0, 255.0)
    scale = s_ref[...] + cut_ref[...]                      # (R,1) + (1,TN) -> (R,TN)
    out_ref[...] = img * scale + t_ref[...] + cinv_ref[...] * x255


def color_fuse(image, gates, m, color_a, color_b, cut_mask, target_tile_bytes=2 << 20):
    B, C, H, W = image.shape
    R, N = B * C, H * W
    # ~2 MiB lane-dense tiles amortize the ~0.35us/step overhead; with 2(in)+2(out)
    # double-buffers this stays ~8 MiB << v7x 32 MiB scoped VMEM default.
    cap = max(128, ((target_tile_bytes // (R * 4)) // 128) * 128)
    TN = _pick_tile(N, cap)
    img2d = image.reshape(R, N)

    # fold the 6 learned color ops: sum_j g_j*(img*a_j*m_j + b_j*m_j) = img*S + T
    gm = gates[:NUM_COLOR] * m[:NUM_COLOR]                 # (NUM_COLOR,)
    s_color = jnp.sum(gm[:, None] * color_a, axis=0)       # (C,)
    t_color = jnp.sum(gm[:, None] * color_b, axis=0)       # (C,)
    # fold Invert (an affine of x255: aug_inv = b_inv + a_inv*x255) and Cutout too
    g_inv = gates[IDX_INVERT]
    g_cut = gates[IDX_CUTOUT]
    a_inv = -1.0 / (255.0 * STD)                           # (C,)
    b_inv = (1.0 - MEAN) / STD                             # (C,)
    s_ch = 1.0 + s_color - g_inv                           # row scale
    t_ch = t_color + g_inv * b_inv                         # row bias
    cinv_ch = g_inv * a_inv                                # row coeff on x255
    m255 = MEAN * 255.0
    s255 = STD * 255.0

    def rows(v):                                           # (C,) -> (R,1), row = b*C + c
        return jnp.tile(v, B).reshape(R, 1).astype(jnp.float32)   # assumes C == 3 (COCO mean/std)

    cut_lane = (g_cut * (cut_mask.reshape(1, N) - 1.0)).astype(jnp.float32)

    out2d = pl.pallas_call(
        _color_fuse_kernel,
        out_shape=jax.ShapeDtypeStruct((R, N), jnp.float32),
        grid=(N // TN,),
        in_specs=[
            pl.BlockSpec((R, TN), lambda i: (0, i)),       # image tile
            pl.BlockSpec((R, 1), lambda i: (0, 0)),        # scale per row (resident)
            pl.BlockSpec((R, 1), lambda i: (0, 0)),        # bias per row
            pl.BlockSpec((R, 1), lambda i: (0, 0)),        # invert x255 coeff per row
            pl.BlockSpec((R, 1), lambda i: (0, 0)),        # mean*255 per row
            pl.BlockSpec((R, 1), lambda i: (0, 0)),        # std*255 per row
            pl.BlockSpec((1, TN), lambda i: (0, i)),       # g_cut*(mask-1) lane tile
        ],
        out_specs=pl.BlockSpec((R, TN), lambda i: (0, i)),
        compiler_params=pltpu.CompilerParams(dimension_semantics=("parallel",)),
    )(img2d, rows(s_ch), rows(t_ch), rows(cinv_ch), rows(m255), rows(s255), cut_lane)
    return out2d.reshape(B, C, H, W)


# ================= Kernel B: affine_grid + grid_sample (STN application) ===============
def _make_stn_kernel(H, W, TM, n_out_tiles, n_src_tiles, nearest, compute_dtype):
    Hf, Wf = float(H), float(W)

    def kernel(theta_ref, obnd_ref, sbnd_ref, xn_ref, yn_ref, si_ref, sj_ref, img_ref,
               out_ref, acc_ref):
        b = pl.program_id(0)
        n = pl.program_id(1)
        mi = pl.program_id(2)

        @pl.when(mi == 0)
        def _():
            acc_ref[...] = jnp.zeros_like(acc_ref)

        base = b * 6
        t00 = theta_ref[base]
        t01 = theta_ref[base + 1]
        t02 = theta_ref[base + 2]
        t10 = theta_ref[base + 3]
        t11 = theta_ref[base + 4]
        t12 = theta_ref[base + 5]

        # ---- band check (all-scalar): this source tile can only contribute if its
        # row range intersects the conservative y-footprint of the output tile.
        xn_lo = obnd_ref[n]
        xn_hi = obnd_ref[n_out_tiles + n]
        yn_lo = obnd_ref[2 * n_out_tiles + n]
        yn_hi = obnd_ref[3 * n_out_tiles + n]
        a1 = t10 * xn_lo
        a2 = t10 * xn_hi
        c1 = t11 * yn_lo
        c2 = t11 * yn_hi
        ys_lo = jnp.minimum(a1, a2) + jnp.minimum(c1, c2) + t12
        ys_hi = jnp.maximum(a1, a2) + jnp.maximum(c1, c2) + t12
        yp_lo = ((ys_lo + 1.0) * Hf - 1.0) * 0.5
        yp_hi = ((ys_hi + 1.0) * Hf - 1.0) * 0.5
        r_lo = sbnd_ref[mi]
        r_hi = sbnd_ref[n_src_tiles + mi]
        overlap = jnp.logical_and(r_hi >= yp_lo - 1.0, r_lo <= yp_hi + 1.0)

        @pl.when(overlap)
        def _():
            # precomputed normalized output coords (align_corners=False base grid)
            xn = xn_ref[...]                               # (1, TN)
            yn = yn_ref[...]                               # (1, TN)
            xs = t00 * xn + t01 * yn + t02
            ys = t10 * xn + t11 * yn + t12
            # grid_sample unnormalization (align_corners=False)
            xp = ((xs + 1.0) * Wf - 1.0) * 0.5             # (1, TN)
            yp = ((ys + 1.0) * Hf - 1.0) * 0.5             # (1, TN)

            si = si_ref[...]                               # (TM, 1) source row index
            sj = sj_ref[...]                               # (TM, 1) source col index
            if nearest:
                # TODO(synk): PyTorch nearest rounds half-to-even; floor(x+0.5) differs only on exact .5 ties.
                w = jnp.where((si == jnp.floor(yp + 0.5)) & (sj == jnp.floor(xp + 0.5)),
                              1.0, 0.0)                    # (TM, TN)
            else:
                wy = jnp.maximum(0.0, 1.0 - jnp.abs(yp - si))
                wx = jnp.maximum(0.0, 1.0 - jnp.abs(xp - sj))
                w = wy * wx                                # (TM, TN); zero padding implicit

            # resident image, dynamic lane slice (start is a multiple of TM>=128)
            start = pl.multiple_of(mi * TM, TM)
            img_tile = img_ref[0, :, pl.ds(start, TM)]     # (C, TM)
            # pre-transposed weight tile: img (C,TM) @ w (TM,TN) -> (C,TN), no XLU transpose
            acc_ref[...] += lax.dot_general(
                img_tile.astype(compute_dtype), w.astype(compute_dtype),
                (((1,), (0,)), ((), ())), preferred_element_type=jnp.float32)

        @pl.when(mi == pl.num_programs(2) - 1)
        def _():
            out_ref[0] = acc_ref[...]

    return kernel


def stn_grid_sample(x, theta, nearest=False, tn_cap=1024, tm_cap=1024):
    # x: (B, C, H, W) f32; theta: (B, 2, 3) f32
    B, C, H, W = x.shape
    N = H * W
    TN = _pick_tile(N, tn_cap)
    TM = _pick_tile(N, tm_cap)
    n_out = N // TN
    n_src = N // TM
    x_flat = x.reshape(B, C, N).astype(jnp.float32)
    theta_flat = theta.reshape(B * 6).astype(jnp.float32)  # 1-D SMEM (avoids 2-D SMEM pad)

    # hoist all index construction out of the kernel (static numpy at trace time)
    idx = np.arange(N)
    row_i = (idx // W).astype(np.float32)
    col_j = (idx % W).astype(np.float32)
    xn = ((2.0 * col_j + 1.0) / W - 1.0).astype(np.float32)   # normalized out-x per out pixel
    yn = ((2.0 * row_i + 1.0) / H - 1.0).astype(np.float32)   # normalized out-y per out pixel
    # per-out-tile coord bounds and per-src-tile row bounds for the scalar band check
    obnd = np.concatenate([xn.reshape(n_out, TN).min(1), xn.reshape(n_out, TN).max(1),
                           yn.reshape(n_out, TN).min(1), yn.reshape(n_out, TN).max(1)])
    sbnd = np.concatenate([row_i.reshape(n_src, TM).min(1), row_i.reshape(n_src, TM).max(1)])

    kernel = _make_stn_kernel(H, W, TM, n_out, n_src, nearest,
                              jnp.bfloat16 if nearest else jnp.float32)
    out = pl.pallas_call(
        kernel,
        out_shape=jax.ShapeDtypeStruct((B, C, N), jnp.float32),
        grid=(B, n_out, n_src),
        in_specs=[
            pl.BlockSpec(memory_space=pltpu.MemorySpace.SMEM),       # theta (B*6,)
            pl.BlockSpec(memory_space=pltpu.MemorySpace.SMEM),       # out-tile coord bounds
            pl.BlockSpec(memory_space=pltpu.MemorySpace.SMEM),       # src-tile row bounds
            pl.BlockSpec((1, TN), lambda b, n, m: (0, n)),           # xn
            pl.BlockSpec((1, TN), lambda b, n, m: (0, n)),           # yn
            pl.BlockSpec((TM, 1), lambda b, n, m: (m, 0)),           # si
            pl.BlockSpec((TM, 1), lambda b, n, m: (m, 0)),           # sj
            pl.BlockSpec((1, C, N), lambda b, n, m: (b, 0, 0)),      # image resident / batch
        ],
        out_specs=pl.BlockSpec((1, C, TN), lambda b, n, m: (b, 0, n)),
        scratch_shapes=[pltpu.VMEM((C, TN), jnp.float32)],
        compiler_params=pltpu.CompilerParams(
            dimension_semantics=("parallel", "parallel", "arbitrary")),
    )(theta_flat, jnp.asarray(obnd, jnp.float32), jnp.asarray(sbnd, jnp.float32),
      jnp.asarray(xn.reshape(1, N)), jnp.asarray(yn.reshape(1, N)),
      jnp.asarray(row_i.reshape(N, 1)), jnp.asarray(col_j.reshape(N, 1)),
      x_flat)
    return out.reshape(B, C, H, W)


# ================================ plain-JAX glue ========================================
def relaxed_bernoulli(key, logits, temp=0.05):
    u = jax.random.uniform(key, logits.shape, jnp.float32)
    l = jnp.log(u) - jnp.log(1.0 - u)
    return jax.nn.sigmoid((l + logits) / temp)


def _stn_thetas(B, m_stn):
    # synthetic deterministic stand-ins for the pretrained DetectionFreezeSTN outputs
    c = 0.3
    zero = jnp.zeros((), jnp.float32)

    def eye():
        return jnp.tile(jnp.array([[1., 0., 0.], [0., 1., 0.]], jnp.float32)[None], (B, 1, 1))

    thetas = []
    thetas.append(eye().at[:, 0, 1].set(c * m_stn[0]))   # ShearX
    thetas.append(eye().at[:, 1, 0].set(c * m_stn[1]))   # ShearY
    thetas.append(eye().at[:, 0, 2].set(c * m_stn[2]))   # TranslateX
    thetas.append(eye().at[:, 1, 2].set(c * m_stn[3]))   # TranslateY
    ang = c * m_stn[4]                                   # Rotate
    rot = jnp.stack([jnp.stack([jnp.cos(ang), -jnp.sin(ang), zero]),
                     jnp.stack([jnp.sin(ang), jnp.cos(ang), zero])])
    thetas.append(jnp.tile(rot[None], (B, 1, 1)))
    return thetas


def init_params(key):
    probabilities = jnp.zeros((NUM_P,), jnp.float32)        # Parameter(torch.zeros(14))
    magnitudes = jnp.zeros((LEN_POLICIES,), jnp.float32)    # Parameter(torch.zeros(11))
    ka, kb = jax.random.split(key)
    # deterministic synthetic stand-ins for pretrained DetectionColorAugmentation weights
    color_a = 0.2 * jax.random.normal(ka, (NUM_COLOR, 3), jnp.float32)
    color_b = 0.1 * jax.random.normal(kb, (NUM_COLOR, 3), jnp.float32)
    return probabilities, magnitudes, color_a, color_b


def mulit_augmentation_forward(image, semantic_seg, params, key, solve_number):
    probabilities, magnitudes, color_a, color_b = params
    B, C, H, W = image.shape

    # _clamp + sigmoid + relaxed bernoulli + random subset (fully traced -> jittable)
    p = jax.nn.sigmoid(jnp.clip(probabilities, -10.0, 10.0))
    m = jax.nn.sigmoid(jnp.clip(magnitudes, -10.0, 10.0))
    k1, k2, k3, k4 = jax.random.split(key, 4)
    p = relaxed_bernoulli(k1, p)
    perm = jax.random.permutation(k2, NUM_P)
    sel = perm[:solve_number]
    sel_mask = jnp.zeros((NUM_P,), jnp.float32).at[sel].set(1.0)
    gates = p * sel_mask
    # TODO(synk): Equalize (histogram equalization) has no clean Pallas equivalent -> contribution dropped.
    gates = gates.at[IDX_EQUALIZE].set(0.0)

    # Cutout(128) coordinates, as in _gen_cutout_coord (traced, no host sync; one box per batch)
    size = 128
    hl = jax.random.randint(k3, (), 0, H)
    wl = jax.random.randint(k4, (), 0, W)
    u0 = jnp.maximum(0, hl - size // 2)
    u1 = jnp.maximum(0, wl - size // 2)
    l0 = jnp.minimum(H, hl + size // 2)
    l1 = jnp.minimum(W, wl + size // 2)
    rr = jnp.arange(H)[:, None]
    cc = jnp.arange(W)[None, :]
    inside = (rr >= u0) & (rr < l0) & (cc >= u1) & (cc < l1)
    cut_mask = jnp.where(inside, 0.0, 1.0).astype(jnp.float32)

    # color + no-learning ops fused in Pallas kernel A
    image = color_fuse(image.astype(jnp.float32), gates, m, color_a, color_b, cut_mask)

    # STN branch: blend affine matrices, then affine_grid + grid_sample (Pallas kernel B)
    stn_g = gates[NUM_COLOR:NUM_COLOR + NUM_STN]
    thetas = _stn_thetas(B, m[NUM_COLOR:NUM_COLOR + NUM_STN])
    eye23 = jnp.tile(jnp.array([[1., 0., 0.], [0., 1., 0.]], jnp.float32)[None], (B, 1, 1))
    H_total = eye23
    for k in range(NUM_STN):
        H_total = H_total + stn_g[k] * (thetas[k] - eye23)

    def _apply_stn(ops):
        img, seg = ops
        img2 = stn_grid_sample(img, H_total, nearest=False)
        if seg is None:
            return img2, None
        seg_f = seg.astype(jnp.float32) + 1.0
        seg_s = stn_grid_sample(seg_f, H_total, nearest=True)
        seg_s = jnp.where(seg_s == 0.0, 255.0, seg_s)
        seg_s = seg_s - 1.0
        seg_s = jnp.where(seg_s >= 20.0, 255.0, seg_s)
        # PyTorch .long(); int32 under default JAX config
        return img2, seg_s.astype(jnp.int32)
        # TODO(synk): forward_box (detection branch) filters boxes with data-dependent shapes
        #             (dynamic-length outputs) -> demo uses the semantic-seg branch instead.

    def _skip_stn(ops):
        return ops

    image, semantic_seg = lax.cond(jnp.any(stn_g > 0.0), _apply_stn, _skip_stn,
                                   (image, semantic_seg))
    return image, semantic_seg


if __name__ == "__main__":
    key = jax.random.PRNGKey(0)
    k_img, k_seg, k_param, k_fwd = jax.random.split(key, 4)
    B, C, H, W = 2, 3, 16, 16                    # C=3 matches the COCO mean/std in the module
    image = jax.random.normal(k_img, (B, C, H, W), jnp.float32)
    semantic_seg = jax.random.randint(k_seg, (B, 1, H, W), 0, 21).astype(jnp.int32)
    params = init_params(k_param)
    solve_number = NUM_P                          # select every op so both Pallas kernels run
    fwd = jax.jit(mulit_augmentation_forward, static_argnums=(4,))
    out_img, out_seg = fwd(image, semantic_seg, params, k_fwd, solve_number)
    jax.block_until_ready(out_img)
    jax.block_until_ready(out_seg)
    print("KERNEL_OK")
</pallas_src>

<mosaic_0001>
module attributes {stable_mosaic.version = 11 : i64} {
  func.func @_color_fuse_kernel(%arg0: i32, %arg1: memref<6x256xf32, #tpu.memory_space<vmem>>, %arg2: memref<6x1xf32, #tpu.memory_space<vmem>>, %arg3: memref<6x1xf32, #tpu.memory_space<vmem>>, %arg4: memref<6x1xf32, #tpu.memory_space<vmem>>, %arg5: memref<6x1xf32, #tpu.memory_space<vmem>>, %arg6: memref<6x1xf32, #tpu.memory_space<vmem>>, %arg7: memref<1x256xf32, #tpu.memory_space<vmem>>, %arg8: memref<6x256xf32, #tpu.memory_space<vmem>>) attributes {dimension_semantics = [#tpu.dimension_semantics<parallel>], iteration_bounds = array<i64: 1>, scalar_prefetch = 0 : i64, scratch_operands = 0 : i64, tpu.core_type = #tpu.core_type<tc>, window_params = [{transform_indices = @transform_0, window_bounds = array<i64: 6, 256>}, {pipeline_mode = #tpu.pipeline_mode<synchronous>, transform_indices = @transform_1, window_bounds = array<i64: 6, 1>}, {pipeline_mode = #tpu.pipeline_mode<synchronous>, transform_indices = @transform_2, window_bounds = array<i64: 6, 1>}, {pipeline_mode = #tpu.pipeline_mode<synchronous>, transform_indices = @transform_3, window_bounds = array<i64: 6, 1>}, {pipeline_mode = #tpu.pipeline_mode<synchronous>, transform_indices = @transform_4, window_bounds = array<i64: 6, 1>}, {pipeline_mode = #tpu.pipeline_mode<synchronous>, transform_indices = @transform_5, window_bounds = array<i64: 6, 1>}, {transform_indices = @transform_6, window_bounds = array<i64: 1, 256>}, {transform_indices = @transform_7, window_bounds = array<i64: 6, 256>}]} {
    %c0 = arith.constant 0 : index
    %c0_0 = arith.constant 0 : index
    %0 = vector.load %arg1[%c0, %c0_0] : memref<6x256xf32, #tpu.memory_space<vmem>>, vector<6x256xf32>
    %c0_1 = arith.constant 0 : index
    %c0_2 = arith.constant 0 : index
    %1 = vector.load %arg6[%c0_1, %c0_2] : memref<6x1xf32, #tpu.memory_space<vmem>>, vector<6x1xf32>
    %2 = vector.broadcast %1 : vector<6x1xf32> to vector<6x256xf32>
    %3 = arith.mulf %0, %2 : vector<6x256xf32>
    %c0_3 = arith.constant 0 : index
    %c0_4 = arith.constant 0 : index
    %4 = vector.load %arg5[%c0_3, %c0_4] : memref<6x1xf32, #tpu.memory_space<vmem>>, vector<6x1xf32>
    %5 = vector.broadcast %4 : vector<6x1xf32> to vector<6x256xf32>
    %6 = arith.addf %3, %5 : vector<6x256xf32>
    %cst = arith.constant 5.000000e-01 : f32
    %7 = vector.broadcast %cst : f32 to vector<6x256xf32>
    %8 = arith.addf %6, %7 : vector<6x256xf32>
    %9 = math.floor %8 : vector<6x256xf32>
    %cst_5 = arith.constant 0.000000e+00 : f32
    %cst_6 = arith.constant 2.550000e+02 : f32
    %10 = vector.broadcast %cst_5 : f32 to vector<6x256xf32>
    %11 = arith.maximumf %10, %9 : vector<6x256xf32>
    %12 = vector.broadcast %cst_6 : f32 to vector<6x256xf32>
    %13 = arith.minimumf %12, %11 : vector<6x256xf32>
    %c0_7 = arith.constant 0 : index
    %c0_8 = arith.constant 0 : index
    %14 = vector.load %arg2[%c0_7, %c0_8] : memref<6x1xf32, #tpu.memory_space<vmem>>, vector<6x1xf32>
    %c0_9 = arith.constant 0 : index
    %c0_10 = arith.constant 0 : index
    %15 = vector.load %arg7[%c0_9, %c0_10] : memref<1x256xf32, #tpu.memory_space<vmem>>, vector<1x256xf32>
    %16 = vector.broadcast %14 : vector<6x1xf32> to vector<6x256xf32>
    %17 = vector.broadcast %15 : vector<1x256xf32> to vector<6x256xf32>
    %18 = arith.addf %16, %17 : vector<6x256xf32>
    %19 = arith.mulf %0, %18 : vector<6x256xf32>
    %c0_11 = arith.constant 0 : index
    %c0_12 = arith.constant 0 : index
    %20 = vector.load %arg3[%c0_11, %c0_12] : memref<6x1xf32, #tpu.memory_space<vmem>>, vector<6x1xf32>
    %21 = vector.broadcast %20 : vector<6x1xf32> to vector<6x256xf32>
    %22 = arith.addf %19, %21 : vector<6x256xf32>
    %c0_13 = arith.constant 0 : index
    %c0_14 = arith.constant 0 : index
    %23 = vector.load %arg4[%c0_13, %c0_14] : memref<6x1xf32, #tpu.memory_space<vmem>>, vector<6x1xf32>
    %24 = vector.broadcast %23 : vector<6x1xf32> to vector<6x256xf32>
    %25 = arith.mulf %24, %13 : vector<6x256xf32>
    %26 = arith.addf %22, %25 : vector<6x256xf32>
    %c0_15 = arith.constant 0 : index
    %c0_16 = arith.constant 0 : index
    %27 = vector.load %arg8[%c0_15, %c0_16] : memref<6x256xf32, #tpu.memory_space<vmem>>, vector<6x256xf32>
    tpu.vector_store %arg8[%c0_15, %c0_16], %26 {strides = array<i32>} : memref<6x256xf32, #tpu.memory_space<vmem>>, vector<6x256xf32>,
    return
  }
  func.func @transform_0(%arg0: i32) -> (i32, i32) {
    %c0_i32 = arith.constant 0 : i32
    %c0_i32_0 = arith.constant 0 : i32
    return %c0_i32, %arg0 : i32, i32
  }
  func.func @transform_1(%arg0: i32) -> (i32, i32) {
    %c0_i32 = arith.constant 0 : i32
    %c0_i32_0 = arith.constant 0 : i32
    %c0_i32_1 = arith.constant 0 : i32
    return %c0_i32, %c0_i32_0 : i32, i32
  }
  func.func @transform_2(%arg0: i32) -> (i32, i32) {
    %c0_i32 = arith.constant 0 : i32
    %c0_i32_0 = arith.constant 0 : i32
    %c0_i32_1 = arith.constant 0 : i32
    return %c0_i32, %c0_i32_0 : i32, i32
  }
  func.func @transform_3(%arg0: i32) -> (i32, i32) {
    %c0_i32 = arith.constant 0 : i32
    %c0_i32_0 = arith.constant 0 : i32
    %c0_i32_1 = arith.constant 0 : i32
    return %c0_i32, %c0_i32_0 : i32, i32
  }
  func.func @transform_4(%arg0: i32) -> (i32, i32) {
    %c0_i32 = arith.constant 0 : i32
    %c0_i32_0 = arith.constant 0 : i32
    %c0_i32_1 = arith.constant 0 : i32
    return %c0_i32, %c0_i32_0 : i32, i32
  }
  func.func @transform_5(%arg0: i32) -> (i32, i32) {
    %c0_i32 = arith.constant 0 : i32
    %c0_i32_0 = arith.constant 0 : i32
    %c0_i32_1 = arith.constant 0 : i32
    return %c0_i32, %c0_i32_0 : i32, i32
  }
  func.func @transform_6(%arg0: i32) -> (i32, i32) {
    %c0_i32 = arith.constant 0 : i32
    %c0_i32_0 = arith.constant 0 : i32
    return %c0_i32, %arg0 : i32, i32
  }
  func.func @transform_7(%arg0: i32) -> (i32, i32) {
    %c0_i32 = arith.constant 0 : i32
    %c0_i32_0 = arith.constant 0 : i32
    return %c0_i32, %arg0 : i32, i32
  }
}

module attributes {stable_mosaic.version = 11 : i64} {
  func.func @kernel(%arg0: i32, %arg1: i32, %arg2: i32, %arg3: memref<12xf32, #tpu.memory_space<smem>>, %arg4: memref<4xf32, #tpu.memory_space<smem>>, %arg5: memref<2xf32, #tpu.memory_space<smem>>, %arg6: memref<1x256xf32, #tpu.memory_space<vmem>>, %arg7: memref<1x256xf32, #tpu.memory_space<vmem>>, %arg8: memref<256x1xf32, #tpu.memory_space<vmem>>, %arg9: memref<256x1xf32, #tpu.memory_space<vmem>>, %arg10: memref<1x3x256xf32, #tpu.memory_space<vmem>>, %arg11: memref<1x3x256xf32, #tpu.memory_space<vmem>>, %arg12: memref<3x256xf32, #tpu.memory_space<vmem>>) attributes {dimension_semantics = [#tpu.dimension_semantics<parallel>, #tpu.dimension_semantics<parallel>, #tpu.dimension_semantics<arbitrary>], iteration_bounds = array<i64: 2, 1, 1>, scalar_prefetch = 0 : i64, scratch_operands = 1 : i64, tpu.core_type = #tpu.core_type<tc>, window_params = [{transform_indices = @transform_0, window_bounds = array<i64: 12>}, {transform_indices = @transform_1, window_bounds = array<i64: 4>}, {transform_indices = @transform_2, window_bounds = array<i64: 2>}, {transform_indices = @transform_3, window_bounds = array<i64: 1, 256>}, {transform_indices = @transform_4, window_bounds = array<i64: 1, 256>}, {transform_indices = @transform_5, window_bounds = array<i64: 256, 1>}, {transform_indices = @transform_6, window_bounds = array<i64: 256, 1>}, {transform_indices = @transform_7, window_bounds = array<i64: 1, 3, 256>}, {transform_indices = @transform_8, window_bounds = array<i64: 1, 3, 256>}]} {
    %c0_i32 = arith.constant 0 : i32
    %0 = arith.cmpi eq, %arg2, %c0_i32 : i32
    %1 = arith.extui %0 : i1 to i32
    %c0_i32_0 = arith.constant 0 : i32
    %2 = arith.cmpi ne, %1, %c0_i32_0 : i32
    scf.if %2 {
      %cst_17 = arith.constant 0.000000e+00 : f32
      %67 = vector.broadcast %cst_17 : f32 to vector<3x256xf32>
      %c0 = arith.constant 0 : index
      %c0_18 = arith.constant 0 : index
      %68 = vector.load %arg12[%c0, %c0_18] : memref<3x256xf32, #tpu.memory_space<vmem>>, vector<3x256xf32>
      tpu.vector_store %arg12[%c0, %c0_18], %67 {strides = array<i32>} : memref<3x256xf32, #tpu.memory_space<vmem>>, vector<3x256xf32>,
    } else {
    }
    %c6_i32 = arith.constant 6 : i32
    %3 = arith.muli %arg0, %c6_i32 : i32
    %4 = arith.index_cast %3 : i32 to index
    %5 = memref.load %arg3[%4] : memref<12xf32, #tpu.memory_space<smem>>
    %c1_i32 = arith.constant 1 : i32
    %6 = arith.addi %3, %c1_i32 : i32
    %7 = arith.index_cast %6 : i32 to index
    %8 = memref.load %arg3[%7] : memref<12xf32, #tpu.memory_space<smem>>
    %c2_i32 = arith.constant 2 : i32
    %9 = arith.addi %3, %c2_i32 : i32
    %10 = arith.index_cast %9 : i32 to index
    %11 = memref.load %arg3[%10] : memref<12xf32, #tpu.memory_space<smem>>
    %c3_i32 = arith.constant 3 : i32
    %12 = arith.addi %3, %c3_i32 : i32
    %13 = arith.index_cast %12 : i32 to index
    %14 = memref.load %arg3[%13] : memref<12xf32, #tpu.memory_space<smem>>
    %c4_i32 = arith.constant 4 : i32
    %15 = arith.addi %3, %c4_i32 : i32
    %16 = arith.index_cast %15 : i32 to index
    %17 = memref.load %arg3[%16] : memref<12xf32, #tpu.memory_space<smem>>
    %c5_i32 = arith.constant 5 : i32
    %18 = arith.addi %3, %c5_i32 : i32
    %19 = arith.index_cast %18 : i32 to index
    %20 = memref.load %arg3[%19] : memref<12xf32, #tpu.memory_space<smem>>
    %21 = arith.index_cast %arg1 : i32 to index
    %22 = memref.load %arg4[%21] : memref<4xf32, #tpu.memory_space<smem>>
    %c1_i32_1 = arith.constant 1 : i32
    %23 = arith.addi %c1_i32_1, %arg1 : i32
    %24 = arith.index_cast %23 : i32 to index
    %25 = memref.load %arg4[%24] : memref<4xf32, #tpu.memory_space<smem>>
    %c2_i32_2 = arith.constant 2 : i32
    %26 = arith.addi %c2_i32_2, %arg1 : i32
    %27 = arith.index_cast %26 : i32 to index
    %28 = memref.load %arg4[%27] : memref<4xf32, #tpu.memory_space<smem>>
    %c3_i32_3 = arith.constant 3 : i32
    %29 = arith.addi %c3_i32_3, %arg1 : i32
    %30 = arith.index_cast %29 : i32 to index
    %31 = memref.load %arg4[%30] : memref<4xf32, #tpu.memory_space<smem>>
    %32 = arith.mulf %14, %22 : f32
    %33 = arith.mulf %14, %25 : f32
    %34 = arith.mulf %17, %28 : f32
    %35 = arith.mulf %17, %31 : f32
    %36 = arith.minimumf %32, %33 : f32
    %37 = arith.minimumf %34, %35 : f32
    %38 = arith.addf %36, %37 : f32
    %39 = arith.addf %38, %20 : f32
    %40 = arith.maximumf %32, %33 : f32
    %41 = arith.maximumf %34, %35 : f32
    %42 = arith.addf %40, %41 : f32
    %43 = arith.addf %42, %20 : f32
    %cst = arith.constant 1.000000e+00 : f32
    %44 = arith.addf %39, %cst : f32
    %cst_4 = arith.constant 1.600000e+01 : f32
    %45 = arith.mulf %44, %cst_4 : f32
    %cst_5 = arith.constant 1.000000e+00 : f32
    %46 = arith.subf %45, %cst_5 : f32
    %cst_6 = arith.constant 5.000000e-01 : f32
    %47 = arith.mulf %46, %cst_6 : f32
    %cst_7 = arith.constant 1.000000e+00 : f32
    %48 = arith.addf %43, %cst_7 : f32
    %cst_8 = arith.constant 1.600000e+01 : f32
    %49 = arith.mulf %48, %cst_8 : f32
    %cst_9 = arith.constant 1.000000e+00 : f32
    %50 = arith.subf %49, %cst_9 : f32
    %cst_10 = arith.constant 5.000000e-01 : f32
    %51 = arith.mulf %50, %cst_10 : f32
    %52 = arith.index_cast %arg2 : i32 to index
    %53 = memref.load %arg5[%52] : memref<2xf32, #tpu.memory_space<smem>>
    %c1_i32_11 = arith.constant 1 : i32
    %54 = arith.addi %c1_i32_11, %arg2 : i32
    %55 = arith.index_cast %54 : i32 to index
    %56 = memref.load %arg5[%55] : memref<2xf32, #tpu.memory_space<smem>>
    %cst_12 = arith.constant 1.000000e+00 : f32
    %57 = arith.subf %47, %cst_12 : f32
    %58 = arith.cmpf oge, %56, %57 : f32
    %cst_13 = arith.constant 1.000000e+00 : f32
    %59 = arith.addf %51, %cst_13 : f32
    %60 = arith.cmpf ole, %53, %59 : f32
    %61 = arith.andi %58, %60 : i1
    %62 = arith.extui %61 : i1 to i32
    %c0_i32_14 = arith.constant 0 : i32
    %63 = arith.cmpi ne, %62, %c0_i32_14 : i32
    scf.if %63 {
      %c0 = arith.constant 0 : index
      %c0_17 = arith.constant 0 : index
      %67 = vector.load %arg6[%c0, %c0_17] : memref<1x256xf32, #tpu.memory_space<vmem>>, vector<1x256xf32>
      %c0_18 = arith.constant 0 : index
      %c0_19 = arith.constant 0 : index
      %68 = vector.load %arg7[%c0_18, %c0_19] : memref<1x256xf32, #tpu.memory_space<vmem>>, vector<1x256xf32>
      %69 = vector.broadcast %5 : f32 to vector<1x256xf32>
      %70 = arith.mulf %69, %67 : vector<1x256xf32>
      %71 = vector.broadcast %8 : f32 to vector<1x256xf32>
      %72 = arith.mulf %71, %68 : vector<1x256xf32>
      %73 = arith.addf %70, %72 : vector<1x256xf32>
      %74 = vector.broadcast %11 : f32 to vector<1x256xf32>
      %75 = arith.addf %73, %74 : vector<1x256xf32>
      %76 = vector.broadcast %14 : f32 to vector<1x256xf32>
      %77 = arith.mulf %76, %67 : vector<1x256xf32>
      %78 = vector.broadcast %17 : f32 to vector<1x256xf32>
      %79 = arith.mulf %78, %68 : vector<1x256xf32>
      %80 = arith.addf %77, %79 : vector<1x256xf32>
      %81 = vector.broadcast %20 : f32 to vector<1x256xf32>
      %82 = arith.addf %80, %81 : vector<1x256xf32>
      %cst_20 = arith.constant 1.000000e+00 : f32
      %83 = vector.broadcast %cst_20 : f32 to vector<1x256xf32>
      %84 = arith.addf %75, %83 : vector<1x256xf32>
      %cst_21 = arith.constant 1.600000e+01 : f32
      %85 = vector.broadcast %cst_21 : f32 to vector<1x256xf32>
      %86 = arith.mulf %84, %85 : vector<1x256xf32>
      %cst_22 = arith.constant 1.000000e+00 : f32
      %87 = vector.broadcast %cst_22 : f32 to vector<1x256xf32>
      %88 = arith.subf %86, %87 : vector<1x256xf32>
      %cst_23 = arith.constant 5.000000e-01 : f32
      %89 = vector.broadcast %cst_23 : f32 to vector<1x256xf32>
      %90 = arith.mulf %88, %89 : vector<1x256xf32>
      %cst_24 = arith.constant 1.000000e+00 : f32
      %91 = vector.broadcast %cst_24 : f32 to vector<1x256xf32>
      %92 = arith.addf %82, %91 : vector<1x256xf32>
      %cst_25 = arith.constant 1.600000e+01 : f32
      %93 = vector.broadcast %cst_25 : f32 to vector<1x256xf32>
      %94 = arith.mulf %92, %93 : vector<1x256xf32>
      %cst_26 = arith.constant 1.000000e+00 : f32
      %95 = vector.broadcast %cst_26 : f32 to vector<1x256xf32>
      %96 = arith.subf %94, %95 : vector<1x256xf32>
      %cst_27 = arith.constant 5.000000e-01 : f32
      %97 = vector.broadcast %cst_27 : f32 to vector<1x256xf32>
      %98 = arith.mulf %96, %97 : vector<1x256xf32>
      %c0_28 = arith.constant 0 : index
      %c0_29 = arith.constant 0 : index
      %99 = vector.load %arg8[%c0_28, %c0_29] : memref<256x1xf32, #tpu.memory_space<vmem>>, vector<256x1xf32>
      %c0_30 = arith.constant 0 : index
      %c0_31 = arith.constant 0 : index
      %100 = vector.load %arg9[%c0_30, %c0_31] : memref<256x1xf32, #tpu.memory_space<vmem>>, vector<256x1xf32>
      %101 = vector.broadcast %98 : vector<1x256xf32> to vector<256x256xf32>
      %102 = vector.broadcast %99 : vector<256x1xf32> to vector<256x256xf32>
      %103 = arith.subf %101, %102 : vector<256x256xf32>
      %104 = math.absf %103 : vector<256x256xf32>
      %cst_32 = arith.constant 1.000000e+00 : f32
      %105 = vector.broadcast %cst_32 : f32 to vector<256x256xf32>
      %106 = arith.subf %105, %104 : vector<256x256xf32>
      %cst_33 = arith.constant 0.000000e+00 : f32
      %107 = vector.broadcast %cst_33 : f32 to vector<256x256xf32>
      %108 = arith.maximumf %107, %106 : vector<256x256xf32>
      %109 = vector.broadcast %90 : vector<1x256xf32> to vector<256x256xf32>
      %110 = vector.broadcast %100 : vector<256x1xf32> to vector<256x256xf32>
      %111 = arith.subf %109, %110 : vector<256x256xf32>
      %112 = math.absf %111 : vector<256x256xf32>
      %cst_34 = arith.constant 1.000000e+00 : f32
      %113 = vector.broadcast %cst_34 : f32 to vector<256x256xf32>
      %114 = arith.subf %113, %112 : vector<256x256xf32>
      %cst_35 = arith.constant 0.000000e+00 : f32
      %115 = vector.broadcast %cst_35 : f32 to vector<256x256xf32>
      %116 = arith.maximumf %115, %114 : vector<256x256xf32>
      %117 = arith.mulf %108, %116 : vector<256x256xf32>
      %c256_i32 = arith.constant 256 : i32
      %118 = arith.muli %arg2, %c256_i32 : i32
      %119 = tpu.assume_multiple %118, 256 : i32
      %c0_36 = arith.constant 0 : index
      %c0_37 = arith.constant 0 : index
      %120 = arith.index_cast %119 : i32 to index
      %121 = vector.load %arg10[%c0_36, %c0_37, %120] : memref<1x3x256xf32, #tpu.memory_space<vmem>>, vector<1x3x256xf32>
      %122 = vector.shape_cast %121 : vector<1x3x256xf32> to vector<3x256xf32>
      %c0_38 = arith.constant 0 : index
      %c0_39 = arith.constant 0 : index
      %123 = vector.load %arg12[%c0_38, %c0_39] : memref<3x256xf32, #tpu.memory_space<vmem>>, vector<3x256xf32>
      %cst_40 = arith.constant dense<0.000000e+00> : vector<3x256xf32>
      %124 = tpu.matmul %122, %117, %cst_40 {dimension_numbers = #tpu.dot_dimension_numbers<[1], [0], [0], [1], [0, 0, 1, 1], [], []>} : vector<3x256xf32>, vector<256x256xf32>, vector<3x256xf32> -> vector<3x256xf32>
      %125 = arith.addf %123, %124 : vector<3x256xf32>
      %c0_41 = arith.constant 0 : index
      %c0_42 = arith.constant 0 : index
      %126 = vector.load %arg12[%c0_41, %c0_42] : memref<3x256xf32, #tpu.memory_space<vmem>>, vector<3x256xf32>
      tpu.vector_store %arg12[%c0_41, %c0_42], %125 {strides = array<i32>} : memref<3x256xf32, #tpu.memory_space<vmem>>, vector<3x256xf32>,
    } else {
    }
    %c0_i32_15 = arith.constant 0 : i32
    %64 = arith.cmpi eq, %arg2, %c0_i32_15 : i32
    %65 = arith.extui %64 : i1 to i32
    %c0_i32_16 = arith.constant 0 : i32
    %66 = arith.cmpi ne, %65, %c0_i32_16 : i32
    scf.if %66 {
      %c0 = arith.constant 0 : index
      %c0_17 = arith.constant 0 : index
      %67 = vector.load %arg12[%c0, %c0_17] : memref<3x256xf32, #tpu.memory_space<vmem>>, vector<3x256xf32>
      %c0_18 = arith.constant 0 : index
      %c0_19 = arith.constant 0 : index
      %c0_20 = arith.constant 0 : index
      %68 = vector.load %arg11[%c0_18, %c0_19, %c0_20] : memref<1x3x256xf32, #tpu.memory_space<vmem>>, vector<1x3x256xf32>
      %69 = vector.shape_cast %68 : vector<1x3x256xf32> to vector<3x256xf32>
      %70 = vector.shape_cast %67 : vector<3x256xf32> to vector<1x3x256xf32>
      tpu.vector_store %arg11[%c0_18, %c0_19, %c0_20], %70 {strides = array<i32>} : memref<1x3x256xf32, #tpu.memory_space<vmem>>, vector<1x3x256xf32>,
    } else {
    }
    return
  }
  func.func @transform_0(%arg0: i32, %arg1: i32, %arg2: i32) -> i32 {
    %c0_i32 = arith.constant 0 : i32
    %c0_i32_0 = arith.constant 0 : i32
    return %c0_i32 : i32
  }
  func.func @transform_1(%arg0: i32, %arg1: i32, %arg2: i32) -> i32 {
    %c0_i32 = arith.constant 0 : i32
    %c0_i32_0 = arith.constant 0 : i32
    return %c0_i32 : i32
  }
  func.func @transform_2(%arg0: i32, %arg1: i32, %arg2: i32) -> i32 {
    %c0_i32 = arith.constant 0 : i32
    %c0_i32_0 = arith.constant 0 : i32
    return %c0_i32 : i32
  }
  func.func @transform_3(%arg0: i32, %arg1: i32, %arg2: i32) -> (i32, i32) {
    %c0_i32 = arith.constant 0 : i32
    %c0_i32_0 = arith.constant 0 : i32
    return %c0_i32, %arg1 : i32, i32
  }
  func.func @transform_4(%arg0: i32, %arg1: i32, %arg2: i32) -> (i32, i32) {
    %c0_i32 = arith.constant 0 : i32
    %c0_i32_0 = arith.constant 0 : i32
    return %c0_i32, %arg1 : i32, i32
  }
  func.func @transform_5(%arg0: i32, %arg1: i32, %arg2: i32) -> (i32, i32) {
    %c0_i32 = arith.constant 0 : i32
    %c0_i32_0 = arith.constant 0 : i32
    return %arg2, %c0_i32 : i32, i32
  }
  func.func @transform_6(%arg0: i32, %arg1: i32, %arg2: i32) -> (i32, i32) {
    %c0_i32 = arith.constant 0 : i32
    %c0_i32_0 = arith.constant 0 : i32
    return %arg2, %c0_i32 : i32, i32
  }
  func.func @transform_7(%arg0: i32, %arg1: i32, %arg2: i32) -> (i32, i32, i32) {
    %c0_i32 = arith.constant 0 : i32
    %c0_i32_0 = arith.constant 0 : i32
    %c0_i32_1 = arith.constant 0 : i32
    return %arg0, %c0_i32, %c0_i32_0 : i32, i32, i32
  }
  func.func @transform_8(%arg0: i32, %arg1: i32, %arg2: i32) -> (i32, i32, i32) {
    %c0_i32 = arith.constant 0 : i32
    %c0_i32_0 = arith.constant 0 : i32
    return %arg0, %c0_i32, %arg1 : i32, i32, i32
  }
}

module attributes {stable_mosaic.version = 11 : i64} {
  func.func @kernel(%arg0: i32, %arg1: i32, %arg2: i32, %arg3: memref<12xf32, #tpu.memory_space<smem>>, %arg4: memref<4xf32, #tpu.memory_space<smem>>, %arg5: memref<2xf32, #tpu.memory_space<smem>>, %arg6: memref<1x256xf32, #tpu.memory_space<vmem>>, %arg7: memref<1x256xf32, #tpu.memory_space<vmem>>, %arg8: memref<256x1xf32, #tpu.memory_space<vmem>>, %arg9: memref<256x1xf32, #tpu.memory_space<vmem>>, %arg10: memref<1x1x256xf32, #tpu.memory_space<vmem>>, %arg11: memref<1x1x256xf32, #tpu.memory_space<vmem>>, %arg12: memref<1x256xf32, #tpu.memory_space<vmem>>) attributes {dimension_semantics = [#tpu.dimension_semantics<parallel>, #tpu.dimension_semantics<parallel>, #tpu.dimension_semantics<arbitrary>], iteration_bounds = array<i64: 2, 1, 1>, scalar_prefetch = 0 : i64, scratch_operands = 1 : i64, tpu.core_type = #tpu.core_type<tc>, window_params = [{transform_indices = @transform_0, window_bounds = array<i64: 12>}, {transform_indices = @transform_1, window_bounds = array<i64: 4>}, {transform_indices = @transform_2, window_bounds = array<i64: 2>}, {transform_indices = @transform_3, window_bounds = array<i64: 1, 256>}, {transform_indices = @transform_4, window_bounds = array<i64: 1, 256>}, {transform_indices = @transform_5, window_bounds = array<i64: 256, 1>}, {transform_indices = @transform_6, window_bounds = array<i64: 256, 1>}, {transform_indices = @transform_7, window_bounds = array<i64: 1, 1, 256>}, {transform_indices = @transform_8, window_bounds = array<i64: 1, 1, 256>}]} {
    %c0_i32 = arith.constant 0 : i32
    %0 = arith.cmpi eq, %arg2, %c0_i32 : i32
    %1 = arith.extui %0 : i1 to i32
    %c0_i32_0 = arith.constant 0 : i32
    %2 = arith.cmpi ne, %1, %c0_i32_0 : i32
    scf.if %2 {
      %cst_17 = arith.constant 0.000000e+00 : f32
      %67 = vector.broadcast %cst_17 : f32 to vector<1x256xf32>
      %c0 = arith.constant 0 : index
      %c0_18 = arith.constant 0 : index
      %68 = vector.load %arg12[%c0, %c0_18] : memref<1x256xf32, #tpu.memory_space<vmem>>, vector<1x256xf32>
      tpu.vector_store %arg12[%c0, %c0_18], %67 {strides = array<i32>} : memref<1x256xf32, #tpu.memory_space<vmem>>, vector<1x256xf32>,
    } else {
    }
    %c6_i32 = arith.constant 6 : i32
    %3 = arith.muli %arg0, %c6_i32 : i32
    %4 = arith.index_cast %3 : i32 to index
    %5 = memref.load %arg3[%4] : memref<12xf32, #tpu.memory_space<smem>>
    %c1_i32 = arith.constant 1 : i32
    %6 = arith.addi %3, %c1_i32 : i32
    %7 = arith.index_cast %6 : i32 to index
    %8 = memref.load %arg3[%7] : memref<12xf32, #tpu.memory_space<smem>>
    %c2_i32 = arith.constant 2 : i32
    %9 = arith.addi %3, %c2_i32 : i32
    %10 = arith.index_cast %9 : i32 to index
    %11 = memref.load %arg3[%10] : memref<12xf32, #tpu.memory_space<smem>>
    %c3_i32 = arith.constant 3 : i32
    %12 = arith.addi %3, %c3_i32 : i32
    %13 = arith.index_cast %12 : i32 to index
    %14 = memref.load %arg3[%13] : memref<12xf32, #tpu.memory_space<smem>>
    %c4_i32 = arith.constant 4 : i32
    %15 = arith.addi %3, %c4_i32 : i32
    %16 = arith.index_cast %15 : i32 to index
    %17 = memref.load %arg3[%16] : memref<12xf32, #tpu.memory_space<smem>>
    %c5_i32 = arith.constant 5 : i32
    %18 = arith.addi %3, %c5_i32 : i32
    %19 = arith.index_cast %18 : i32 to index
    %20 = memref.load %arg3[%19] : memref<12xf32, #tpu.memory_space<smem>>
    %21 = arith.index_cast %arg1 : i32 to index
    %22 = memref.load %arg4[%21] : memref<4xf32, #tpu.memory_space<smem>>
    %c1_i32_1 = arith.constant 1 : i32
    %23 = arith.addi %c1_i32_1, %arg1 : i32
    %24 = arith.index_cast %23 : i32 to index
    %25 = memref.load %arg4[%24] : memref<4xf32, #tpu.memory_space<smem>>
    %c2_i32_2 = arith.constant 2 : i32
    %26 = arith.addi %c2_i32_2, %arg1 : i32
    %27 = arith.index_cast %26 : i32 to index
    %28 = memref.load %arg4[%27] : memref<4xf32, #tpu.memory_space<smem>>
    %c3_i32_3 = arith.constant 3 : i32
    %29 = arith.addi %c3_i32_3, %arg1 : i32
    %30 = arith.index_cast %29 : i32 to index
    %31 = memref.load %arg4[%30] : memref<4xf32, #tpu.memory_space<smem>>
    %32 = arith.mulf %14, %22 : f32
    %33 = arith.mulf %14, %25 : f32
    %34 = arith.mulf %17, %28 : f32
    %35 = arith.mulf %17, %31 : f32
    %36 = arith.minimumf %32, %33 : f32
    %37 = arith.minimumf %34, %35 : f32
    %38 = arith.addf %36, %37 : f32
    %39 = arith.addf %38, %20 : f32
    %40 = arith.maximumf %32, %33 : f32
    %41 = arith.maximumf %34, %35 : f32
    %42 = arith.addf %40, %41 : f32
    %43 = arith.addf %42, %20 : f32
    %cst = arith.constant 1.000000e+00 : f32
    %44 = arith.addf %39, %cst : f32
    %cst_4 = arith.constant 1.600000e+01 : f32
    %45 = arith.mulf %44, %cst_4 : f32
    %cst_5 = arith.constant 1.000000e+00 : f32
    %46 = arith.subf %45, %cst_5 : f32
    %cst_6 = arith.constant 5.000000e-01 : f32
    %47 = arith.mulf %46, %cst_6 : f32
    %cst_7 = arith.constant 1.000000e+00 : f32
    %48 = arith.addf %43, %cst_7 : f32
    %cst_8 = arith.constant 1.600000e+01 : f32
    %49 = arith.mulf %48, %cst_8 : f32
    %cst_9 = arith.constant 1.000000e+00 : f32
    %50 = arith.subf %49, %cst_9 : f32
    %cst_10 = arith.constant 5.000000e-01 : f32
    %51 = arith.mulf %50, %cst_10 : f32
    %52 = arith.index_cast %arg2 : i32 to index
    %53 = memref.load %arg5[%52] : memref<2xf32, #tpu.memory_space<smem>>
    %c1_i32_11 = arith.constant 1 : i32
    %54 = arith.addi %c1_i32_11, %arg2 : i32
    %55 = arith.index_cast %54 : i32 to index
    %56 = memref.load %arg5[%55] : memref<2xf32, #tpu.memory_space<smem>>
    %cst_12 = arith.constant 1.000000e+00 : f32
    %57 = arith.subf %47, %cst_12 : f32
    %58 = arith.cmpf oge, %56, %57 : f32
    %cst_13 = arith.constant 1.000000e+00 : f32
    %59 = arith.addf %51, %cst_13 : f32
    %60 = arith.cmpf ole, %53, %59 : f32
    %61 = arith.andi %58, %60 : i1
    %62 = arith.extui %61 : i1 to i32
    %c0_i32_14 = arith.constant 0 : i32
    %63 = arith.cmpi ne, %62, %c0_i32_14 : i32
    scf.if %63 {
      %c0 = arith.constant 0 : index
      %c0_17 = arith.constant 0 : index
      %67 = vector.load %arg6[%c0, %c0_17] : memref<1x256xf32, #tpu.memory_space<vmem>>, vector<1x256xf32>
      %c0_18 = arith.constant 0 : index
      %c0_19 = arith.constant 0 : index
      %68 = vector.load %arg7[%c0_18, %c0_19] : memref<1x256xf32, #tpu.memory_space<vmem>>, vector<1x256xf32>
      %69 = vector.broadcast %5 : f32 to vector<1x256xf32>
      %70 = arith.mulf %69, %67 : vector<1x256xf32>
      %71 = vector.broadcast %8 : f32 to vector<1x256xf32>
      %72 = arith.mulf %71, %68 : vector<1x256xf32>
      %73 = arith.addf %70, %72 : vector<1x256xf32>
      %74 = vector.broadcast %11 : f32 to vector<1x256xf32>
      %75 = arith.addf %73, %74 : vector<1x256xf32>
      %76 = vector.broadcast %14 : f32 to vector<1x256xf32>
      %77 = arith.mulf %76, %67 : vector<1x256xf32>
      %78 = vector.broadcast %17 : f32 to vector<1x256xf32>
      %79 = arith.mulf %78, %68 : vector<1x256xf32>
      %80 = arith.addf %77, %79 : vector<1x256xf32>
      %81 = vector.broadcast %20 : f32 to vector<1x256xf32>
      %82 = arith.addf %80, %81 : vector<1x256xf32>
      %cst_20 = arith.constant 1.000000e+00 : f32
      %83 = vector.broadcast %cst_20 : f32 to vector<1x256xf32>
      %84 = arith.addf %75, %83 : vector<1x256xf32>
      %cst_21 = arith.constant 1.600000e+01 : f32
      %85 = vector.broadcast %cst_21 : f32 to vector<1x256xf32>
      %86 = arith.mulf %84, %85 : vector<1x256xf32>
      %cst_22 = arith.constant 1.000000e+00 : f32
      %87 = vector.broadcast %cst_22 : f32 to vector<1x256xf32>
      %88 = arith.subf %86, %87 : vector<1x256xf32>
      %cst_23 = arith.constant 5.000000e-01 : f32
      %89 = vector.broadcast %cst_23 : f32 to vector<1x256xf32>
      %90 = arith.mulf %88, %89 : vector<1x256xf32>
      %cst_24 = arith.constant 1.000000e+00 : f32
      %91 = vector.broadcast %cst_24 : f32 to vector<1x256xf32>
      %92 = arith.addf %82, %91 : vector<1x256xf32>
      %cst_25 = arith.constant 1.600000e+01 : f32
      %93 = vector.broadcast %cst_25 : f32 to vector<1x256xf32>
      %94 = arith.mulf %92, %93 : vector<1x256xf32>
      %cst_26 = arith.constant 1.000000e+00 : f32
      %95 = vector.broadcast %cst_26 : f32 to vector<1x256xf32>
      %96 = arith.subf %94, %95 : vector<1x256xf32>
      %cst_27 = arith.constant 5.000000e-01 : f32
      %97 = vector.broadcast %cst_27 : f32 to vector<1x256xf32>
      %98 = arith.mulf %96, %97 : vector<1x256xf32>
      %c0_28 = arith.constant 0 : index
      %c0_29 = arith.constant 0 : index
      %99 = vector.load %arg8[%c0_28, %c0_29] : memref<256x1xf32, #tpu.memory_space<vmem>>, vector<256x1xf32>
      %c0_30 = arith.constant 0 : index
      %c0_31 = arith.constant 0 : index
      %100 = vector.load %arg9[%c0_30, %c0_31] : memref<256x1xf32, #tpu.memory_space<vmem>>, vector<256x1xf32>
      %cst_32 = arith.constant 5.000000e-01 : f32
      %101 = vector.broadcast %cst_32 : f32 to vector<1x256xf32>
      %102 = arith.addf %98, %101 : vector<1x256xf32>
      %103 = math.floor %102 : vector<1x256xf32>
      %104 = vector.broadcast %99 : vector<256x1xf32> to vector<256x256xf32>
      %105 = vector.broadcast %103 : vector<1x256xf32> to vector<256x256xf32>
      %106 = arith.cmpf oeq, %104, %105 : vector<256x256xf32>
      %cst_33 = arith.constant 5.000000e-01 : f32
      %107 = vector.broadcast %cst_33 : f32 to vector<1x256xf32>
      %108 = arith.addf %90, %107 : vector<1x256xf32>
      %109 = math.floor %108 : vector<1x256xf32>
      %110 = vector.broadcast %100 : vector<256x1xf32> to vector<256x256xf32>
      %111 = vector.broadcast %109 : vector<1x256xf32> to vector<256x256xf32>
      %112 = arith.cmpf oeq, %110, %111 : vector<256x256xf32>
      %113 = arith.andi %106, %112 : vector<256x256xi1>
      %cst_34 = arith.constant 1.000000e+00 : f32
      %cst_35 = arith.constant 0.000000e+00 : f32
      %114 = vector.broadcast %cst_34 : f32 to vector<256x256xf32>
      %115 = vector.broadcast %cst_35 : f32 to vector<256x256xf32>
      %116 = arith.select %113, %114, %115 : vector<256x256xi1>, vector<256x256xf32>
      %c256_i32 = arith.constant 256 : i32
      %117 = arith.muli %arg2, %c256_i32 : i32
      %118 = tpu.assume_multiple %117, 256 : i32
      %c0_36 = arith.constant 0 : index
      %c0_37 = arith.constant 0 : index
      %119 = arith.index_cast %118 : i32 to index
      %120 = vector.load %arg10[%c0_36, %c0_37, %119] : memref<1x1x256xf32, #tpu.memory_space<vmem>>, vector<1x1x256xf32>
      %121 = vector.shape_cast %120 : vector<1x1x256xf32> to vector<1x256xf32>
      %c0_38 = arith.constant 0 : index
      %c0_39 = arith.constant 0 : index
      %122 = vector.load %arg12[%c0_38, %c0_39] : memref<1x256xf32, #tpu.memory_space<vmem>>, vector<1x256xf32>
      %123 = arith.truncf %121 : vector<1x256xf32> to vector<1x256xbf16>
      %124 = arith.truncf %116 : vector<256x256xf32> to vector<256x256xbf16>
      %cst_40 = arith.constant dense<0.000000e+00> : vector<1x256xf32>
      %125 = tpu.matmul %123, %124, %cst_40 {dimension_numbers = #tpu.dot_dimension_numbers<[1], [0], [0], [1], [0, 0, 1, 1], [], []>} : vector<1x256xbf16>, vector<256x256xbf16>, vector<1x256xf32> -> vector<1x256xf32>
      %126 = arith.addf %122, %125 : vector<1x256xf32>
      %c0_41 = arith.constant 0 : index
      %c0_42 = arith.constant 0 : index
      %127 = vector.load %arg12[%c0_41, %c0_42] : memref<1x256xf32, #tpu.memory_space<vmem>>, vector<1x256xf32>
      tpu.vector_store %arg12[%c0_41, %c0_42], %126 {strides = array<i32>} : memref<1x256xf32, #tpu.memory_space<vmem>>, vector<1x256xf32>,
    } else {
    }
    %c0_i32_15 = arith.constant 0 : i32
    %64 = arith.cmpi eq, %arg2, %c0_i32_15 : i32
    %65 = arith.extui %64 : i1 to i32
    %c0_i32_16 = arith.constant 0 : i32
    %66 = arith.cmpi ne, %65, %c0_i32_16 : i32
    scf.if %66 {
      %c0 = arith.constant 0 : index
      %c0_17 = arith.constant 0 : index
      %67 = vector.load %arg12[%c0, %c0_17] : memref<1x256xf32, #tpu.memory_space<vmem>>, vector<1x256xf32>
      %c0_18 = arith.constant 0 : index
      %c0_19 = arith.constant 0 : index
      %c0_20 = arith.constant 0 : index
      %68 = vector.load %arg11[%c0_18, %c0_19, %c0_20] : memref<1x1x256xf32, #tpu.memory_space<vmem>>, vector<1x1x256xf32>
      %69 = vector.shape_cast %68 : vector<1x1x256xf32> to vector<1x256xf32>
      %70 = vector.shape_cast %67 : vector<1x256xf32> to vector<1x1x256xf32>
      tpu.vector_store %arg11[%c0_18, %c0_19, %c0_20], %70 {strides = array<i32>} : memref<1x1x256xf32, #tpu.memory_space<vmem>>, vector<1x1x256xf32>,
    } else {
    }
    return
  }
  func.func @transform_0(%arg0: i32, %arg1: i32, %arg2: i32) -> i32 {
    %c0_i32 = arith.constant 0 : i32
    %c0_i32_0 = arith.constant 0 : i32
    return %c0_i32 : i32
  }
  func.func @transform_1(%arg0: i32, %arg1: i32, %arg2: i32) -> i32 {
    %c0_i32 = arith.constant 0 : i32
    %c0_i32_0 = arith.constant 0 : i32
    return %c0_i32 : i32
  }
  func.func @transform_2(%arg0: i32, %arg1: i32, %arg2: i32) -> i32 {
    %c0_i32 = arith.constant 0 : i32
    %c0_i32_0 = arith.constant 0 : i32
    return %c0_i32 : i32
  }
  func.func @transform_3(%arg0: i32, %arg1: i32, %arg2: i32) -> (i32, i32) {
    %c0_i32 = arith.constant 0 : i32
    %c0_i32_0 = arith.constant 0 : i32
    return %c0_i32, %arg1 : i32, i32
  }
  func.func @transform_4(%arg0: i32, %arg1: i32, %arg2: i32) -> (i32, i32) {
    %c0_i32 = arith.constant 0 : i32
    %c0_i32_0 = arith.constant 0 : i32
    return %c0_i32, %arg1 : i32, i32
  }
  func.func @transform_5(%arg0: i32, %arg1: i32, %arg2: i32) -> (i32, i32) {
    %c0_i32 = arith.constant 0 : i32
    %c0_i32_0 = arith.constant 0 : i32
    return %arg2, %c0_i32 : i32, i32
  }
  func.func @transform_6(%arg0: i32, %arg1: i32, %arg2: i32) -> (i32, i32) {
    %c0_i32 = arith.constant 0 : i32
    %c0_i32_0 = arith.constant 0 : i32
    return %arg2, %c0_i32 : i32, i32
  }
  func.func @transform_7(%arg0: i32, %arg1: i32, %arg2: i32) -> (i32, i32, i32) {
    %c0_i32 = arith.constant 0 : i32
    %c0_i32_0 = arith.constant 0 : i32
    %c0_i32_1 = arith.constant 0 : i32
    return %arg0, %c0_i32, %c0_i32_0 : i32, i32, i32
  }
  func.func @transform_8(%arg0: i32, %arg1: i32, %arg2: i32) -> (i32, i32, i32) {
    %c0_i32 = arith.constant 0 : i32
    %c0_i32_0 = arith.constant 0 : i32
    return %arg0, %c0_i32, %arg1 : i32, i32, i32
  }
}

</mosaic_0001>

<bundles_post_ra>
// kernel: tile.60
= control target key start
LH: loop header
LB: loop body
LE: loop exit
PB: predicated region body
PF: predicated region fallthrough
CT: control target
= control target key end

     0   :  { %s22_s0 = inlined_call_operand.vmem [shape: f32[3], index: 0, kind: input, shape index: {}]   ;;  %s23_s1 = inlined_call_operand.vmem [shape: f32[2,3], index: 1, kind: output, shape index: {}]  }
   0x1   :  { %v4_v0 = vld [vmem:[%s22_s0] ss:$0 sm:$0xff] }
   0x2   :  { %5 = vst [vmem:[%s23_s1] sm:$0x3] %v4_v0 }

// kernel: tile.1
= control target key start
LH: loop header
LB: loop body
LE: loop exit
PB: predicated region body
PF: predicated region fallthrough
CT: control target
= control target key end

     0   :  { %s26_s8 = smov 126   ;;  %vm7_vm0 = vcmask 7168   ;;  %s49_s0 = inlined_call_operand.vmem [shape: f32[2,3], index: 0, kind: input, shape index: {}]   ;;  %s50_s1 = inlined_call_operand.vmem [shape: f32[6,1], index: 1, kind: output, shape index: {}]  }
   0x1   :  { %v4_v0 = vld [vmem:[%s49_s0] sm:$0x3]  ;;  %s25_s0 = smov 127  }
   0x2   :  { %5 = vst [vmem:[#allocation0] sm:$0x3] %v4_v0 }
   0x9   :  { %v9_v1 = vld [vmem:[#allocation0] sm:$0x3]  }
   0xa   :  { %10 = vrot.lane.b32.xlu0 %v9_v1, %s25_s0  ;;  %v15_v2 = vld [vmem:[#allocation0] sm:$0x3]  }
   0xb   :  { %v6_v3 = vld [vmem:[#allocation0] sm:$0x3]  }
   0xc   :  { %8 = vst.msk [vmem:[%s50_s1] ss:$3 sm:$0x3] %vm7_vm0, %v6_v3  }
  0x12   :  { %16 = vrot.lane.b32.xlu0 %v15_v2, %s26_s8 }
  0x7c   :  { %v11_v4 = vpop.permute.xlu0 %10  }
  0x7d   :  { %21 = vst.msk [vmem:[%s50_s1 + $0x1] ss:$3 sm:$0x3] %vm7_vm0, %v11_v4  }
  0x84   :  { %v17_v5 = vpop.permute.xlu0 %16  }
  0x85   :  { %22 = vst.msk [vmem:[%s50_s1 + $0x2] ss:$3 sm:$0x3] %vm7_vm0, %v17_v5  }

// kernel: mulit_augmentation_forward.3
= control target key start
LH: loop header
LB: loop body
LE: loop exit
PB: predicated region body
PF: predicated region fallthrough
CT: control target
= control target key end

     0   :  { %v96_v0 = vmov 0   ;;  %s167_s5 = inlined_call_operand.vmem [shape: f32[6,1], index: 5, kind: input, shape index: {}]   ;;  %s168_s1 = inlined_call_operand.vmem [shape: f32[6,1], index: 1, kind: input, shape index: {}]   ;;  %s169_s3 = inlined_call_operand.vmem [shape: f32[6,1], index: 3, kind: input, shape index: {}]   ;;  %s170_s4 = inlined_call_operand.vmem [shape: f32[6,1], index: 4, kind: input, shape index: {}]   ;;  %s171_s2 = inlined_call_operand.vmem [shape: f32[6,1], index: 2, kind: input, shape index: {}]   ;;  %s172_s0 = inlined_call_operand.vmem [shape: f32[6,256], index: 0, kind: input, shape index: {}]   ;;  %s173_s6 = inlined_call_operand.vmem [shape: f32[1,256], index: 6, kind: input, shape index: {}]   ;;  %s174_s7 = inlined_call_operand.vmem [shape: f32[6,256], index: 7, kind: output, shape index: {}]  }
   0x1   :  { %93 = vset.pattern.permute.xlu0 %v96_v0  ;;  %v28_v1 = vld [vmem:[%s167_s5] sm:$0x3f]  ;;  %94 = vset.pattern.permute.xlu1 %v96_v0  ;;  %v27_v8 = vld [vmem:[%s172_s0 + $0x8] sm:$0x3f] }
   0x2   :  { %v52_v2 = vld [vmem:[%s168_s1] sm:$0x3f]  ;;  %31 = vperm.xlu0 %93, %v28_v1   ;;  %95 = vset.pattern.permute.xlu2 %v96_v0 }
   0x3   :  { %56 = vperm.xlu1 %94, %v52_v2   ;;  %v76_v3 = vld [vmem:[%s169_s3] sm:$0x3f] }
   0x4   :  { %79 = vperm.xlu2 %95, %v76_v3   ;;  %v36_v4 = vld [vmem:[%s170_s4] sm:$0x3f] }
   0x5   :  { %v68_v5 = vld [vmem:[%s171_s2] sm:$0x3f] }
   0x6   :  { %v26_v7 = vld [vmem:[%s172_s0] sm:$0x3f] }
   0x7   :  { %v53_v9 = vld [vmem:[%s173_s6] sm:$0x3] }
   0x8   :  { %v60_v13 = vperm.slane %v53_v9, 0  ;;  %v61_v14 = vperm.slane %v53_v9, 1 }
   0xa   :  { %39 = vperm.xlu0 %93, %v36_v4  }
   0xb   :  { %71 = vperm.xlu1 %94, %v68_v5  }
  0x5e   :  { %v80_v29 = vpop.permute.xlu2 %79 }
  0x74   :  { %v32_v6 = vpop.permute.xlu0 %31 }
  0x75   :  { %v57_v10 = vpop.permute.xlu1 %56  ;;  %v34_v11 = vmul.f32 %v32_v6, %v26_v7  ;;  %v35_v12 = vmul.f32 %v32_v6, %v27_v8 }
  0x76   :  { %v64_v18 = vadd.f32 %v60_v13, %v57_v10  ;;  %v65_v19 = vadd.f32 %v61_v14, %v57_v10 }
  0x78   :  { %v66_v26 = vmul.f32 %v64_v18, %v26_v7  ;;  %v67_v27 = vmul.f32 %v65_v19, %v27_v8 }
  0x7c   :  { %v40_v15 = vpop.permute.xlu0 %39 }
  0x7d   :  { %v42_v16 = vadd.f32 %v40_v15, %v34_v11  ;;  %v43_v17 = vadd.f32 %v40_v15, %v35_v12  ;;  %v72_v28 = vpop.permute.xlu1 %71 }
  0x7e   :  { %v74_v32 = vadd.f32 %v72_v28, %v66_v26  ;;  %v75_v33 = vadd.f32 %v72_v28, %v67_v27 }
  0x7f   :  { %v44_v20 = vadd.f32 0.5, %v42_v16  ;;  %v45_v21 = vadd.f32 0.5, %v43_v17 }
  0x81   :  { %v46_v22 = vfloor.f32 %v44_v20  ;;  %v47_v23 = vfloor.f32 %v45_v21 }
  0x83   :  { %v48_v24 = vmax.f32 %v46_v22, 0.0  ;;  %v49_v25 = vmax.f32 %v47_v23, 0.0 }
  0x85   :  { %v50_v30 = vmin.f32 %v48_v24, 255.0  ;;  %v51_v31 = vmin.f32 %v49_v25, 255.0 }
  0x87   :  { %v82_v34 = vmul.f32 %v80_v29, %v50_v30  ;;  %v83_v35 = vmul.f32 %v80_v29, %v51_v31 }
  0x89   :  { %v84_v36 = vadd.f32 %v82_v34, %v74_v32  ;;  %v85_v37 = vadd.f32 %v83_v35, %v75_v33 }
  0x8b   :  { %86 = vst [vmem:[%s174_s7] sm:$0x3f] %v84_v36 }
  0x8c   :  { %87 = vst [vmem:[%s174_s7 + $0x8] sm:$0x3f] %v85_v37 }

// kernel: branch_1_fun.10
= control target key start
LH: loop header
LB: loop body
LE: loop exit
PB: predicated region body
PF: predicated region fallthrough
CT: control target
= control target key end

     0   :  { %s2677_s0 = inlined_call_operand.vmem [shape: f32[12], index: 0, kind: input, shape index: {}]   ;;  %s2678_s1 = inlined_call_operand.vmem [shape: f32[4], index: 1, kind: input, shape index: {}]   ;;  %s2679_s2 = inlined_call_operand.vmem [shape: f32[2], index: 2, kind: input, shape index: {}]   ;;  %s2680_s3 = inlined_call_operand.vmem [shape: f32[1,256], index: 3, kind: input, shape index: {}]   ;;  %s2681_s4 = inlined_call_operand.vmem [shape: f32[1,256], index: 4, kind: input, shape index: {}]   ;;  %s2682_s5 = inlined_call_operand.hbm [shape: f32[256,1], index: 5, kind: input, shape index: {}]   ;;  %s2683_s6 = inlined_call_operand.hbm [shape: f32[256,1], index: 6, kind: input, shape index: {}]   ;;  %s2684_s7 = inlined_call_operand.vmem [shape: f32[2,3,256], index: 7, kind: input, shape index: {}]   ;;  %s2685_s8 = inlined_call_operand.vmem [shape: f32[2,3,256], index: 8, kind: output, shape index: {}]  }
   0x1   :  { %2694 = sst [smem:[#allocation40_spill]] %s2677_s0 }
   0x2   :  { %2695 = sst [smem:[#allocation41_spill]] %s2678_s1 }
   0x3   :  { %2696 = sst [smem:[#allocation42_spill]] %s2679_s2 }
   0x4   :  { %2697 = sst [smem:[#allocation43_spill]] %s2682_s5 }
   0x5   :  { %2698 = sst [smem:[#allocation44_spill]] %s2683_s6 }
   0x6   :  { %2699 = sst [smem:[#allocation45_spill]] %s2684_s7 }
   0x7   :  { %2700 = sst [smem:[#allocation46_spill]] %s2685_s8 }
   0x8   :  { %13 = vsyncpa [#allocation5], 0 }
   0x9   :  { %14 = vsyncpa [#allocation7], 0 }
   0xa   :  { %15 = vsyncpa [#allocation4], 0 }
   0xb   :  { %16 = vsyncpa [#allocation11], 0  ;;  %s2102_s27 = smov 0   ;;  %s2104_s28 = smov 0  }
   0xc   :  { %s2106_s29 = smov 0  }
   0xd LB: > { %2701 = sst [smem:[#allocation16_spill]] %s2042_s28  ;;  %s1787_s11 = sadd.s32 4294967295, %s2046_s29   ;;  %s2046_s29 = sphi %s2106_s29, %s22_s29   ;;  %s2042_s28 = sphi %s2104_s28, %s2771_s28   ;;  %s2038_s27 = sphi %s2102_s27, %s2770_s27  }
   0xe   : > { %2702 = sst [smem:[#allocation17_spill]] %s2046_s29  ;;  %p1789_p0 = scmp.ge.s32.totalorder %s2046_s29, 1 }
   0xf   : > { %s2703_s1 = sld [smem:[#allocation41_spill]]  ;;  %p267_p1 = scmp.lt.s32.totalorder %s2046_s29, 3 }
  0x10   : > { %p2123_p2 = scmp.eq.s32.totalorder %s1787_s11, 0  ;;  %s41_s14 = sadd.s32 1, %s2042_s28 }
  0x11   : > { %p2127_p3 = pnand %p1789_p0, %p267_p1  ;;  %s2706_s0 = sld [smem:[#allocation40_spill]] }
  0x12   : > { %p43_p6 = scmp.ge.s32.totalorder %s41_s14, 2  ;;  %s2708_s2 = sld [smem:[#allocation42_spill]] }
  0x13   : > { %p1841_p4 = pneg %p2127_p3  ;;  %s2048_s22 = smov [#allocation6]  }
  0x14   : > { %s2773_s14 = smov (%p43_p6, %s41_s14), 0  ;;  %s2049_s23 = smov [#allocation3]  }
  0x15   : > { %s289_s10 = sshll.u32 %s2703_s1, 4  ;;  %p2139_p5 = pnand %p2123_p2, %p1841_p4  ;;  %s290_s10 = int_to_ptr.vmem [resolvable:$true] %s289_s10 }
  0x16   : > { %2709 = sst [smem:[#allocation18_spill]] %s2773_s14  ;;  %s2050_s24 = smov [#allocation8]  }
  0x17   : > { %s279_s17 = sshll.u32 %s2706_s0, 4  ;;  %s2710_s5 = sld [smem:[#allocation43_spill]]  ;;  %s280_s17 = int_to_ptr.vmem [resolvable:$true] %s279_s17 }
  0x18   : > { %s299_s21 = sshll.u32 %s2708_s2, 4  ;;  %s2051_s9 = smov [#allocation9]   ;;  %s300_s21 = int_to_ptr.vmem [resolvable:$true] %s299_s21 }
  0x19   : > { %1847 = dma.vmem_to_smem (!%p2139_p5), %s290_s10, 16, %s2048_s22, [#allocation7]  }
  0x1a   : > { %1844 = dma.vmem_to_smem (!%p2139_p5), %s280_s17, 16, %s2049_s23, [#allocation5]  }
  0x1b   : > { %1850 = dma.vmem_to_smem (!%p2139_p5), %s300_s21, 16, %s2050_s24, [#allocation7]  }
  0x1c   : > { %s329_s11 = sshll.u32 %s2051_s9, 4  ;;  %s2711_s6 = sld [smem:[#allocation44_spill]]  ;;  %s330_s11 = int_to_ptr.vmem [resolvable:$true] %s329_s11 }
  0x1d   : > { %s327_s30 = sshll.u32 %s2710_s5, 4  ;;  %s2052_s19 = smov 128   ;;  %s328_s30 = int_to_ptr.hbm [resolvable:$true] %s327_s30 }
  0x1e   : > { %s2053_s20 = smov 8   ;;  %s2054_s17 = smov [#allocation10]  }
  0x1f   : > { %1853 = dma.hbm_to_vmem [thread:$0]  (!%p2139_p5), %s328_s30, 4096, %s330_s11, [#allocation4], %s2052_s19, %s2052_s19, %s2053_s20  }
  0x20   : > { %s346_s22 = sshll.u32 %s2054_s17, 4  ;;  %370 = sbr.rel (%p2127_p3) target bundleno = 541 (0x21d), region = 52  ;;  %s347_s22 = int_to_ptr.vmem [resolvable:$true] %s346_s22 }
  0x22   : > { %s344_s16 = sshll.u32 %s2711_s6, 4  ;;  %s345_s16 = int_to_ptr.hbm [resolvable:$true] %s344_s16 }
  0x23   : > { %1856 = dma.hbm_to_vmem [thread:$0]  (!%p2139_p5), %s345_s16, 4096, %s347_s22, [#allocation11], %s2052_s19, %s2052_s19, %s2053_s20  }
  0x25   : > { %2021 = dma.done.wait (%p2123_p2), [#allocation5], 16  }
  0x26   : > { %2023 = vsyncadd (%p2123_p2), [#allocation5], 4294967280 }
  0x27   : > { %2025 = dma.done.wait (%p2123_p2), [#allocation7], 32  }
  0x28   : > { %2027 = vsyncadd (%p2123_p2), [#allocation7], 4294967264 }
  0x29   : > { %2029 = dma.done.wait (%p2123_p2), [#allocation4], 4096  }
  0x2a   : > { %2031 = vsyncadd (%p2123_p2), [#allocation4], 4294963200 }
  0x2b   : > { %2033 = dma.done.wait (%p2123_p2), [#allocation11], 4096  }
  0x2c   : > { %2035 = vsyncadd (%p2123_p2), [#allocation11], 4294963200 }
  0x2d   : > { %397 = sfence }
  0x2e   : > { %p450_p7 = scmp.lt.s32.totalorder %s2038_s27, 1  ;;  %v2055_v0 = vmov 0.0   ;;  %s470_s13 = smul.u32 6, %s2038_s27 }
  0x2f   : > { %469 = vst [vmem:[#allocation2] sm:$0x77] %v2055_v0  ;;  %s482_s18 = sld [smem:[#allocation6]] }
  0x30   : > { %s2775_s27 = smov (!%p450_p7, %s2038_s27), 1  ;;  %s2185_s21 = sld [smem:[#allocation3 + %s470_s13]] }
  0x31   : > { %s472_s23 = sadd.s32 1, %s470_s13  ;;  %s1819_s24 = sshll.u32 %s2775_s27, 3 }
  0x32   : > { %s2187_s25 = sld [smem:[#allocation3 + %s472_s23]]  ;;  %s474_s10 = sadd.s32 2, %s470_s13 }
  0x33   : > { %s2712_s7 = sld [smem:[#allocation45_spill]]  ;;  %s476_s16 = sadd.s32 3, %s470_s13 }
  0x34   : > { %s2714_s8 = sld [smem:[#allocation46_spill]]  ;;  %s478_s20 = sadd.s32 4, %s470_s13 }
  0x35   : > { %s2199_s19 = sld [smem:[#allocation3 + %s474_s10]]  ;;  %s480_s26 = sadd.s32 5, %s470_s13 }
  0x36   : > { %s2201_s17 = sld [smem:[#allocation3 + %s476_s16]] }
  0x37   : > { %s2203_s27 = sld [smem:[#allocation3 + %s478_s20]] }
  0x38   : > { %s1808_s22 = sld [smem:[#allocation6 + $0x1]] }
  0x39   : > { %s2192_s12 = scalar_lea.vmem %s2712_s7, %s1819_s24  ;;  %s1809_s23 = sld [smem:[#allocation6 + $0x2]] }
  0x3a   : > { %2713 = sst [smem:[#allocation19_spill]] %s2192_s12  ;;  %s2197_s15 = scalar_lea.vmem %s2714_s8, %s1819_s24 }
  0x3b   : > { %2715 = sst [smem:[#allocation20_spill]] %s2197_s15 }
  0x3c   : > { %2716 = sst [smem:[#allocation21_spill]] %s2199_s19  ;;  %s489_s9 = smul.f32 %s482_s18, %s2201_s17 }
  0x3d   : > { %s1810_s30 = sld [smem:[#allocation6 + $0x3]] }
  0x3e   : > { %s2206_s24 = sld [smem:[#allocation3 + %s480_s26]]  ;;  %s490_s11 = smul.f32 %s1808_s22, %s2201_s17 }
  0x3f   : > { %s491_s10 = smul.f32 %s1809_s23, %s2203_s27  ;;  %s1813_s29 = sld [smem:[#allocation8 + $0x1]] }
  0x40   : > { %s493_s16 = smin.f32 %s490_s11, %s489_s9  ;;  %s497_s1 = smax.f32 %s490_s11, %s489_s9 }
  0x41   : > { %s509_s26 = sld [smem:[#allocation8]] }
  0x43   : > { %s492_s0 = smul.f32 %s1810_s30, %s2203_s27 }
  0x45   : > { %s494_s2 = smin.f32 %s492_s0, %s491_s10  ;;  %s498_s5 = smax.f32 %s492_s0, %s491_s10 }
  0x46   : > { %s495_s20 = sadd.f32 %s494_s2, %s493_s16 }
  0x47   : > { %s499_s6 = sadd.f32 %s498_s5, %s497_s1 }
  0x48   : > { %s496_s7 = sadd.f32 %s495_s20, %s2206_s24 }
  0x49   : > { %s500_s8 = sadd.f32 %s499_s6, %s2206_s24 }
  0x4a   : > { %s501_s14 = sadd.f32 1.0, %s496_s7 }
  0x4b   : > { %s505_s28 = sadd.f32 1.0, %s500_s8 }
  0x4c   : > { %s502_s13 = smul.f32 16.0, %s501_s14 }
  0x4d   : > { %s506_s18 = smul.f32 16.0, %s505_s28 }
  0x4e   : > { %s1811_s15 = sadd.f32 -1.0, %s502_s13 }
  0x4f   : > { %s1812_s12 = sadd.f32 -1.0, %s506_s18 }
  0x50   : > { %s504_s19 = smul.f32 0.5, %s1811_s15 }
  0x51   : > { %s508_s22 = smul.f32 0.5, %s1812_s12 }
  0x52   : > { %s1814_s23 = sadd.f32 -1.0, %s504_s19 }
  0x53   : > { %s514_s30 = sadd.f32 1.0, %s508_s22 }
  0x54   : > { %p513_p8 = scmp.ge.f32.partialorder %s1813_s29, %s1814_s23 }
  0x55   : > { %p515_p9 = scmp.le.f32.partialorder %s509_s26, %s514_s30 }
  0x57   : > { %p516_p10 = pnand %p515_p9, %p513_p8 }
  0x59   : > { %519 = sbr.rel (%p516_p10) target bundleno = 533 (0x215), region = 80 }
  0x5e   : > { %v548_v1 = vld [vmem:[#allocation9 + $0x20] sm:$0xff]  ;;  %v546_v2 = vld [vmem:[#allocation9 + $0x10] sm:$0xff]  ;;  %v2056_v4 = vmov 0   ;;  %v549_v5 = vld [vmem:[#allocation9 + $0x28] sm:$0xff]  ;;  %v529_v48 = vstv %s2201_s17  ;;  %v531_v49 = vstv %s2203_s27  ;;  %v534_v57 = vstv %s2206_s24  ;;  %s2717_s6 = sld [smem:[#allocation21_spill]] }
  0x5f   : > { %v544_v3 = vld [vmem:[#allocation9] sm:$0xff]  ;;  %1902 = vset.pattern.permute.xlu2 %v2056_v4  ;;  %1901 = vset.pattern.permute.xlu1 %v2056_v4  ;;  %v547_v6 = vld [vmem:[#allocation9 + $0x18] sm:$0xff]  ;;  %v545_v7 = vld [vmem:[#allocation9 + $0x8] sm:$0xff]  ;;  %s2740_s7 = sld [smem:[#allocation19_spill]]  ;;  %vm1610_vm0 = vcmask 1043456  }
  0x60   : > { %1900 = vset.pattern.permute.xlu0 %v2056_v4  ;;  %635 = vperm.xlu2 %1902, %v548_v1   ;;  %v552_v8 = vld [vmem:[#allocation9 + $0x40] sm:$0xff]  ;;  %v551_v9 = vld [vmem:[#allocation9 + $0x38] sm:$0xff]  ;;  %v550_v10 = vld [vmem:[#allocation9 + $0x30] sm:$0xff] }
  0x61   : > { %625 = vperm.xlu1 %1901, %v546_v2   ;;  %615 = vperm.xlu0 %1900, %v544_v3   ;;  %v555_v11 = vld [vmem:[#allocation9 + $0x58] sm:$0xff]  ;;  %v554_v12 = vld [vmem:[#allocation9 + $0x50] sm:$0xff]  ;;  %v553_v13 = vld [vmem:[#allocation9 + $0x48] sm:$0xff] }
  0x62   : > { %v558_v14 = vld [vmem:[#allocation9 + $0x70] sm:$0xff]  ;;  %v557_v15 = vld [vmem:[#allocation9 + $0x68] sm:$0xff]  ;;  %v556_v16 = vld [vmem:[#allocation9 + $0x60] sm:$0xff] }
  0x63   : > { %v561_v17 = vld [vmem:[#allocation9 + $0x88] sm:$0xff]  ;;  %v560_v18 = vld [vmem:[#allocation9 + $0x80] sm:$0xff]  ;;  %v559_v19 = vld [vmem:[#allocation9 + $0x78] sm:$0xff] }
  0x64   : > { %v564_v20 = vld [vmem:[#allocation9 + $0xa0] sm:$0xff]  ;;  %v563_v21 = vld [vmem:[#allocation9 + $0x98] sm:$0xff]  ;;  %v562_v22 = vld [vmem:[#allocation9 + $0x90] sm:$0xff] }
  0x65   : > { %v567_v23 = vld [vmem:[#allocation9 + $0xb8] sm:$0xff]  ;;  %v566_v24 = vld [vmem:[#allocation9 + $0xb0] sm:$0xff]  ;;  %v565_v25 = vld [vmem:[#allocation9 + $0xa8] sm:$0xff] }
  0x66   : > { %v570_v26 = vld [vmem:[#allocation9 + $0xd0] sm:$0xff]  ;;  %v569_v27 = vld [vmem:[#allocation9 + $0xc8] sm:$0xff]  ;;  %v568_v28 = vld [vmem:[#allocation9 + $0xc0] sm:$0xff] }
  0x67   : > { %v591_v29 = vld [vmem:[#allocation10 + $0x78] sm:$0xff]  ;;  %v590_v32 = vld [vmem:[#allocation10 + $0x70] sm:$0xff]  ;;  %v589_v35 = vld [vmem:[#allocation10 + $0x68] sm:$0xff] }
  0x68   : > { %640 = vperm.xlu2 %1902, %v549_v5   ;;  %v575_v30 = vld [vmem:[#allocation9 + $0xf8] sm:$0xff]  ;;  %v574_v33 = vld [vmem:[#allocation9 + $0xf0] sm:$0xff]  ;;  %v573_v36 = vld [vmem:[#allocation9 + $0xe8] sm:$0xff] }
  0x69   : > { %630 = vperm.xlu1 %1901, %v547_v6   ;;  %620 = vperm.xlu0 %1900, %v545_v7   ;;  %v571_v31 = vld [vmem:[#allocation9 + $0xd8] sm:$0xff]  ;;  %v606_v37 = vld [vmem:[#allocation10 + $0xf0] sm:$0xff]  ;;  %v588_v39 = vld [vmem:[#allocation10 + $0x60] sm:$0xff] }
  0x6a   : > { %v607_v34 = vld [vmem:[#allocation10 + $0xf8] sm:$0xff]  ;;  %v572_v40 = vld [vmem:[#allocation9 + $0xe0] sm:$0xff]  ;;  %v605_v41 = vld [vmem:[#allocation10 + $0xe8] sm:$0xff] }
  0x6b   : > { %v603_v43 = vld [vmem:[#allocation10 + $0xd8] sm:$0xff]  ;;  %v604_v45 = vld [vmem:[#allocation10 + $0xe0] sm:$0xff]  ;;  %v520_v46 = vld [vmem:[%s2680_s3] sm:$0x3] }
  0x6c   : > { %v587_v44 = vld [vmem:[#allocation10 + $0x58] sm:$0xff]  ;;  %v521_v47 = vld [vmem:[%s2681_s4] sm:$0x3]  ;;  %v530_v51 = vmul.f32 %v529_v48, %v520_v46  ;;  %v585_v53 = vld [vmem:[#allocation10 + $0x48] sm:$0xff] }
  0x6d   : > { %v532_v52 = vmul.f32 %v531_v49, %v521_v47  ;;  %v602_v54 = vld [vmem:[#allocation10 + $0xd0] sm:$0xff]  ;;  %v600_v62 = vld [vmem:[#allocation10 + $0xc0] sm:$0xff]  ;;  %v601_v0 = vld [vmem:[#allocation10 + $0xc8] sm:$0xff] }
  0x6e   : > { %v586_v55 = vld [vmem:[#allocation10 + $0x50] sm:$0xff]  ;;  %v584_v63 = vld [vmem:[#allocation10 + $0x40] sm:$0xff]  ;;  %v599_v7 = vld [vmem:[#allocation10 + $0xb8] sm:$0xff] }
  0x6f   : > { %v533_v56 = vadd.f32 %v532_v52, %v530_v51  ;;  %v582_v6 = vld [vmem:[#allocation10 + $0x30] sm:$0xff] }
  0x70   : > { %655 = vperm.xlu2 %1902, %v552_v8   ;;  %v583_v8 = vld [vmem:[#allocation10 + $0x38] sm:$0xff] }
  0x71   : > { %650 = vperm.xlu1 %1901, %v551_v9   ;;  %645 = vperm.xlu0 %1900, %v550_v10   ;;  %v535_v59 = vadd.f32 %v534_v57, %v533_v56  ;;  %v522_v10 = vstv %s2185_s21 }
  0x73   : > { %v540_v1 = vadd.f32 1.0, %v535_v59 }
  0x75   : > { %v541_v3 = vmul.f32 16.0, %v540_v1  ;;  %v594_v1 = vld [vmem:[#allocation10 + $0x90] sm:$0xff] }
  0x77   : > { %v1816_v9 = vadd.f32 -1.0, %v541_v3 }
  0x78   : > { %670 = vperm.xlu2 %1902, %v555_v11   ;;  %v524_v11 = vstv %s2187_s25 }
  0x79   : > { %665 = vperm.xlu1 %1901, %v554_v12   ;;  %660 = vperm.xlu0 %1900, %v553_v13   ;;  %v543_v13 = vmul.f32 0.5, %v1816_v9  ;;  %v578_v9 = vld [vmem:[#allocation10 + $0x10] sm:$0xff] }
  0x80   : > { %685 = vperm.xlu2 %1902, %v558_v14  }
  0x81   : > { %680 = vperm.xlu1 %1901, %v557_v15   ;;  %675 = vperm.xlu0 %1900, %v556_v16   ;;  %v523_v16 = vmul.f32 %v522_v10, %v520_v46  ;;  %v595_v10 = vld [vmem:[#allocation10 + $0x98] sm:$0xff] }
  0x88   : > { %700 = vperm.xlu2 %1902, %v561_v17   ;;  %v525_v17 = vmul.f32 %v524_v11, %v521_v47 }
  0x89   : > { %695 = vperm.xlu1 %1901, %v560_v18   ;;  %690 = vperm.xlu0 %1900, %v559_v19   ;;  %v597_v18 = vld [vmem:[#allocation10 + $0xa8] sm:$0xff] }
  0x8a   : > { %v581_v19 = vld [vmem:[#allocation10 + $0x28] sm:$0xff] }
  0x90   : > { %715 = vperm.xlu2 %1902, %v564_v20   ;;  %v598_v20 = vld [vmem:[#allocation10 + $0xb0] sm:$0xff] }
  0x91   : > { %710 = vperm.xlu1 %1901, %v563_v21   ;;  %705 = vperm.xlu0 %1900, %v562_v22   ;;  %v2248_v21 = vperm.slane %v543_v13, 0  ;;  %v2250_v22 = vperm.slane %v543_v13, 1 }
  0x93   : > { %2718 = vst [vmem:[#allocation22_spill] sm:$0xff] %v2248_v21 }
  0x98   : > { %730 = vperm.xlu2 %1902, %v567_v23   ;;  %v526_v23 = vadd.f32 %v525_v17, %v523_v16 }
  0x99   : > { %725 = vperm.xlu1 %1901, %v566_v24   ;;  %720 = vperm.xlu0 %1900, %v565_v25   ;;  %v527_v24 = vstv %s2717_s6 }
  0xa0   : > { %745 = vperm.xlu2 %1902, %v570_v26  }
  0xa1   : > { %740 = vperm.xlu1 %1901, %v569_v27   ;;  %735 = vperm.xlu0 %1900, %v568_v28  }
  0xa8   : > { %1111 = vperm.xlu2 %1902, %v591_v29  }
  0xa9   : > { %770 = vperm.xlu1 %1901, %v575_v30   ;;  %750 = vperm.xlu0 %1900, %v571_v31   ;;  %v528_v31 = vadd.f32 %v527_v24, %v526_v23 }
  0xb0   : > { %1106 = vperm.xlu2 %1902, %v590_v32  }
  0xb1   : > { %765 = vperm.xlu1 %1901, %v574_v33   ;;  %1191 = vperm.xlu0 %1900, %v607_v34  }
  0xb8   : > { %1101 = vperm.xlu2 %1902, %v589_v35   ;;  %v579_v35 = vld [vmem:[#allocation10 + $0x18] sm:$0xff] }
  0xb9   : > { %760 = vperm.xlu1 %1901, %v573_v36   ;;  %1186 = vperm.xlu0 %1900, %v606_v37  }
  0xba   : > { %v2213_v38 = vpop.permute.xlu2 %635 }
  0xbb   : > { %v781_v25 = vsub.f32 %v2248_v21, %v2213_v38  ;;  %v782_v26 = vsub.f32 %v2250_v22, %v2213_v38  ;;  %v596_v38 = vld [vmem:[#allocation10 + $0xa0] sm:$0xff] }
  0xbd   : > { %v845_v32 = vand.u32 2147483647, %v781_v25  ;;  %v846_v33 = vand.u32 2147483647, %v782_v26 }
  0xc0   : > { %1096 = vperm.xlu2 %1902, %v588_v39   ;;  %v580_v39 = vld [vmem:[#allocation10 + $0x20] sm:$0xff] }
  0xc1   : > { %755 = vperm.xlu1 %1901, %v572_v40   ;;  %1181 = vperm.xlu0 %1900, %v605_v41   ;;  %v536_v41 = vadd.f32 1.0, %v528_v31 }
  0xc2   : > { %v2215_v42 = vpop.permute.xlu2 %640 }
  0xc3   : > { %v783_v27 = vsub.f32 %v2248_v21, %v2215_v42  ;;  %v784_v34 = vsub.f32 %v2250_v22, %v2215_v42  ;;  %v910_v42 = vsub.f32 1.0, %v846_v33  ;;  %v537_v56 = vmul.f32 16.0, %v536_v41 }
  0xc5   : > { %v847_v36 = vand.u32 2147483647, %v783_v27  ;;  %v848_v46 = vand.u32 2147483647, %v784_v34  ;;  %v1815_v16 = vadd.f32 -1.0, %v537_v56 }
  0xc7   : > { %v911_v47 = vsub.f32 1.0, %v847_v36 }
  0xc8   : > { %1171 = vperm.xlu2 %1902, %v603_v43  }
  0xc9   : > { %1091 = vperm.xlu1 %1901, %v587_v44   ;;  %1176 = vperm.xlu0 %1900, %v604_v45   ;;  %v909_v45 = vsub.f32 1.0, %v845_v32  ;;  %v2295_v3 = vmax.f32 %v911_v47, 0.0 }
  0xca   : > { %v2225_v50 = vpop.permute.xlu2 %655 }
  0xcb   : > { %v789_v37 = vsub.f32 %v2248_v21, %v2225_v50  ;;  %v790_v40 = vsub.f32 %v2250_v22, %v2225_v50 }
  0xcd   : > { %v853_v48 = vand.u32 2147483647, %v789_v37  ;;  %v854_v50 = vand.u32 2147483647, %v790_v40 }
  0xcf   : > { %v918_v11 = vsub.f32 1.0, %v854_v50  ;;  %v593_v50 = vld [vmem:[#allocation10 + $0x88] sm:$0xff] }
  0xd0   : > { %1081 = vperm.xlu2 %1902, %v585_v53  }
  0xd1   : > { %1166 = vperm.xlu1 %1901, %v602_v54   ;;  %1086 = vperm.xlu0 %1900, %v586_v55   ;;  %v2315_v34 = vmax.f32 %v918_v11, 0.0 }
  0xd2   : > { %v2228_v58 = vpop.permute.xlu2 %670 }
  0xd3   : > { %v2230_v60 = vpop.permute.xlu1 %625  ;;  %v2232_v61 = vpop.permute.xlu0 %615  ;;  %v795_v43 = vsub.f32 %v2248_v21, %v2228_v58  ;;  %v796_v44 = vsub.f32 %v2250_v22, %v2228_v58 }
  0xd4   : > { %v777_v49 = vsub.f32 %v2248_v21, %v2230_v60  ;;  %v778_v52 = vsub.f32 %v2250_v22, %v2230_v60  ;;  %v773_v53 = vsub.f32 %v2248_v21, %v2232_v61  ;;  %v774_v59 = vsub.f32 %v2250_v22, %v2232_v61 }
  0xd5   : > { %v859_v57 = vand.u32 2147483647, %v795_v43  ;;  %v860_v58 = vand.u32 2147483647, %v796_v44 }
  0xd6   : > { %v842_v61 = vand.u32 2147483647, %v778_v52  ;;  %v837_v13 = vand.u32 2147483647, %v773_v53  ;;  %v577_v52 = vld [vmem:[#allocation10 + $0x8] sm:$0xff] }
  0xd7   : > { %v923_v17 = vsub.f32 1.0, %v859_v57 }
  0xd8   : > { %1156 = vperm.xlu2 %1902, %v600_v62   ;;  %v2289_v62 = vmax.f32 %v909_v45, 0.0  ;;  %v901_v36 = vsub.f32 1.0, %v837_v13 }
  0xd9   : > { %1076 = vperm.xlu1 %1901, %v584_v63   ;;  %1161 = vperm.xlu0 %1900, %v601_v0   ;;  %v2291_v63 = vmax.f32 %v910_v42, 0.0  ;;  %v912_v0 = vsub.f32 1.0, %v848_v46  ;;  %v576_v46 = vld [vmem:[#allocation10] sm:$0xff] }
  0xda   : > { %v2234_v2 = vpop.permute.xlu2 %685  ;;  %2719 = vst [vmem:[#allocation23_spill] sm:$0xff] %v2289_v62 }
  0xdb   : > { %v2236_v4 = vpop.permute.xlu1 %630  ;;  %v2238_v5 = vpop.permute.xlu0 %620  ;;  %2720 = vst [vmem:[#allocation24_spill] sm:$0xff] %v2291_v63  ;;  %v801_v60 = vsub.f32 %v2248_v21, %v2234_v2  ;;  %v2303_v23 = vmax.f32 %v912_v0, 0.0 }
  0xdc   : > { %v775_v25 = vsub.f32 %v2248_v21, %v2238_v5  ;;  %v776_v32 = vsub.f32 %v2250_v22, %v2238_v5 }
  0xdd   : > { %v865_v24 = vand.u32 2147483647, %v801_v60 }
  0xde   : > { %v839_v5 = vand.u32 2147483647, %v775_v25 }
  0xdf   : > { %v929_v44 = vsub.f32 1.0, %v865_v24 }
  0xe0   : > { %1066 = vperm.xlu2 %1902, %v582_v6   ;;  %v917_v6 = vsub.f32 1.0, %v853_v48 }
  0xe1   : > { %1151 = vperm.xlu1 %1901, %v599_v7   ;;  %1071 = vperm.xlu0 %1900, %v583_v8   ;;  %v841_v7 = vand.u32 2147483647, %v777_v49  ;;  %v802_v8 = vsub.f32 %v2250_v22, %v2234_v2  ;;  %v780_v2 = vsub.f32 %v2250_v22, %v2236_v4  ;;  %v2327_v49 = vand.u32 2147483647, %v776_v32 }
  0xe2   : > { %v2242_v12 = vpop.permute.xlu2 %700  ;;  %v2309_v26 = vmax.f32 %v917_v6, 0.0  ;;  %v2342_v6 = vmax.f32 %v929_v44, 0.0 }
  0xe3   : > { %v2244_v14 = vpop.permute.xlu1 %650  ;;  %v2246_v15 = vpop.permute.xlu0 %645  ;;  %v905_v27 = vsub.f32 1.0, %v841_v7  ;;  %v866_v31 = vand.u32 2147483647, %v802_v8  ;;  %v844_v45 = vand.u32 2147483647, %v780_v2  ;;  %2723 = vst [vmem:[#allocation27_spill] sm:$0xff] %v2327_v49  ;;  %v807_v60 = vsub.f32 %v2248_v21, %v2242_v12 }
  0xe4   : > { %v903_v8 = vsub.f32 1.0, %v839_v5  ;;  %v785_v13 = vsub.f32 %v2248_v21, %v2246_v15  ;;  %v786_v32 = vsub.f32 %v2250_v22, %v2246_v15 }
  0xe5   : > { %v2325_v47 = vmax.f32 %v905_v27, 0.0  ;;  %v930_v48 = vsub.f32 1.0, %v866_v31  ;;  %v908_v7 = vsub.f32 1.0, %v844_v45  ;;  %v2361_v31 = vand.u32 2147483647, %v807_v60  ;;  %v592_v45 = vld [vmem:[#allocation10 + $0x80] sm:$0xff] }
  0xe6   : > { %v849_v44 = vand.u32 2147483647, %v785_v13 }
  0xe7   : > { %2722 = vst [vmem:[#allocation26_spill] sm:$0xff] %v2325_v47 }
  0xe8   : > { %1141 = vperm.xlu2 %1902, %v597_v18   ;;  %v924_v18 = vsub.f32 1.0, %v860_v58  ;;  %2727 = vst [vmem:[#allocation31_spill] sm:$0xff] %v2361_v31 }
  0xe9   : > { %1061 = vperm.xlu1 %1901, %v581_v19   ;;  %1146 = vperm.xlu0 %1900, %v598_v20   ;;  %v2299_v19 = vand.u32 2147483647, %v774_v59  ;;  %v779_v20 = vsub.f32 %v2248_v21, %v2236_v4  ;;  %v2336_v59 = vmax.f32 %v901_v36, 0.0 }
  0xea   : > { %v2259_v28 = vpop.permute.xlu2 %715  ;;  %v2321_v40 = vmax.f32 %v924_v18, 0.0 }
  0xeb   : > { %v2261_v29 = vpop.permute.xlu1 %665  ;;  %v2263_v30 = vpop.permute.xlu0 %660  ;;  %2721 = vst [vmem:[#allocation25_spill] sm:$0xff] %v2299_v19  ;;  %v843_v43 = vand.u32 2147483647, %v779_v20  ;;  %v813_v15 = vsub.f32 %v2248_v21, %v2259_v28 }
  0xec   : > { %2725 = vst [vmem:[#allocation29_spill] sm:$0xff] %v2336_v59  ;;  %v794_v13 = vsub.f32 %v2250_v22, %v2261_v29 }
  0xed   : > { %v907_v0 = vsub.f32 1.0, %v843_v43 }
  0xef   : > { %v2359_v27 = vmax.f32 %v907_v0, 0.0 }
  0xf0   : > { %1051 = vperm.xlu2 %1902, %v579_v35   ;;  %v906_v35 = vsub.f32 1.0, %v842_v61  ;;  %v788_v61 = vsub.f32 %v2250_v22, %v2244_v14 }
  0xf1   : > { %1136 = vperm.xlu1 %1901, %v596_v38   ;;  %1056 = vperm.xlu0 %1900, %v580_v39   ;;  %v539_v38 = vmul.f32 0.5, %v1815_v16  ;;  %v2319_v39 = vmax.f32 %v923_v17, 0.0  ;;  %v808_v17 = vsub.f32 %v2250_v22, %v2242_v12  ;;  %2726 = vst [vmem:[#allocation30_spill] sm:$0xff] %v2359_v27 }
  0xf2   : > { %v2277_v51 = vpop.permute.xlu2 %730  ;;  %v2329_v53 = vmax.f32 %v906_v35, 0.0  ;;  %v2365_v35 = vmax.f32 %v908_v7, 0.0  ;;  %v852_v43 = vand.u32 2147483647, %v788_v61  ;;  %v793_v61 = vsub.f32 %v2248_v21, %v2261_v29 }
  0xf3   : > { %v2283_v54 = vpop.permute.xlu1 %680  ;;  %v2285_v55 = vpop.permute.xlu0 %675  ;;  %v2332_v57 = vperm.slane %v539_v38, 0  ;;  %v2334_v58 = vperm.slane %v539_v38, 1  ;;  %v2367_v38 = vmax.f32 %v903_v8, 0.0  ;;  %v2369_v5 = vand.u32 2147483647, %v808_v17 }
  0xf4   : > { %2724 = vst [vmem:[#allocation28_spill] sm:$0xff] %v2329_v53  ;;  %v916_v8 = vsub.f32 1.0, %v852_v43  ;;  %v799_v29 = vsub.f32 %v2248_v21, %v2283_v54  ;;  %v819_v41 = vsub.f32 %v2248_v21, %v2277_v51 }
  0xf5   : > { %2728 = vst [vmem:[#allocation32_spill] sm:$0xff] %v2365_v35 }
  0xf6   : > { %2729 = vst [vmem:[#allocation33_spill] sm:$0xff] %v2367_v38 }
  0xf7   : > { %2730 = vst [vmem:[#allocation34_spill] sm:$0xff] %v2369_v5 }
  0xf8   : > { %1126 = vperm.xlu2 %1902, %v594_v1   ;;  %v787_v1 = vsub.f32 %v2248_v21, %v2244_v14 }
  0xf9   : > { %1046 = vperm.xlu1 %1901, %v578_v9   ;;  %1131 = vperm.xlu0 %1900, %v595_v10   ;;  %v2344_v10 = vmax.f32 %v930_v48, 0.0 }
  0xfa   : > { %v2313_v33 = vpop.permute.xlu2 %745  ;;  %v851_v14 = vand.u32 2147483647, %v787_v1 }
  0xfb   : > { %v2317_v37 = vpop.permute.xlu1 %695  ;;  %v691_v4 = vpop.permute.xlu0 %690 }
  0xfc   : > { %v803_v42 = vsub.f32 %v2248_v21, %v691_v4  ;;  %v804_v56 = vsub.f32 %v2250_v22, %v691_v4  ;;  %v915_v0 = vsub.f32 1.0, %v851_v14 }
  0xfe   : > { %v867_v9 = vand.u32 2147483647, %v803_v42  ;;  %v868_v18 = vand.u32 2147483647, %v804_v56  ;;  %v814_v56 = vsub.f32 %v2250_v22, %v2259_v28 }
 0x100   : > { %1036 = vperm.xlu2 %1902, %v576_v46   ;;  %v931_v4 = vsub.f32 1.0, %v867_v9  ;;  %v932_v46 = vsub.f32 1.0, %v868_v18  ;;  %v913_v9 = vsub.f32 1.0, %v849_v44 }
 0x101   : > { %1121 = vperm.xlu1 %1901, %v593_v50   ;;  %1041 = vperm.xlu0 %1900, %v577_v52   ;;  %v850_v52 = vand.u32 2147483647, %v786_v32 }
 0x102   : > { %v1112_v16 = vpop.permute.xlu2 %1111  ;;  %v995_v60 = vmax.f32 %v931_v4, 0.0  ;;  %v996_v14 = vmax.f32 %v932_v46, 0.0  ;;  %v791_v4 = vsub.f32 %v2248_v21, %v2263_v30  ;;  %v792_v46 = vsub.f32 %v2250_v22, %v2263_v30 }
 0x103   : > { %v1224_v20 = vsub.f32 %v2332_v57, %v1112_v16  ;;  %v1225_v24 = vsub.f32 %v2334_v58, %v1112_v16  ;;  %v2355_v2 = vpop.permute.xlu1 %710  ;;  %v2357_v25 = vpop.permute.xlu0 %705  ;;  %v914_v32 = vsub.f32 1.0, %v850_v52  ;;  %v2394_v52 = vmax.f32 %v916_v8, 0.0 }
 0x104   : > { %v856_v8 = vand.u32 2147483647, %v792_v46 }
 0x105   : > { %v1288_v12 = vand.u32 2147483647, %v1224_v20  ;;  %v1289_v36 = vand.u32 2147483647, %v1225_v24 }
 0x107   : > { %v1352_v42 = vsub.f32 1.0, %v1288_v12  ;;  %v1353_v48 = vsub.f32 1.0, %v1289_v36  ;;  %v877_v12 = vand.u32 2147483647, %v813_v15  ;;  %v878_v36 = vand.u32 2147483647, %v814_v56 }
 0x108   : > { %v800_v15 = vsub.f32 %v2250_v22, %v2283_v54 }
 0x109   : > { %1116 = vperm.xlu0 %1900, %v592_v45   ;;  %v1416_v1 = vmax.f32 %v1352_v42, 0.0  ;;  %v1417_v7 = vmax.f32 %v1353_v48, 0.0  ;;  %v2390_v42 = vmax.f32 %v915_v0, 0.0  ;;  %v857_v48 = vand.u32 2147483647, %v793_v61 }
 0x10a   : > { %v1107_v16 = vpop.permute.xlu2 %1106  ;;  %v855_v0 = vand.u32 2147483647, %v791_v4  ;;  %v863_v61 = vand.u32 2147483647, %v799_v29  ;;  %v820_v29 = vsub.f32 %v2250_v22, %v2277_v51  ;;  %v826_v51 = vsub.f32 %v2250_v22, %v2313_v33 }
 0x10b   : > { %v1222_v17 = vsub.f32 %v2332_v57, %v1107_v16  ;;  %v1223_v18 = vsub.f32 %v2334_v58, %v1107_v16  ;;  %v2382_v20 = vpop.permute.xlu1 %725  ;;  %v2384_v28 = vpop.permute.xlu0 %720  ;;  %v1480_v24 = vmul.f32 %v1416_v1, %v995_v60  ;;  %v1481_v45 = vmul.f32 %v1417_v7, %v996_v14 }
 0x10c   : > { %v858_v16 = vand.u32 2147483647, %v794_v13  ;;  %v2398_v1 = vmax.f32 %v913_v9, 0.0  ;;  %v941_v7 = vsub.f32 1.0, %v877_v12  ;;  %v921_v14 = vsub.f32 1.0, %v857_v48 }
 0x10d   : > { %v1286_v43 = vand.u32 2147483647, %v1222_v17  ;;  %v1287_v44 = vand.u32 2147483647, %v1223_v18  ;;  %1527 = vmatpush.msra.mxu0 %v1480_v24  ;;  %1567 = vmatpush.msra.mxu2 %v1481_v45  ;;  %v2400_v17 = vmax.f32 %v914_v32, 0.0  ;;  %v942_v18 = vsub.f32 1.0, %v878_v36 }
 0x10e   : > { %v922_v30 = vsub.f32 1.0, %v858_v16  ;;  %v919_v4 = vsub.f32 1.0, %v855_v0  ;;  %v797_v45 = vsub.f32 %v2248_v21, %v2285_v55  ;;  %v798_v48 = vsub.f32 %v2250_v22, %v2285_v55 }
 0x10f   : > { %v1350_v56 = vsub.f32 1.0, %v1286_v43  ;;  %v1351_v60 = vsub.f32 1.0, %v1287_v44  ;;  %v864_v43 = vand.u32 2147483647, %v800_v15  ;;  %v927_v16 = vsub.f32 1.0, %v863_v61 }
 0x110   : > { %v2424_v0 = vmax.f32 %v942_v18, 0.0  ;;  %v884_v61 = vand.u32 2147483647, %v820_v29  ;;  %v890_v19 = vand.u32 2147483647, %v826_v51 }
 0x111   : > { %v1414_v13 = vmax.f32 %v1350_v56, 0.0  ;;  %v1415_v24 = vmax.f32 %v1351_v60, 0.0  ;;  %v2418_v60 = vmax.f32 %v941_v7, 0.0 }
 0x112   : > { %v1102_v54 = vpop.permute.xlu2 %1101  ;;  %2732 = vst [vmem:[#allocation36_spill] sm:$0xff] %v2424_v0 }
 0x113   : > { %v1220_v44 = vsub.f32 %v2332_v57, %v1102_v54  ;;  %v1221_v9 = vsub.f32 %v2334_v58, %v1102_v54  ;;  %v2406_v32 = vpop.permute.xlu1 %740  ;;  %v2408_v12 = vpop.permute.xlu0 %735  ;;  %v1478_v36 = vmul.f32 %v1414_v13, %v2342_v6  ;;  %v1479_v56 = vmul.f32 %v1415_v24, %v2344_v10  ;;  %2731 = vst [vmem:[#allocation35_spill] sm:$0xff] %v2418_v60 }
 0x114   : > { %v883_v54 = vand.u32 2147483647, %v819_v41  ;;  %v825_v6 = vsub.f32 %v2248_v21, %v2313_v33  ;;  %v928_v13 = vsub.f32 1.0, %v864_v43  ;;  %v991_v10 = vmax.f32 %v927_v16, 0.0 }
 0x115   : > { %v1284_v46 = vand.u32 2147483647, %v1220_v44  ;;  %v1285_v15 = vand.u32 2147483647, %v1221_v9  ;;  %1528 = vmatpush.msra.mxu0 %v1478_v36  ;;  %1568 = vmatpush.msra.mxu2 %v1479_v56  ;;  %v861_v44 = vand.u32 2147483647, %v797_v45 }
 0x116   : > { %v862_v9 = vand.u32 2147483647, %v798_v48  ;;  %v920_v36 = vsub.f32 1.0, %v856_v8  ;;  %v2426_v41 = vmax.f32 %v921_v14, 0.0  ;;  %v947_v50 = vsub.f32 1.0, %v883_v54 }
 0x117   : > { %v1348_v11 = vsub.f32 1.0, %v1284_v46  ;;  %v1349_v55 = vsub.f32 1.0, %v1285_v15  ;;  %v889_v59 = vand.u32 2147483647, %v825_v6  ;;  %v992_v33 = vmax.f32 %v928_v13, 0.0 }
 0x118   : > { %v2432_v45 = vmax.f32 %v922_v30, 0.0  ;;  %v948_v8 = vsub.f32 1.0, %v884_v61  ;;  %v926_v48 = vsub.f32 1.0, %v862_v9  ;;  %v2434_v14 = vmax.f32 %v919_v4, 0.0 }
 0x119   : > { %v1412_v7 = vmax.f32 %v1348_v11, 0.0  ;;  %v1413_v24 = vmax.f32 %v1349_v55, 0.0  ;;  %v925_v11 = vsub.f32 1.0, %v861_v44  ;;  %v2436_v6 = vmax.f32 %v920_v36, 0.0 }
 0x11a   : > { %v1097_v38 = vpop.permute.xlu2 %1096  ;;  %v2438_v51 = vmax.f32 %v947_v50, 0.0  ;;  %v954_v13 = vsub.f32 1.0, %v890_v19  ;;  %v2442_v44 = vmax.f32 %v948_v8, 0.0  ;;  %v990_v9 = vmax.f32 %v926_v48, 0.0 }
 0x11b   : > { %v1218_v18 = vsub.f32 %v2332_v57, %v1097_v38  ;;  %v1219_v43 = vsub.f32 %v2334_v58, %v1097_v38  ;;  %v771_v46 = vpop.permute.xlu1 %770  ;;  %v2430_v15 = vpop.permute.xlu0 %750  ;;  %v1476_v29 = vmul.f32 %v1412_v7, %v991_v10  ;;  %v1477_v54 = vmul.f32 %v1413_v24, %v992_v33 }
 0x11c   : > { %v953_v38 = vsub.f32 1.0, %v889_v59  ;;  %v835_v30 = vsub.f32 %v2248_v21, %v771_v46  ;;  %v836_v61 = vsub.f32 %v2250_v22, %v771_v46  ;;  %v989_v4 = vmax.f32 %v925_v11, 0.0 }
 0x11d   : > { %v1282_v16 = vand.u32 2147483647, %v1218_v18  ;;  %v1283_v56 = vand.u32 2147483647, %v1219_v43  ;;  %1529 = vmatpush.msra.mxu0 %v1476_v29  ;;  %1569 = vmatpush.msra.mxu2 %v1477_v54  ;;  %v811_v10 = vsub.f32 %v2248_v21, %v2355_v2  ;;  %v812_v50 = vsub.f32 %v2250_v22, %v2355_v2 }
 0x11e   : > { %v809_v19 = vsub.f32 %v2248_v21, %v2357_v25  ;;  %v2450_v7 = vmax.f32 %v953_v38, 0.0  ;;  %v2452_v24 = vmax.f32 %v954_v13, 0.0  ;;  %v817_v33 = vsub.f32 %v2248_v21, %v2382_v20 }
 0x11f   : > { %v1346_v55 = vsub.f32 1.0, %v1282_v16  ;;  %v1347_v49 = vsub.f32 1.0, %v1283_v56  ;;  %v818_v18 = vsub.f32 %v2250_v22, %v2382_v20  ;;  %v810_v2 = vsub.f32 %v2250_v22, %v2357_v25 }
 0x120   : > { %v899_v46 = vand.u32 2147483647, %v835_v30  ;;  %v900_v29 = vand.u32 2147483647, %v836_v61  ;;  %v2462_v48 = vand.u32 2147483647, %v811_v10  ;;  %v815_v16 = vsub.f32 %v2248_v21, %v2384_v28 }
 0x121   : > { %v1410_v59 = vmax.f32 %v1346_v55, 0.0  ;;  %v1411_v36 = vmax.f32 %v1347_v49, 0.0  ;;  %v2468_v20 = vand.u32 2147483647, %v812_v50  ;;  %v2470_v38 = vand.u32 2147483647, %v809_v19 }
 0x122   : > { %v2458_v43 = vpop.permute.xlu2 %1171  ;;  %v816_v25 = vsub.f32 %v2250_v22, %v2384_v28  ;;  %v881_v55 = vand.u32 2147483647, %v817_v33  ;;  %v2474_v30 = vand.u32 2147483647, %v818_v18  ;;  %v964_v50 = vsub.f32 1.0, %v900_v29 }
 0x123   : > { %v766_v8 = vpop.permute.xlu1 %765  ;;  %v1192_v11 = vpop.permute.xlu0 %1191  ;;  %v1474_v49 = vmul.f32 %v1410_v59, %v989_v4  ;;  %2733 = vst [vmem:[#allocation37_spill] sm:$0xff] %v2468_v20  ;;  %v1475_v13 = vmul.f32 %v1411_v36, %v990_v9  ;;  %v2479_v31 = vand.u32 2147483647, %v810_v2  ;;  %v2481_v5 = vand.u32 2147483647, %v815_v16 }
 0x124   : > { %v1256_v56 = vsub.f32 %v2332_v57, %v1192_v11  ;;  %v1257_v54 = vsub.f32 %v2334_v58, %v1192_v11  ;;  %2734 = vst [vmem:[#allocation38_spill] sm:$0xff] %v2470_v38  ;;  %v833_v61 = vsub.f32 %v2248_v21, %v766_v8  ;;  %v834_v10 = vsub.f32 %v2250_v22, %v766_v8 }
 0x125   : > { %1530 = vmatpush.msra.mxu0 %v1474_v49  ;;  %1570 = vmatpush.msra.mxu2 %v1475_v13  ;;  %v963_v11 = vsub.f32 1.0, %v899_v46  ;;  %2735 = vst [vmem:[#allocation39_spill] sm:$0xff] %v2479_v31  ;;  %v2485_v33 = vand.u32 2147483647, %v816_v25  ;;  %v945_v49 = vsub.f32 1.0, %v881_v55  ;;  %v1028_v19 = vmax.f32 %v964_v50, 0.0 }
 0x126   : > { %v1320_v4 = vand.u32 2147483647, %v1256_v56  ;;  %v1321_v59 = vand.u32 2147483647, %v1257_v54  ;;  %v897_v56 = vand.u32 2147483647, %v833_v61  ;;  %v823_v9 = vsub.f32 %v2248_v21, %v2406_v32 }
 0x127   : > { %v898_v29 = vand.u32 2147483647, %v834_v10  ;;  %v1027_v2 = vmax.f32 %v963_v11, 0.0  ;;  %v824_v61 = vsub.f32 %v2250_v22, %v2406_v32  ;;  %v821_v10 = vsub.f32 %v2248_v21, %v2408_v12 }
 0x128   : > { %v1384_v28 = vsub.f32 1.0, %v1320_v4  ;;  %v1385_v18 = vsub.f32 1.0, %v1321_v59  ;;  %v2499_v50 = vmax.f32 %v945_v49, 0.0  ;;  %v2504_v32 = vand.u32 2147483647, %v823_v9 }
 0x129   : > { %v962_v8 = vsub.f32 1.0, %v898_v29  ;;  %v828_v29 = vsub.f32 %v2250_v22, %v2430_v15  ;;  %v1249_v9 = vsub.f32 %v2334_v58, %v2458_v43 }
 0x12a   : > { %v1448_v46 = vmax.f32 %v1384_v28, 0.0  ;;  %v1449_v16 = vmax.f32 %v1385_v18, 0.0  ;;  %v2491_v36 = vpop.permute.xlu2 %1081  ;;  %v961_v18 = vsub.f32 1.0, %v897_v56  ;;  %v2512_v56 = vand.u32 2147483647, %v821_v10 }
 0x12b   : > { %v761_v54 = vpop.permute.xlu1 %760  ;;  %v1187_v13 = vpop.permute.xlu0 %1186  ;;  %v892_v35 = vand.u32 2147483647, %v828_v29 }
 0x12c   : > { %v1254_v25 = vsub.f32 %v2332_v57, %v1187_v13  ;;  %v1255_v55 = vsub.f32 %v2334_v58, %v1187_v13  ;;  %v1512_v59 = vmul.f32 %v1448_v46, %v1027_v2  ;;  %v1513_v11 = vmul.f32 %v1449_v16, %v1028_v19 }
 0x12d   : > { %v831_v53 = vsub.f32 %v2248_v21, %v761_v54  ;;  %v832_v47 = vsub.f32 %v2250_v22, %v761_v54  ;;  %v822_v46 = vsub.f32 %v2250_v22, %v2408_v12  ;;  %v827_v19 = vsub.f32 %v2248_v21, %v2430_v15 }
 0x12e   : > { %v1318_v4 = vand.u32 2147483647, %v1254_v25  ;;  %v1319_v13 = vand.u32 2147483647, %v1255_v55  ;;  %1547 = vmatpush.msra.mxu1 %v1512_v59  ;;  %1587 = vmatpush.msra.mxu3 %v1513_v11  ;;  %v2510_v2 = vand.u32 2147483647, %v824_v61  ;;  %v1248_v16 = vsub.f32 %v2332_v57, %v2458_v43 }
 0x12f   : > { %v1025_v25 = vmax.f32 %v961_v18, 0.0  ;;  %v1026_v55 = vmax.f32 %v962_v8, 0.0  ;;  %v895_v59 = vand.u32 2147483647, %v831_v53  ;;  %v896_v11 = vand.u32 2147483647, %v832_v47 }
 0x130   : > { %v1382_v49 = vsub.f32 1.0, %v1318_v4  ;;  %v1383_v54 = vsub.f32 1.0, %v1319_v13  ;;  %v2520_v10 = vand.u32 2147483647, %v822_v46  ;;  %v891_v38 = vand.u32 2147483647, %v827_v19 }
 0x131   : > { %v1312_v18 = vand.u32 2147483647, %v1248_v16  ;;  %v1212_v47 = vsub.f32 %v2332_v57, %v2491_v36  ;;  %v959_v46 = vsub.f32 1.0, %v895_v59 }
 0x132   : > { %v1446_v12 = vmax.f32 %v1382_v49, 0.0  ;;  %v1447_v4 = vmax.f32 %v1383_v54, 0.0  ;;  %v1313_v49 = vand.u32 2147483647, %v1249_v9  ;;  %v2527_v53 = vpop.permute.xlu2 %1156  ;;  %v960_v54 = vsub.f32 1.0, %v896_v11 }
 0x133   : > { %v756_v61 = vpop.permute.xlu1 %755  ;;  %v1182_v28 = vpop.permute.xlu0 %1181  ;;  %v956_v9 = vsub.f32 1.0, %v892_v35  ;;  %v1376_v59 = vsub.f32 1.0, %v1312_v18 }
 0x134   : > { %v1252_v15 = vsub.f32 %v2332_v57, %v1182_v28  ;;  %v1253_v13 = vsub.f32 %v2334_v58, %v1182_v28  ;;  %v1510_v27 = vmul.f32 %v1446_v12, %v1025_v25  ;;  %v1511_v43 = vmul.f32 %v1447_v4, %v1026_v55 }
 0x135   : > { %v829_v19 = vsub.f32 %v2248_v21, %v756_v61  ;;  %v955_v25 = vsub.f32 1.0, %v891_v38  ;;  %v1213_v12 = vsub.f32 %v2334_v58, %v2491_v36  ;;  %v830_v55 = vsub.f32 %v2250_v22, %v756_v61 }
 0x136   : > { %v1316_v8 = vand.u32 2147483647, %v1252_v15  ;;  %v1317_v0 = vand.u32 2147483647, %v1253_v13  ;;  %1548 = vmatpush.msra.mxu1 %v1510_v27  ;;  %1588 = vmatpush.msra.mxu3 %v1511_v43  ;;  %v1377_v11 = vsub.f32 1.0, %v1313_v49  ;;  %v1023_v13 = vmax.f32 %v959_v46, 0.0 }
 0x137   : > { %v1276_v15 = vand.u32 2147483647, %v1212_v47  ;;  %v1024_v27 = vmax.f32 %v960_v54, 0.0  ;;  %v893_v43 = vand.u32 2147483647, %v829_v19 }
 0x138   : > { %v1380_v16 = vsub.f32 1.0, %v1316_v8  ;;  %v1381_v4 = vsub.f32 1.0, %v1317_v0  ;;  %v1277_v61 = vand.u32 2147483647, %v1213_v12  ;;  %v894_v0 = vand.u32 2147483647, %v830_v55 }
 0x139   : > { %v957_v29 = vsub.f32 1.0, %v893_v43 }
 0x13a   : > { %v1444_v20 = vmax.f32 %v1380_v16, 0.0  ;;  %v1445_v63 = vmax.f32 %v1381_v4, 0.0  ;;  %v1019_v16 = vmax.f32 %v955_v25, 0.0  ;;  %v1340_v4 = vsub.f32 1.0, %v1276_v15  ;;  %v2541_v31 = vpop.permute.xlu2 %1066 }
 0x13b   : > { %v1092_v28 = vpop.permute.xlu1 %1091  ;;  %v1177_v60 = vpop.permute.xlu0 %1176  ;;  %v1341_v47 = vsub.f32 1.0, %v1277_v61  ;;  %v1242_v15 = vsub.f32 %v2332_v57, %v2527_v53  ;;  %v1021_v43 = vmax.f32 %v957_v29, 0.0 }
 0x13c   : > { %v1216_v38 = vsub.f32 %v2332_v57, %v1092_v28  ;;  %v1217_v35 = vsub.f32 %v2334_v58, %v1092_v28  ;;  %v1250_v8 = vsub.f32 %v2332_v57, %v1177_v60  ;;  %v1251_v36 = vsub.f32 %v2334_v58, %v1177_v60 }
 0x13d   : > { %v1508_v18 = vmul.f32 %v1444_v20, %v1023_v13  ;;  %v1509_v49 = vmul.f32 %v1445_v63, %v1024_v27  ;;  %v1020_v28 = vmax.f32 %v956_v9, 0.0  ;;  %v1440_v20 = vmax.f32 %v1376_v59, 0.0 }
 0x13e   : > { %v1280_v46 = vand.u32 2147483647, %v1216_v38  ;;  %v1281_v54 = vand.u32 2147483647, %v1217_v35  ;;  %v1314_v19 = vand.u32 2147483647, %v1250_v8 }
 0x13f   : > { %v1315_v62 = vand.u32 2147483647, %v1251_v36  ;;  %1549 = vmatpush.msra.mxu1 %v1508_v18  ;;  %1589 = vmatpush.msra.mxu3 %v1509_v49  ;;  %v1441_v63 = vmax.f32 %v1377_v11, 0.0  ;;  %v958_v13 = vsub.f32 1.0, %v894_v0  ;;  %v1404_v25 = vmax.f32 %v1340_v4, 0.0 }
 0x140   : > { %v1344_v60 = vsub.f32 1.0, %v1280_v46  ;;  %v1345_v12 = vsub.f32 1.0, %v1281_v54  ;;  %v1378_v55 = vsub.f32 1.0, %v1314_v19  ;;  %v1243_v11 = vsub.f32 %v2334_v58, %v2527_v53 }
 0x141   : > { %v1379_v27 = vsub.f32 1.0, %v1315_v62  ;;  %v1022_v61 = vmax.f32 %v958_v13, 0.0 }
 0x142   : > { %v1408_v38 = vmax.f32 %v1344_v60, 0.0  ;;  %v1409_v35 = vmax.f32 %v1345_v12, 0.0  ;;  %v1442_v8 = vmax.f32 %v1378_v55, 0.0  ;;  %v1206_v12 = vsub.f32 %v2332_v57, %v2541_v31 }
 0x143   : > { %v1443_v36 = vmax.f32 %v1379_v27, 0.0  ;;  %v1167_v9 = vpop.permute.xlu1 %1166  ;;  %v1087_v18 = vpop.permute.xlu0 %1086 }
 0x144   : > { %v1246_v49 = vsub.f32 %v2332_v57, %v1167_v9  ;;  %v1247_v46 = vsub.f32 %v2334_v58, %v1167_v9  ;;  %v1214_v59 = vsub.f32 %v2332_v57, %v1087_v18  ;;  %v1215_v62 = vsub.f32 %v2334_v58, %v1087_v18 }
 0x145   : > { %v1472_v0 = vmul.f32 %v1408_v38, %v2319_v39  ;;  %v1506_v54 = vmul.f32 %v1442_v8, %v1021_v43  ;;  %v1473_v60 = vmul.f32 %v1409_v35, %v2321_v40  ;;  %v1507_v27 = vmul.f32 %v1443_v36, %v1022_v61  ;;  %v2556_v43 = vpop.permute.xlu2 %1141 }
 0x146   : > { %v1310_v19 = vand.u32 2147483647, %v1246_v49  ;;  %v1311_v29 = vand.u32 2147483647, %v1247_v46  ;;  %v1278_v4 = vand.u32 2147483647, %v1214_v59  ;;  %v1504_v9 = vmul.f32 %v1440_v20, %v1019_v16 }
 0x147   : > { %v1279_v55 = vand.u32 2147483647, %v1215_v62  ;;  %1531 = vmatpush.msra.mxu0 %v1472_v0  ;;  %1550 = vmatpush.msra.mxu1 %v1506_v54  ;;  %v950_v18 = vsub.f32 1.0, %v2520_v10  ;;  %v1306_v39 = vand.u32 2147483647, %v1242_v15  ;;  %v1505_v40 = vmul.f32 %v1441_v63, %v1020_v28 }
 0x148   : > { %v1374_v53 = vsub.f32 1.0, %v1310_v19  ;;  %v1375_v13 = vsub.f32 1.0, %v1311_v29  ;;  %v1342_v21 = vsub.f32 1.0, %v1278_v4  ;;  %1571 = vmatpush.msra.mxu2 %v1473_v60  ;;  %v1307_v38 = vand.u32 2147483647, %v1243_v11  ;;  %1590 = vmatpush.msra.mxu3 %v1507_v27 }
 0x149   : > { %v1343_v8 = vsub.f32 1.0, %v1279_v55  ;;  %1551 = vmatpush.msra.mxu1 %v1504_v9  ;;  %v1405_v35 = vmax.f32 %v1341_v47, 0.0  ;;  %v1468_v36 = vmul.f32 %v1404_v25, %v2434_v14  ;;  %v1207_v16 = vsub.f32 %v2334_v58, %v2541_v31 }
 0x14a   : > { %v1438_v49 = vmax.f32 %v1374_v53, 0.0  ;;  %v1406_v46 = vmax.f32 %v1342_v21, 0.0  ;;  %v1270_v20 = vand.u32 2147483647, %v1206_v12  ;;  %v1439_v59 = vmax.f32 %v1375_v13, 0.0  ;;  %1591 = vmatpush.msra.mxu3 %v1505_v40 }
 0x14b   : > { %v1407_v62 = vmax.f32 %v1343_v8, 0.0  ;;  %v1077_v15 = vpop.permute.xlu1 %1076  ;;  %v1162_v11 = vpop.permute.xlu0 %1161  ;;  %v1370_v21 = vsub.f32 1.0, %v1306_v39  ;;  %v1371_v0 = vsub.f32 1.0, %v1307_v38  ;;  %v1271_v4 = vand.u32 2147483647, %v1207_v16 }
 0x14c   : > { %v1210_v61 = vsub.f32 %v2332_v57, %v1077_v15  ;;  %v1211_v28 = vsub.f32 %v2334_v58, %v1077_v15  ;;  %v1244_v47 = vsub.f32 %v2332_v57, %v1162_v11  ;;  %v1245_v63 = vsub.f32 %v2334_v58, %v1162_v11 }
 0x14d   : > { %v1470_v14 = vmul.f32 %v1406_v46, %v2426_v41  ;;  %v1502_v31 = vmul.f32 %v1438_v49, %v2450_v7  ;;  %v1471_v29 = vmul.f32 %v1407_v62, %v2432_v45  ;;  %v1334_v60 = vsub.f32 1.0, %v1270_v20  ;;  %v1052_v15 = vpop.permute.xlu2 %1051 }
 0x14e   : > { %v1274_v25 = vand.u32 2147483647, %v1210_v61  ;;  %v1275_v54 = vand.u32 2147483647, %v1211_v28  ;;  %v1308_v19 = vand.u32 2147483647, %v1244_v47  ;;  %v1503_v55 = vmul.f32 %v1439_v59, %v2452_v24 }
 0x14f   : > { %v1309_v12 = vand.u32 2147483647, %v1245_v63  ;;  %1532 = vmatpush.msra.mxu0 %v1470_v14  ;;  %1552 = vmatpush.msra.mxu1 %v1502_v31  ;;  %v1469_v41 = vmul.f32 %v1405_v35, %v2436_v6  ;;  %v2736_v7 = vsub.f32 1.0, %v2504_v32  ;;  %v2737_v39 = vsub.f32 1.0, %v2510_v2 }
 0x150   : > { %v1338_v27 = vsub.f32 1.0, %v1274_v25  ;;  %v1339_v9 = vsub.f32 1.0, %v1275_v54  ;;  %v1372_v53 = vsub.f32 1.0, %v1308_v19  ;;  %1572 = vmatpush.msra.mxu2 %v1471_v29  ;;  %v2738_v45 = vsub.f32 1.0, %v2512_v56  ;;  %1592 = vmatpush.msra.mxu3 %v1503_v55 }
 0x151   : > { %v1015_v13 = vmax.f32 %v2736_v7, 0.0  ;;  %v1016_v38 = vmax.f32 %v2737_v39, 0.0  ;;  %v1373_v40 = vsub.f32 1.0, %v1309_v12  ;;  %1533 = vmatpush.msra.mxu0 %v1468_v36  ;;  %v1434_v49 = vmax.f32 %v1370_v21, 0.0 }
 0x152   : > { %v1013_v8 = vmax.f32 %v2738_v45, 0.0  ;;  %v1402_v24 = vmax.f32 %v1338_v27, 0.0  ;;  %v1403_v46 = vmax.f32 %v1339_v9, 0.0  ;;  %v1436_v16 = vmax.f32 %v1372_v53, 0.0  ;;  %1573 = vmatpush.msra.mxu2 %v1469_v41 }
 0x153   : > { %v1435_v20 = vmax.f32 %v1371_v0, 0.0  ;;  %v1335_v59 = vsub.f32 1.0, %v1271_v4  ;;  %v1398_v6 = vmax.f32 %v1334_v60, 0.0  ;;  %v1437_v35 = vmax.f32 %v1373_v40, 0.0  ;;  %v1152_v32 = vpop.permute.xlu1 %1151  ;;  %v1072_v62 = vpop.permute.xlu0 %1071 }
 0x154   : > { %v1240_v2 = vsub.f32 %v2332_v57, %v1152_v32  ;;  %v1241_v56 = vsub.f32 %v2334_v58, %v1152_v32  ;;  %v1208_v11 = vsub.f32 %v2332_v57, %v1072_v62  ;;  %v1209_v36 = vsub.f32 %v2334_v58, %v1072_v62 }
 0x155   : > { %v1236_v61 = vsub.f32 %v2332_v57, %v2556_v43  ;;  %v1237_v28 = vsub.f32 %v2334_v58, %v2556_v43  ;;  %v1466_v47 = vmul.f32 %v1402_v24, %v2309_v26  ;;  %v1500_v63 = vmul.f32 %v1436_v16, %v1015_v13 }
 0x156   : > { %v1304_v21 = vand.u32 2147483647, %v1240_v2  ;;  %v1305_v0 = vand.u32 2147483647, %v1241_v56  ;;  %v1272_v14 = vand.u32 2147483647, %v1208_v11  ;;  %v1467_v31 = vmul.f32 %v1403_v46, %v2315_v34 }
 0x157   : > { %v1014_v25 = vmax.f32 %v950_v18, 0.0  ;;  %v1273_v54 = vand.u32 2147483647, %v1209_v36  ;;  %1534 = vmatpush.msra.mxu0 %v1466_v47  ;;  %1553 = vmatpush.msra.mxu1 %v1500_v63  ;;  %v1501_v19 = vmul.f32 %v1437_v35, %v1016_v38  ;;  %v1498_v29 = vmul.f32 %v1434_v49, %v1013_v8 }
 0x158   : > { %v2739_v4 = vsub.f32 1.0, %v2474_v30  ;;  %v1368_v43 = vsub.f32 1.0, %v1304_v21  ;;  %v1369_v26 = vsub.f32 1.0, %v1305_v0  ;;  %v1336_v12 = vsub.f32 1.0, %v1272_v14  ;;  %1574 = vmatpush.msra.mxu2 %v1467_v31 }
 0x159   : > { %v1300_v55 = vand.u32 2147483647, %v1236_v61  ;;  %v1301_v27 = vand.u32 2147483647, %v1237_v28  ;;  %v1337_v9 = vsub.f32 1.0, %v1273_v54  ;;  %1593 = vmatpush.msra.mxu3 %v1501_v19  ;;  %1554 = vmatpush.msra.mxu1 %v1498_v29  ;;  %v1499_v34 = vmul.f32 %v1435_v20, %v1014_v25 }
 0x15a   : > { %v2590_v60 = vmax.f32 %v2739_v4, 0.0  ;;  %v1399_v10 = vmax.f32 %v1335_v59, 0.0  ;;  %v1432_v18 = vmax.f32 %v1368_v43, 0.0  ;;  %v1400_v53 = vmax.f32 %v1336_v12, 0.0  ;;  %v2601_v59 = vpop.permute.xlu2 %1126  ;;  %v1519_v54 = vld [vmem:[%s2740_s7] sm:$0x77] }
 0x15b   : > { %v1462_v41 = vmul.f32 %v1398_v6, %v2398_v1  ;;  %v1200_v7 = vsub.f32 %v2332_v57, %v1052_v15  ;;  %v1201_v30 = vsub.f32 %v2334_v58, %v1052_v15  ;;  %v1433_v13 = vmax.f32 %v1369_v26, 0.0  ;;  %1594 = vmatpush.msra.mxu3 %v1499_v34  ;;  %v1062_v38 = vpop.permute.xlu1 %1061  ;;  %v1147_v45 = vpop.permute.xlu0 %1146  ;;  %1522 = vst [vmem:[#allocation1] ss:$2 sm:$0xff] %v1519_v54 }
 0x15c   : > { %v1401_v39 = vmax.f32 %v1337_v9, 0.0  ;;  %v1204_v8 = vsub.f32 %v2332_v57, %v1062_v38  ;;  %v1205_v40 = vsub.f32 %v2334_v58, %v1062_v38  ;;  %v1238_v49 = vsub.f32 %v2332_v57, %v1147_v45 }
 0x15d   : > { %v1239_v24 = vsub.f32 %v2334_v58, %v1147_v45  ;;  %v1364_v46 = vsub.f32 1.0, %v1300_v55  ;;  %v1365_v16 = vsub.f32 1.0, %v1301_v27  ;;  %v1464_v1 = vmul.f32 %v1400_v53, %v2390_v42 }
 0x15e   : > { %v1496_v20 = vmul.f32 %v1432_v18, %v2438_v51  ;;  %v1268_v6 = vand.u32 2147483647, %v1204_v8  ;;  %v1269_v35 = vand.u32 2147483647, %v1205_v40  ;;  %v1302_v32 = vand.u32 2147483647, %v1238_v49 }
 0x15f   : > { %v1465_v62 = vmul.f32 %v1401_v39, %v2394_v52  ;;  %v1264_v15 = vand.u32 2147483647, %v1200_v7  ;;  %v1265_v2 = vand.u32 2147483647, %v1201_v30  ;;  %v1303_v56 = vand.u32 2147483647, %v1239_v24  ;;  %1535 = vmatpush.msra.mxu0 %v1464_v1 }
 0x160   : > { %1555 = vmatpush.msra.mxu1 %v1496_v20  ;;  %v1497_v11 = vmul.f32 %v1433_v13, %v2442_v44  ;;  %v1332_v36 = vsub.f32 1.0, %v1268_v6  ;;  %v1333_v61 = vsub.f32 1.0, %v1269_v35  ;;  %v1366_v42 = vsub.f32 1.0, %v1302_v32  ;;  %v2744_v49 = vld [vmem:[#allocation39_spill] sm:$0xff] }
 0x161   : > { %1575 = vmatpush.msra.mxu2 %v1465_v62  ;;  %v1463_v51 = vmul.f32 %v1399_v10, %v2400_v17  ;;  %v2741_v28 = vsub.f32 1.0, %v2481_v5  ;;  %v2742_v63 = vsub.f32 1.0, %v2485_v33  ;;  %v1428_v21 = vmax.f32 %v1364_v46, 0.0  ;;  %1536 = vmatpush.msra.mxu0 %v1462_v41 }
 0x162   : > { %v1367_v0 = vsub.f32 1.0, %v1303_v56  ;;  %1595 = vmatpush.msra.mxu3 %v1497_v11  ;;  %v1429_v14 = vmax.f32 %v1365_v16, 0.0  ;;  %v1396_v31 = vmax.f32 %v1332_v36, 0.0  ;;  %v1397_v44 = vmax.f32 %v1333_v61, 0.0  ;;  %v1037_v38 = vpop.permute.xlu2 %1036 }
 0x163   : > { %v1007_v47 = vmax.f32 %v2741_v28, 0.0  ;;  %v1008_v52 = vmax.f32 %v2742_v63, 0.0  ;;  %v1430_v25 = vmax.f32 %v1366_v42, 0.0  ;;  %1576 = vmatpush.msra.mxu2 %v1463_v51  ;;  %v1328_v19 = vsub.f32 1.0, %v1264_v15  ;;  %v1137_v4 = vpop.permute.xlu1 %1136  ;;  %v1057_v43 = vpop.permute.xlu0 %1056  ;;  %v2745_v42 = vld [vmem:[#allocation23_spill] sm:$0xff]  ;;  %v2747_v63 = vld [vmem:[#allocation24_spill] sm:$0xff] }
 0x164   : > { %v1329_v29 = vsub.f32 1.0, %v1265_v2  ;;  %v1230_v17 = vsub.f32 %v2332_v57, %v2601_v59  ;;  %v1431_v5 = vmax.f32 %v1367_v0, 0.0  ;;  %v1234_v33 = vsub.f32 %v2332_v57, %v1137_v4  ;;  %v2746_v28 = vld [vmem:[#allocation35_spill] sm:$0xff] }
 0x165   : > { %v1235_v26 = vsub.f32 %v2334_v58, %v1137_v4  ;;  %v1202_v12 = vsub.f32 %v2332_v57, %v1057_v43  ;;  %v1203_v55 = vsub.f32 %v2334_v58, %v1057_v43  ;;  %v1460_v27 = vmul.f32 %v1396_v31, %v2295_v3 }
 0x166   : > { %v1494_v9 = vmul.f32 %v1430_v25, %v2499_v50  ;;  %v1461_v34 = vmul.f32 %v1397_v44, %v2303_v23  ;;  %v1495_v10 = vmul.f32 %v1431_v5, %v2590_v60  ;;  %v806_v18 = vsub.f32 %v2250_v22, %v2317_v37  ;;  %v2749_v25 = vld [vmem:[#allocation30_spill] sm:$0xff]  ;;  %v2764_v22 = vld [vmem:[#allocation33_spill] sm:$0xff] }
 0x167   : > { %v1298_v53 = vand.u32 2147483647, %v1234_v33  ;;  %v1299_v41 = vand.u32 2147483647, %v1235_v26  ;;  %v1266_v7 = vand.u32 2147483647, %v1202_v12  ;;  %v1231_v30 = vsub.f32 %v2334_v58, %v2601_v59  ;;  %1537 = vmatpush.msra.mxu0 %v1460_v27 }
 0x168   : > { %v1294_v13 = vand.u32 2147483647, %v1230_v17  ;;  %v1267_v39 = vand.u32 2147483647, %v1203_v55  ;;  %1556 = vmatpush.msra.mxu1 %v1494_v9  ;;  %v1492_v3 = vmul.f32 %v1428_v21, %v1007_v47  ;;  %1577 = vmatpush.msra.mxu2 %v1461_v34  ;;  %v1493_v60 = vmul.f32 %v1429_v14, %v1008_v52  ;;  %v2748_v21 = vld [vmem:[#allocation36_spill] sm:$0xff]  ;;  %v2751_v55 = vld [vmem:[#allocation37_spill] sm:$0xff] }
 0x169   : > { %v1362_v50 = vsub.f32 1.0, %v1298_v53  ;;  %v1363_v45 = vsub.f32 1.0, %v1299_v41  ;;  %v1330_v23 = vsub.f32 1.0, %v1266_v7  ;;  %1596 = vmatpush.msra.mxu3 %v1495_v10  ;;  %v2743_v8 = vsub.f32 1.0, %v2462_v48  ;;  %v2750_v26 = vld [vmem:[#allocation32_spill] sm:$0xff]  ;;  %v2753_v34 = vld [vmem:[#allocation38_spill] sm:$0xff] }
 0x16a   : > { %v938_v24 = vsub.f32 1.0, %v2744_v49  ;;  %v1392_v46 = vmax.f32 %v1328_v19, 0.0  ;;  %v1331_v16 = vsub.f32 1.0, %v1267_v39  ;;  %1557 = vmatpush.msra.mxu1 %v1492_v3  ;;  %v1393_v1 = vmax.f32 %v1329_v29, 0.0 }
 0x16b   : > { %v1003_v40 = vmax.f32 %v2743_v8, 0.0  ;;  %v1426_v20 = vmax.f32 %v1362_v50, 0.0  ;;  %v1427_v59 = vmax.f32 %v1363_v45, 0.0  ;;  %v1394_v6 = vmax.f32 %v1330_v23, 0.0  ;;  %1597 = vmatpush.msra.mxu3 %v1493_v60  ;;  %v1047_v2 = vpop.permute.xlu1 %1046  ;;  %v1132_v56 = vpop.permute.xlu0 %1131 }
 0x16c   : > { %v1295_v35 = vand.u32 2147483647, %v1231_v30  ;;  %v1358_v32 = vsub.f32 1.0, %v1294_v13  ;;  %v1194_v62 = vsub.f32 %v2332_v57, %v1037_v38  ;;  %v1395_v15 = vmax.f32 %v1331_v16, 0.0 }
 0x16d   : > { %v1198_v48 = vsub.f32 %v2332_v57, %v1047_v2  ;;  %v1199_v11 = vsub.f32 %v2334_v58, %v1047_v2  ;;  %v1232_v36 = vsub.f32 %v2332_v57, %v1132_v56  ;;  %v1233_v61 = vsub.f32 %v2334_v58, %v1132_v56  ;;  %v2757_v56 = vld [vmem:[#allocation34_spill] sm:$0xff] }
 0x16e   : > { %v1458_v51 = vmul.f32 %v1394_v6, %v2745_v42  ;;  %v1490_v47 = vmul.f32 %v1426_v20, %v2746_v28  ;;  %v1459_v52 = vmul.f32 %v1395_v15, %v2747_v63  ;;  %v1491_v0 = vmul.f32 %v1427_v59, %v2748_v21  ;;  %v2756_v6 = vld [vmem:[#allocation28_spill] sm:$0xff]  ;;  %v2760_v21 = vld [vmem:[#allocation22_spill] sm:$0xff] }
 0x16f   : > { %v1262_v14 = vand.u32 2147483647, %v1198_v48  ;;  %v1263_v31 = vand.u32 2147483647, %v1199_v11  ;;  %v1296_v44 = vand.u32 2147483647, %v1232_v36  ;;  %v1456_v54 = vmul.f32 %v1392_v46, %v2749_v25 }
 0x170   : > { %v1359_v19 = vsub.f32 1.0, %v1295_v35  ;;  %v1195_v29 = vsub.f32 %v2334_v58, %v1037_v38  ;;  %v1258_v17 = vand.u32 2147483647, %v1194_v62  ;;  %v1297_v5 = vand.u32 2147483647, %v1233_v61  ;;  %1538 = vmatpush.msra.mxu0 %v1458_v51  ;;  %1558 = vmatpush.msra.mxu1 %v1490_v47 }
 0x171   : > { %v1326_v4 = vsub.f32 1.0, %v1262_v14  ;;  %v1327_v43 = vsub.f32 1.0, %v1263_v31  ;;  %v1360_v33 = vsub.f32 1.0, %v1296_v44  ;;  %1578 = vmatpush.msra.mxu2 %v1459_v52  ;;  %1598 = vmatpush.msra.mxu3 %v1491_v0  ;;  %v1457_v12 = vmul.f32 %v1393_v1, %v2750_v26  ;;  %v2755_v1 = vld [vmem:[#allocation26_spill] sm:$0xff] }
 0x172   : > { %v2752_v27 = vsub.f32 1.0, %v2751_v55  ;;  %v2754_v10 = vsub.f32 1.0, %v2753_v34  ;;  %v1002_v41 = vmax.f32 %v938_v24, 0.0  ;;  %v1361_v7 = vsub.f32 1.0, %v1297_v5  ;;  %1539 = vmatpush.msra.mxu0 %v1456_v54 }
 0x173   : > { %v1422_v30 = vmax.f32 %v1358_v32, 0.0  ;;  %v1390_v13 = vmax.f32 %v1326_v4, 0.0  ;;  %v1391_v39 = vmax.f32 %v1327_v43, 0.0  ;;  %v1424_v3 = vmax.f32 %v1360_v33, 0.0  ;;  %1579 = vmatpush.msra.mxu2 %v1457_v12  ;;  %v1122_v60 = vpop.permute.xlu1 %1121  ;;  %v1042_v8 = vpop.permute.xlu0 %1041 }
 0x174   : > { %v1004_v9 = vmax.f32 %v2752_v27, 0.0  ;;  %v1001_v53 = vmax.f32 %v2754_v10, 0.0  ;;  %v1423_v38 = vmax.f32 %v1359_v19, 0.0  ;;  %v1259_v50 = vand.u32 2147483647, %v1195_v29 }
 0x175   : > { %v1322_v45 = vsub.f32 1.0, %v1258_v17  ;;  %v1425_v23 = vmax.f32 %v1361_v7, 0.0  ;;  %v1228_v49 = vsub.f32 %v2332_v57, %v1122_v60  ;;  %v1229_v46 = vsub.f32 %v2334_v58, %v1122_v60  ;;  %v2762_v17 = vld [vmem:[#allocation27_spill] sm:$0xff] }
 0x176   : > { %v1196_v16 = vsub.f32 %v2332_v57, %v1042_v8  ;;  %v1197_v24 = vsub.f32 %v2334_v58, %v1042_v8  ;;  %v1454_v20 = vmul.f32 %v1390_v13, %v2755_v1  ;;  %v1488_v59 = vmul.f32 %v1424_v3, %v1003_v40  ;;  %v2758_v40 = vld [vmem:[#allocation31_spill] sm:$0xff]  ;;  %v2767_v3 = vld [vmem:[#allocation29_spill] sm:$0xff] }
 0x177   : > { %v1455_v35 = vmul.f32 %v1391_v39, %v2756_v6  ;;  %v1489_v32 = vmul.f32 %v1425_v23, %v1004_v9  ;;  %v1292_v62 = vand.u32 2147483647, %v1228_v49  ;;  %v1293_v15 = vand.u32 2147483647, %v1229_v46  ;;  %v2765_v9 = vld [vmem:[#allocation25_spill] sm:$0xff] }
 0x178   : > { %v1260_v2 = vand.u32 2147483647, %v1196_v16  ;;  %v936_v48 = vsub.f32 1.0, %v2757_v56  ;;  %v1323_v11 = vsub.f32 1.0, %v1259_v50  ;;  %v1261_v36 = vand.u32 2147483647, %v1197_v24  ;;  %1540 = vmatpush.msra.mxu0 %v1454_v20  ;;  %1559 = vmatpush.msra.mxu1 %v1488_v59 }
 0x179   : > { %v1486_v61 = vmul.f32 %v1422_v30, %v1001_v53  ;;  %v1356_v42 = vsub.f32 1.0, %v1292_v62  ;;  %v1357_v51 = vsub.f32 1.0, %v1293_v15  ;;  %1580 = vmatpush.msra.mxu2 %v1455_v35  ;;  %1599 = vmatpush.msra.mxu3 %v1489_v32  ;;  %v1487_v47 = vmul.f32 %v1423_v38, %v1002_v41  ;;  %v1524_v24 = vld.sshfl [vmem:[#allocation1 + $0x8] sm:$0xff pattern:$0x75316420] }
 0x17a   : > { %v1324_v28 = vsub.f32 1.0, %v1260_v2  ;;  %v2759_v63 = vsub.f32 1.0, %v2758_v40  ;;  %v2761_v0 = vsub.f32 %v2760_v21, %v2317_v37  ;;  %v870_v31 = vand.u32 2147483647, %v806_v18  ;;  %v1520_v15 = vld [vmem:[#allocation2] sm:$0x77] }
 0x17b   : > { %v1325_v44 = vsub.f32 1.0, %v1261_v36  ;;  %1560 = vmatpush.msra.mxu1 %v1486_v61  ;;  %v1386_v25 = vmax.f32 %v1322_v45, 0.0  ;;  %v1420_v54 = vmax.f32 %v1356_v42, 0.0  ;;  %v1421_v19 = vmax.f32 %v1357_v51, 0.0  ;;  %1600 = vmatpush.msra.mxu3 %v1487_v47  ;;  %v1117_v12 = vpop.permute.xlu0 %1116 }
 0x17c   : > { %v999_v52 = vmax.f32 %v2759_v63, 0.0  ;;  %v869_v14 = vand.u32 2147483647, %v2761_v0  ;;  %v1388_v29 = vmax.f32 %v1324_v28, 0.0  ;;  %v2763_v5 = vsub.f32 1.0, %v2762_v17 }
 0x17d   : > { %v1000_v43 = vmax.f32 %v936_v48, 0.0  ;;  %v1387_v33 = vmax.f32 %v1323_v11, 0.0  ;;  %v1389_v26 = vmax.f32 %v1325_v44, 0.0  ;;  %v1226_v55 = vsub.f32 %v2332_v57, %v1117_v12 }
 0x17e   : > { %v968_v4 = vmax.f32 %v2763_v5, 0.0  ;;  %v1227_v27 = vsub.f32 %v2334_v58, %v1117_v12  ;;  %v1452_v37 = vmul.f32 %v1388_v29, %v2764_v22  ;;  %v1484_v18 = vmul.f32 %v1420_v54, %v999_v52  ;;  %v1523_v58 = vld.sshfl [vmem:[#allocation1] sm:$0xff pattern:$0x75316420] }
 0x17f   : > { %v2766_v34 = vsub.f32 1.0, %v2765_v9  ;;  %v933_v53 = vsub.f32 1.0, %v869_v14  ;;  %v1485_v7 = vmul.f32 %v1421_v19, %v1000_v43  ;;  %v934_v30 = vsub.f32 1.0, %v870_v31 }
 0x180   : > { %v1453_v41 = vmul.f32 %v1389_v26, %v968_v4  ;;  %v1290_v13 = vand.u32 2147483647, %v1226_v55  ;;  %v1291_v39 = vand.u32 2147483647, %v1227_v27  ;;  %1541 = vmatpush.msra.mxu0 %v1452_v37  ;;  %1561 = vmatpush.msra.mxu1 %v1484_v18  ;;  %v1450_v38 = vmul.f32 %v1386_v25, %v2767_v3 }
 0x181   : > { %v966_v10 = vmax.f32 %v2766_v34, 0.0  ;;  %1601 = vmatpush.msra.mxu3 %v1485_v7  ;;  %v997_v23 = vmax.f32 %v933_v53, 0.0  ;;  %v998_v60 = vmax.f32 %v934_v30, 0.0 }
 0x182   : > { %1581 = vmatpush.msra.mxu2 %v1453_v41  ;;  %v1354_v50 = vsub.f32 1.0, %v1290_v13  ;;  %v1355_v45 = vsub.f32 1.0, %v1291_v39  ;;  %1542 = vmatpush.msra.mxu0 %v1450_v38 }
 0x183   : > { %v1451_v57 = vmul.f32 %v1387_v33, %v966_v10  ;;  %1543 = vmatmul.f32.vlgmr.msra.gmra.mxu0 %v1523_v58 }
 0x184   : > { %v1418_v8 = vmax.f32 %v1354_v50, 0.0  ;;  %v1419_v49 = vmax.f32 %v1355_v45, 0.0 }
 0x185   : > { %1582 = vmatpush.msra.mxu2 %v1451_v57 }
 0x186   : > { %1583 = vmatmul.f32.vlgmr.msra.gmra.mxu2 %v1523_v58  ;;  %v1482_v46 = vmul.f32 %v1418_v8, %v997_v23  ;;  %v1483_v16 = vmul.f32 %v1419_v49, %v998_v60 }
 0x188   : > { %1562 = vmatpush.msra.mxu1 %v1482_v46  ;;  %1602 = vmatpush.msra.mxu3 %v1483_v16 }
 0x189   : > { %1603 = vmatmul.f32.vlgmr.msra.gmra.mxu3 %v1524_v24  ;;  %1563 = vmatmul.f32.vlgmr.msra.gmra.mxu1 %v1524_v24 }
 0x200   : > { %v1544_v1 = vpop.f32.mrf.mxu0 }
 0x206   : > { %v1564_v59 = vpop.f32.mrf.mxu1 }
 0x207   : > { %v1565_v32 = vadd.f32 %v1564_v59, %v1544_v1 }
 0x209   : > { %v1584_v20 = vpop.f32.mrf.mxu2 }
 0x20c   : > { %v1604_v6 = vpop.f32.mrf.mxu3 }
 0x20d   : > { %v1605_v35 = vadd.f32 %v1604_v6, %v1584_v20 }
 0x20f   : > { %v1609_v62 = vrot.slane %v1605_v35, 4 }
 0x211   : > { %v1611_v2 = vsel %vm1610_vm0, %v1565_v32, %v1609_v62 }
 0x212   : > { %v1613_v56 = vadd.f32 %v1611_v2, %v1520_v15 }
 0x214   : > { %1614 = vst [vmem:[#allocation2] sm:$0x77] %v1613_v56 }
 0x215 PF: > { %s2768_s8 = sld [smem:[#allocation20_spill]] }
 0x21b   : > { %v1618_v48 = vld [vmem:[#allocation2] sm:$0x77] }
 0x21c   : > { %1619 = vst [vmem:[%s2768_s8] sm:$0x77] %v1618_v48 }
 0x21d PF: > { %s2769_s28 = sld [smem:[#allocation17_spill]] }
 0x21e   : > { %s2770_s27 = sld [smem:[#allocation16_spill]] }
 0x223   : > { %s22_s29 = sadd.s32 1, %s2769_s28   ;;  %s2771_s28 = sld [smem:[#allocation18_spill]] }
 0x224   : > { %p19_p11 = scmp.ge.s32.totalorder %s22_s29, 4  }
 0x226   :  { %21 = sbr.rel (!%p19_p11) target bundleno = 13 (0xd), region = 125 }
 0x22b   :  { %1650 = vsyncpa [#allocation4], 1 }
 0x22c   :  { %1652 = vsyncpa [#allocation4 + $0x1], 1 }
 0x22d   :  { %1653 = vsyncpa [#allocation11], 1 }
 0x22e   :  { %1654 = vsyncpa [#allocation5], 1 }
 0x22f   :  { %1656 = vsyncpa [#allocation5 + $0x1], 1 }
 0x230   :  { %1657 = vsyncpa [#allocation7], 1 }

// kernel: branch_1_fun.11
= control target key start
LH: loop header
LB: loop body
LE: loop exit
PB: predicated region body
PF: predicated region fallthrough
CT: control target
= control target key end

     0   :  { %s2375_s0 = inlined_call_operand.vmem [shape: f32[12], index: 0, kind: input, shape index: {}]   ;;  %s2376_s1 = inlined_call_operand.vmem [shape: f32[4], index: 1, kind: input, shape index: {}]   ;;  %s2377_s2 = inlined_call_operand.vmem [shape: f32[2], index: 2, kind: input, shape index: {}]   ;;  %s2378_s3 = inlined_call_operand.vmem [shape: f32[1,256], index: 3, kind: input, shape index: {}]   ;;  %s2379_s4 = inlined_call_operand.vmem [shape: f32[1,256], index: 4, kind: input, shape index: {}]   ;;  %s2380_s5 = inlined_call_operand.hbm [shape: f32[256,1], index: 5, kind: input, shape index: {}]   ;;  %s2381_s6 = inlined_call_operand.hbm [shape: f32[256,1], index: 6, kind: input, shape index: {}]   ;;  %s2382_s7 = inlined_call_operand.vmem [shape: f32[2,1,256], index: 7, kind: input, shape index: {}]   ;;  %s2383_s8 = inlined_call_operand.vmem [shape: f32[2,1,256], index: 8, kind: output, shape index: {}]  }
   0x1   :  { %2387 = sst [smem:[#allocation22_spill]] %s2375_s0 }
   0x2   :  { %2388 = sst [smem:[#allocation23_spill]] %s2376_s1 }
   0x3   :  { %2389 = sst [smem:[#allocation24_spill]] %s2377_s2 }
   0x4   :  { %2390 = sst [smem:[#allocation25_spill]] %s2380_s5 }
   0x5   :  { %2391 = sst [smem:[#allocation26_spill]] %s2381_s6 }
   0x6   :  { %2392 = sst [smem:[#allocation27_spill]] %s2382_s7 }
   0x7   :  { %2393 = sst [smem:[#allocation28_spill]] %s2383_s8 }
   0x8   :  { %13 = vsyncpa [#allocation5], 0 }
   0x9   :  { %14 = vsyncpa [#allocation7], 0 }
   0xa   :  { %15 = vsyncpa [#allocation4], 0 }
   0xb   :  { %16 = vsyncpa [#allocation11], 0  ;;  %s1852_s27 = smov 0   ;;  %s1854_s28 = smov 0  }
   0xc   :  { %s1856_s29 = smov 0  }
   0xd LB: > { %2394 = sst [smem:[#allocation16_spill]] %s1791_s28  ;;  %s1475_s11 = sadd.s32 4294967295, %s1795_s29   ;;  %s1795_s29 = sphi %s1856_s29, %s22_s29   ;;  %s1791_s28 = sphi %s1854_s28, %s2444_s28   ;;  %s1787_s27 = sphi %s1852_s27, %s2443_s27  }
   0xe   : > { %2395 = sst [smem:[#allocation17_spill]] %s1795_s29  ;;  %p1477_p0 = scmp.ge.s32.totalorder %s1795_s29, 1 }
   0xf   : > { %s2396_s1 = sld [smem:[#allocation23_spill]]  ;;  %p267_p1 = scmp.lt.s32.totalorder %s1795_s29, 3 }
  0x10   : > { %p1873_p2 = scmp.eq.s32.totalorder %s1475_s11, 0  ;;  %s41_s14 = sadd.s32 1, %s1791_s28 }
  0x11   : > { %p1877_p3 = pnand %p1477_p0, %p267_p1  ;;  %s2399_s0 = sld [smem:[#allocation22_spill]] }
  0x12   : > { %p43_p6 = scmp.ge.s32.totalorder %s41_s14, 2  ;;  %s2401_s2 = sld [smem:[#allocation24_spill]] }
  0x13   : > { %p1589_p4 = pneg %p1877_p3  ;;  %s1797_s22 = smov [#allocation6]  }
  0x14   : > { %s2446_s14 = smov (%p43_p6, %s41_s14), 0  ;;  %s1798_s23 = smov [#allocation3]  }
  0x15   : > { %s289_s10 = sshll.u32 %s2396_s1, 4  ;;  %p1889_p5 = pnand %p1873_p2, %p1589_p4  ;;  %s290_s10 = int_to_ptr.vmem [resolvable:$true] %s289_s10 }
  0x16   : > { %2402 = sst [smem:[#allocation18_spill]] %s2446_s14  ;;  %s1799_s24 = smov [#allocation8]  }
  0x17   : > { %s279_s17 = sshll.u32 %s2399_s0, 4  ;;  %s2403_s5 = sld [smem:[#allocation25_spill]]  ;;  %s280_s17 = int_to_ptr.vmem [resolvable:$true] %s279_s17 }
  0x18   : > { %s299_s21 = sshll.u32 %s2401_s2, 4  ;;  %s1800_s9 = smov [#allocation9]   ;;  %s300_s21 = int_to_ptr.vmem [resolvable:$true] %s299_s21 }
  0x19   : > { %1595 = dma.vmem_to_smem (!%p1889_p5), %s290_s10, 16, %s1797_s22, [#allocation7]  }
  0x1a   : > { %1592 = dma.vmem_to_smem (!%p1889_p5), %s280_s17, 16, %s1798_s23, [#allocation5]  }
  0x1b   : > { %1598 = dma.vmem_to_smem (!%p1889_p5), %s300_s21, 16, %s1799_s24, [#allocation7]  }
  0x1c   : > { %s329_s11 = sshll.u32 %s1800_s9, 4  ;;  %s2404_s6 = sld [smem:[#allocation26_spill]]  ;;  %s330_s11 = int_to_ptr.vmem [resolvable:$true] %s329_s11 }
  0x1d   : > { %s327_s30 = sshll.u32 %s2403_s5, 4  ;;  %s1801_s19 = smov 128   ;;  %s328_s30 = int_to_ptr.hbm [resolvable:$true] %s327_s30 }
  0x1e   : > { %s1802_s20 = smov 8   ;;  %s1803_s17 = smov [#allocation10]  }
  0x1f   : > { %1601 = dma.hbm_to_vmem [thread:$0]  (!%p1889_p5), %s328_s30, 4096, %s330_s11, [#allocation4], %s1801_s19, %s1801_s19, %s1802_s20  }
  0x20   : > { %s346_s22 = sshll.u32 %s1803_s17, 4  ;;  %369 = sbr.rel (%p1877_p3) target bundleno = 543 (0x21f), region = 52  ;;  %s347_s22 = int_to_ptr.vmem [resolvable:$true] %s346_s22 }
  0x22   : > { %s344_s16 = sshll.u32 %s2404_s6, 4  ;;  %s345_s16 = int_to_ptr.hbm [resolvable:$true] %s344_s16 }
  0x23   : > { %1604 = dma.hbm_to_vmem [thread:$0]  (!%p1889_p5), %s345_s16, 4096, %s347_s22, [#allocation11], %s1801_s19, %s1801_s19, %s1802_s20  }
  0x25   : > { %1770 = dma.done.wait (%p1873_p2), [#allocation5], 16  }
  0x26   : > { %1772 = vsyncadd (%p1873_p2), [#allocation5], 4294967280 }
  0x27   : > { %1774 = dma.done.wait (%p1873_p2), [#allocation7], 32  }
  0x28   : > { %1776 = vsyncadd (%p1873_p2), [#allocation7], 4294967264 }
  0x29   : > { %1778 = dma.done.wait (%p1873_p2), [#allocation4], 4096  }
  0x2a   : > { %1780 = vsyncadd (%p1873_p2), [#allocation4], 4294963200 }
  0x2b   : > { %1782 = dma.done.wait (%p1873_p2), [#allocation11], 4096  }
  0x2c   : > { %1784 = vsyncadd (%p1873_p2), [#allocation11], 4294963200 }
  0x2d   : > { %396 = sfence }
  0x2e   : > { %p447_p7 = scmp.lt.s32.totalorder %s1787_s27, 1  ;;  %v464_v0 = vlaneseq  ;;  %s469_s13 = smul.u32 6, %s1787_s27  ;;  %v2405_v1 = vmov 0  ;;  %v1804_v2 = vmov 0.0  }
  0x2f   : > { %s481_s18 = sld [smem:[#allocation6]] }
  0x30   : > { %s2448_s27 = smov (!%p447_p7, %s1787_s27), 1  ;;  %vm1935_vm0 = vcmp.lt.s32.totalorder %v464_v0, 256  ;;  %s1941_s21 = sld [smem:[#allocation3 + %s469_s13]] }
  0x31   : > { %v2406_v1 = vsel %vm1935_vm0, 4294967295, %v2405_v1  ;;  %468 = vst.msk [vmem:[#allocation2] sm:$0x3] %vm1935_vm0, %v1804_v2  ;;  %s471_s12 = sadd.s32 1, %s469_s13  ;;  %s1492_s23 = sshll.u32 %s2448_s27, 1 }
  0x32   : > { %s1943_s24 = sld [smem:[#allocation3 + %s471_s12]]  ;;  %s473_s10 = sadd.s32 2, %s469_s13 }
  0x33   : > { %s2407_s7 = sld [smem:[#allocation27_spill]]  ;;  %s475_s16 = sadd.s32 3, %s469_s13 }
  0x34   : > { %s2409_s8 = sld [smem:[#allocation28_spill]]  ;;  %s477_s20 = sadd.s32 4, %s469_s13 }
  0x35   : > { %s1955_s19 = sld [smem:[#allocation3 + %s473_s10]]  ;;  %s479_s25 = sadd.s32 5, %s469_s13 }
  0x36   : > { %s1957_s17 = sld [smem:[#allocation3 + %s475_s16]] }
  0x37   : > { %s1959_s27 = sld [smem:[#allocation3 + %s477_s20]] }
  0x38   : > { %s1494_s22 = sld [smem:[#allocation6 + $0x1]] }
  0x39   : > { %s1948_s30 = scalar_lea.vmem %s2407_s7, %s1492_s23  ;;  %s1495_s12 = sld [smem:[#allocation6 + $0x2]] }
  0x3a   : > { %2408 = sst [smem:[#allocation19_spill]] %s1948_s30  ;;  %s1953_s15 = scalar_lea.vmem %s2409_s8, %s1492_s23 }
  0x3b   : > { %2410 = sst [smem:[#allocation20_spill]] %s1953_s15 }
  0x3c   : > { %2411 = sst [smem:[#allocation21_spill]] %s1955_s19  ;;  %s488_s9 = smul.f32 %s481_s18, %s1957_s17 }
  0x3d   : > { %s1496_s26 = sld [smem:[#allocation6 + $0x3]] }
  0x3e   : > { %s1962_s23 = sld [smem:[#allocation3 + %s479_s25]]  ;;  %s489_s11 = smul.f32 %s1494_s22, %s1957_s17 }
  0x3f   : > { %s490_s10 = smul.f32 %s1495_s12, %s1959_s27  ;;  %s1499_s29 = sld [smem:[#allocation8 + $0x1]] }
  0x40   : > { %s492_s16 = smin.f32 %s489_s11, %s488_s9  ;;  %s496_s1 = smax.f32 %s489_s11, %s488_s9 }
  0x41   : > { %s508_s25 = sld [smem:[#allocation8]] }
  0x43   : > { %s491_s0 = smul.f32 %s1496_s26, %s1959_s27 }
  0x45   : > { %s493_s2 = smin.f32 %s491_s0, %s490_s10  ;;  %s497_s5 = smax.f32 %s491_s0, %s490_s10 }
  0x46   : > { %s494_s20 = sadd.f32 %s493_s2, %s492_s16 }
  0x47   : > { %s498_s6 = sadd.f32 %s497_s5, %s496_s1 }
  0x48   : > { %s495_s7 = sadd.f32 %s494_s20, %s1962_s23 }
  0x49   : > { %s499_s8 = sadd.f32 %s498_s6, %s1962_s23 }
  0x4a   : > { %s500_s14 = sadd.f32 1.0, %s495_s7 }
  0x4b   : > { %s504_s28 = sadd.f32 1.0, %s499_s8 }
  0x4c   : > { %s501_s13 = smul.f32 16.0, %s500_s14 }
  0x4d   : > { %s505_s18 = smul.f32 16.0, %s504_s28 }
  0x4e   : > { %s1497_s15 = sadd.f32 -1.0, %s501_s13 }
  0x4f   : > { %s1498_s30 = sadd.f32 -1.0, %s505_s18 }
  0x50   : > { %s503_s19 = smul.f32 0.5, %s1497_s15 }
  0x51   : > { %s507_s22 = smul.f32 0.5, %s1498_s30 }
  0x52   : > { %s1500_s12 = sadd.f32 -1.0, %s503_s19 }
  0x53   : > { %s513_s26 = sadd.f32 1.0, %s507_s22 }
  0x54   : > { %p512_p8 = scmp.ge.f32.partialorder %s1499_s29, %s1500_s12 }
  0x55   : > { %p514_p9 = scmp.le.f32.partialorder %s508_s25, %s513_s26 }
  0x57   : > { %p515_p10 = pnand %p514_p9, %p512_p8 }
  0x58   : > { %s2412_s6 = sld [smem:[#allocation21_spill]] (!%p515_p10) }
  0x59   : > { %518 = sbr.rel (%p515_p10) target bundleno = 535 (0x217), region = 80  ;;  %s2432_s7 = sld [smem:[#allocation19_spill]] (!%p515_p10) }
  0x5e   : > { %v547_v3 = vld [vmem:[#allocation9 + $0x20] sm:$0xff]  ;;  %v545_v4 = vld [vmem:[#allocation9 + $0x10] sm:$0xff]  ;;  %v1805_v6 = vmov 0   ;;  %v548_v7 = vld [vmem:[#allocation9 + $0x28] sm:$0xff] }
  0x5f   : > { %v543_v5 = vld [vmem:[#allocation9] sm:$0xff]  ;;  %1651 = vset.pattern.permute.xlu2 %v1805_v6  ;;  %1650 = vset.pattern.permute.xlu1 %v1805_v6  ;;  %v546_v8 = vld [vmem:[#allocation9 + $0x18] sm:$0xff]  ;;  %v544_v9 = vld [vmem:[#allocation9 + $0x8] sm:$0xff] }
  0x60   : > { %1649 = vset.pattern.permute.xlu0 %v1805_v6  ;;  %631 = vperm.xlu2 %1651, %v547_v3   ;;  %v551_v10 = vld [vmem:[#allocation9 + $0x40] sm:$0xff]  ;;  %v550_v11 = vld [vmem:[#allocation9 + $0x38] sm:$0xff]  ;;  %v549_v12 = vld [vmem:[#allocation9 + $0x30] sm:$0xff] }
  0x61   : > { %621 = vperm.xlu1 %1650, %v545_v4   ;;  %611 = vperm.xlu0 %1649, %v543_v5   ;;  %v554_v13 = vld [vmem:[#allocation9 + $0x58] sm:$0xff]  ;;  %v553_v14 = vld [vmem:[#allocation9 + $0x50] sm:$0xff]  ;;  %v552_v15 = vld [vmem:[#allocation9 + $0x48] sm:$0xff] }
  0x62   : > { %v557_v16 = vld [vmem:[#allocation9 + $0x70] sm:$0xff]  ;;  %v556_v17 = vld [vmem:[#allocation9 + $0x68] sm:$0xff]  ;;  %v555_v18 = vld [vmem:[#allocation9 + $0x60] sm:$0xff] }
  0x63   : > { %v560_v19 = vld [vmem:[#allocation9 + $0x88] sm:$0xff]  ;;  %v559_v20 = vld [vmem:[#allocation9 + $0x80] sm:$0xff]  ;;  %v558_v21 = vld [vmem:[#allocation9 + $0x78] sm:$0xff] }
  0x64   : > { %v563_v22 = vld [vmem:[#allocation9 + $0xa0] sm:$0xff]  ;;  %v562_v23 = vld [vmem:[#allocation9 + $0x98] sm:$0xff]  ;;  %v561_v24 = vld [vmem:[#allocation9 + $0x90] sm:$0xff] }
  0x65   : > { %v566_v25 = vld [vmem:[#allocation9 + $0xb8] sm:$0xff]  ;;  %v565_v26 = vld [vmem:[#allocation9 + $0xb0] sm:$0xff]  ;;  %v564_v27 = vld [vmem:[#allocation9 + $0xa8] sm:$0xff] }
  0x66   : > { %v569_v28 = vld [vmem:[#allocation9 + $0xd0] sm:$0xff]  ;;  %v568_v29 = vld [vmem:[#allocation9 + $0xc8] sm:$0xff]  ;;  %v567_v30 = vld [vmem:[#allocation9 + $0xc0] sm:$0xff] }
  0x67   : > { %v573_v31 = vld [vmem:[#allocation9 + $0xf0] sm:$0xff]  ;;  %v571_v32 = vld [vmem:[#allocation9 + $0xe0] sm:$0xff]  ;;  %v570_v33 = vld [vmem:[#allocation9 + $0xd8] sm:$0xff] }
  0x68   : > { %636 = vperm.xlu2 %1651, %v548_v7   ;;  %v590_v34 = vld [vmem:[#allocation10 + $0x78] sm:$0xff]  ;;  %v589_v35 = vld [vmem:[#allocation10 + $0x70] sm:$0xff]  ;;  %v572_v37 = vld [vmem:[#allocation9 + $0xe8] sm:$0xff] }
  0x69   : > { %626 = vperm.xlu1 %1650, %v546_v8   ;;  %616 = vperm.xlu0 %1649, %v544_v9   ;;  %v574_v36 = vld [vmem:[#allocation9 + $0xf8] sm:$0xff]  ;;  %v605_v39 = vld [vmem:[#allocation10 + $0xf0] sm:$0xff]  ;;  %v603_v41 = vld [vmem:[#allocation10 + $0xe0] sm:$0xff] }
  0x6a   : > { %v606_v38 = vld [vmem:[#allocation10 + $0xf8] sm:$0xff]  ;;  %v588_v42 = vld [vmem:[#allocation10 + $0x68] sm:$0xff]  ;;  %v587_v43 = vld [vmem:[#allocation10 + $0x60] sm:$0xff] }
  0x6b   : > { %v586_v45 = vld [vmem:[#allocation10 + $0x58] sm:$0xff]  ;;  %v585_v46 = vld [vmem:[#allocation10 + $0x50] sm:$0xff]  ;;  %v604_v47 = vld [vmem:[#allocation10 + $0xe8] sm:$0xff] }
  0x6c   : > { %v583_v49 = vld [vmem:[#allocation10 + $0x40] sm:$0xff]  ;;  %v602_v50 = vld [vmem:[#allocation10 + $0xd8] sm:$0xff]  ;;  %v601_v51 = vld [vmem:[#allocation10 + $0xd0] sm:$0xff] }
  0x6d   : > { %v600_v55 = vld [vmem:[#allocation10 + $0xc8] sm:$0xff]  ;;  %v599_v56 = vld [vmem:[#allocation10 + $0xc0] sm:$0xff]  ;;  %v597_v61 = vld [vmem:[#allocation10 + $0xb0] sm:$0xff] }
  0x6e   : > { %v584_v57 = vld [vmem:[#allocation10 + $0x48] sm:$0xff]  ;;  %v582_v62 = vld [vmem:[#allocation10 + $0x38] sm:$0xff]  ;;  %v581_v63 = vld [vmem:[#allocation10 + $0x30] sm:$0xff] }
  0x6f   : > { %v580_v4 = vld [vmem:[#allocation10 + $0x28] sm:$0xff]  ;;  %v579_v5 = vld [vmem:[#allocation10 + $0x20] sm:$0xff]  ;;  %v598_v6 = vld [vmem:[#allocation10 + $0xb8] sm:$0xff] }
  0x70   : > { %651 = vperm.xlu2 %1651, %v551_v10   ;;  %v577_v10 = vld [vmem:[#allocation10 + $0x10] sm:$0xff] }
  0x71   : > { %646 = vperm.xlu1 %1650, %v550_v11   ;;  %641 = vperm.xlu0 %1649, %v549_v12   ;;  %v596_v11 = vld [vmem:[#allocation10 + $0xa8] sm:$0xff]  ;;  %v595_v12 = vld [vmem:[#allocation10 + $0xa0] sm:$0xff] }
  0x78   : > { %666 = vperm.xlu2 %1651, %v554_v13  }
  0x79   : > { %661 = vperm.xlu1 %1650, %v553_v14   ;;  %656 = vperm.xlu0 %1649, %v552_v15  }
  0x80   : > { %681 = vperm.xlu2 %1651, %v557_v16   ;;  %v594_v16 = vld [vmem:[#allocation10 + $0x98] sm:$0xff] }
  0x81   : > { %676 = vperm.xlu1 %1650, %v556_v17   ;;  %671 = vperm.xlu0 %1649, %v555_v18   ;;  %v521_v17 = vstv %s1941_s21  ;;  %v523_v18 = vstv %s1943_s24 }
  0x88   : > { %696 = vperm.xlu2 %1651, %v560_v19   ;;  %v593_v19 = vld [vmem:[#allocation10 + $0x90] sm:$0xff] }
  0x89   : > { %691 = vperm.xlu1 %1650, %v559_v20   ;;  %686 = vperm.xlu0 %1649, %v558_v21   ;;  %v578_v20 = vld [vmem:[#allocation10 + $0x18] sm:$0xff] }
  0x8a   : > { %v519_v21 = vld [vmem:[%s2378_s3] sm:$0x3] }
  0x90   : > { %711 = vperm.xlu2 %1651, %v563_v22   ;;  %v520_v22 = vld [vmem:[%s2379_s4] sm:$0x3] }
  0x91   : > { %706 = vperm.xlu1 %1650, %v562_v23   ;;  %701 = vperm.xlu0 %1649, %v561_v24   ;;  %v522_v23 = vmul.f32 %v521_v17, %v519_v21  ;;  %v524_v24 = vmul.f32 %v523_v18, %v520_v22 }
  0x98   : > { %726 = vperm.xlu2 %1651, %v566_v25   ;;  %v528_v25 = vstv %s1957_s17 }
  0x99   : > { %721 = vperm.xlu1 %1650, %v565_v26   ;;  %716 = vperm.xlu0 %1649, %v564_v27   ;;  %v530_v26 = vstv %s1959_s27 }
  0xa0   : > { %741 = vperm.xlu2 %1651, %v569_v28  }
  0xa1   : > { %736 = vperm.xlu1 %1650, %v568_v29   ;;  %731 = vperm.xlu0 %1649, %v567_v30   ;;  %v529_v30 = vmul.f32 %v528_v25, %v519_v21 }
  0xa8   : > { %761 = vperm.xlu2 %1651, %v573_v31   ;;  %v531_v31 = vmul.f32 %v530_v26, %v520_v22 }
  0xa9   : > { %751 = vperm.xlu1 %1650, %v571_v32   ;;  %746 = vperm.xlu0 %1649, %v570_v33   ;;  %v525_v32 = vadd.f32 %v524_v24, %v522_v23  ;;  %v591_v33 = vld [vmem:[#allocation10 + $0x80] sm:$0xff] }
  0xb0   : > { %917 = vperm.xlu2 %1651, %v590_v34   ;;  %v526_v34 = vstv %s2412_s6 }
  0xb1   : > { %912 = vperm.xlu1 %1650, %v589_v35   ;;  %766 = vperm.xlu0 %1649, %v574_v36   ;;  %v576_v35 = vld [vmem:[#allocation10 + $0x8] sm:$0xff]  ;;  %v575_v36 = vld [vmem:[#allocation10] sm:$0xff] }
  0xb8   : > { %756 = vperm.xlu2 %1651, %v572_v37   ;;  %v532_v37 = vadd.f32 %v531_v31, %v529_v30  ;;  %v1806_v30 = vmov 1.0|1.0  }
  0xb9   : > { %997 = vperm.xlu1 %1650, %v606_v38   ;;  %992 = vperm.xlu0 %1649, %v605_v39   ;;  %v527_v38 = vadd.f32 %v526_v34, %v525_v32  ;;  %v533_v39 = vstv %s1962_s23 }
  0xba   : > { %v1969_v40 = vpop.permute.xlu2 %631 }
  0xc0   : > { %982 = vperm.xlu2 %1651, %v603_v41  }
  0xc1   : > { %907 = vperm.xlu1 %1650, %v588_v42   ;;  %902 = vperm.xlu0 %1649, %v587_v43  }
  0xc2   : > { %v1971_v44 = vpop.permute.xlu2 %636 }
  0xc8   : > { %897 = vperm.xlu2 %1651, %v586_v45   ;;  %v534_v45 = vadd.f32 %v533_v39, %v532_v37 }
  0xc9   : > { %892 = vperm.xlu1 %1650, %v585_v46   ;;  %987 = vperm.xlu0 %1649, %v604_v47   ;;  %v535_v46 = vadd.f32 1.0, %v527_v38  ;;  %v592_v47 = vld [vmem:[#allocation10 + $0x88] sm:$0xff] }
  0xca   : > { %v1973_v48 = vpop.permute.xlu2 %651 }
  0xd0   : > { %882 = vperm.xlu2 %1651, %v583_v49   ;;  %v539_v49 = vadd.f32 1.0, %v534_v45 }
  0xd1   : > { %977 = vperm.xlu1 %1650, %v602_v50   ;;  %972 = vperm.xlu0 %1649, %v601_v51   ;;  %v536_v50 = vmul.f32 16.0, %v535_v46 }
  0xd2   : > { %v1975_v52 = vpop.permute.xlu2 %666 }
  0xd3   : > { %v1977_v53 = vpop.permute.xlu1 %621  ;;  %v1979_v54 = vpop.permute.xlu0 %611 }
  0xd8   : > { %967 = vperm.xlu2 %1651, %v600_v55  }
  0xd9   : > { %962 = vperm.xlu1 %1650, %v599_v56   ;;  %887 = vperm.xlu0 %1649, %v584_v57   ;;  %v540_v56 = vmul.f32 16.0, %v539_v49 }
  0xda   : > { %v1981_v58 = vpop.permute.xlu2 %681 }
  0xdb   : > { %v1983_v59 = vpop.permute.xlu1 %626  ;;  %v1985_v60 = vpop.permute.xlu0 %616 }
  0xe0   : > { %952 = vperm.xlu2 %1651, %v597_v61   ;;  %v1501_v61 = vadd.f32 -1.0, %v536_v50 }
  0xe1   : > { %877 = vperm.xlu1 %1650, %v582_v62   ;;  %872 = vperm.xlu0 %1649, %v581_v63   ;;  %v1502_v62 = vadd.f32 -1.0, %v540_v56 }
  0xe2   : > { %v1987_v0 = vpop.permute.xlu2 %696  ;;  %v538_v63 = vmul.f32 0.5, %v1501_v61 }
  0xe3   : > { %v1989_v2 = vpop.permute.xlu1 %646  ;;  %v1991_v3 = vpop.permute.xlu0 %641 }
  0xe8   : > { %867 = vperm.xlu2 %1651, %v580_v4  }
  0xe9   : > { %862 = vperm.xlu1 %1650, %v579_v5   ;;  %957 = vperm.xlu0 %1649, %v598_v6   ;;  %v542_v6 = vmul.f32 0.5, %v1502_v62 }
  0xea   : > { %v1993_v7 = vpop.permute.xlu2 %711 }
  0xeb   : > { %v1995_v8 = vpop.permute.xlu1 %661  ;;  %v1997_v9 = vpop.permute.xlu0 %656 }
  0xf0   : > { %852 = vperm.xlu2 %1651, %v577_v10   ;;  %v838_v10 = vadd.f32 0.5, %v538_v63 }
  0xf1   : > { %947 = vperm.xlu1 %1650, %v596_v11   ;;  %942 = vperm.xlu0 %1649, %v595_v12   ;;  %v607_v12 = vadd.f32 0.5, %v542_v6 }
  0xf2   : > { %v1999_v13 = vpop.permute.xlu2 %726 }
  0xf3   : > { %v2001_v14 = vpop.permute.xlu1 %676  ;;  %v2003_v15 = vpop.permute.xlu0 %671 }
  0xf8   : > { %937 = vperm.xlu2 %1651, %v594_v16   ;;  %v839_v16 = vfloor.f32 %v838_v10 }
  0xf9   : > { %932 = vperm.xlu1 %1650, %v593_v19   ;;  %857 = vperm.xlu0 %1649, %v578_v20   ;;  %v608_v19 = vfloor.f32 %v607_v12 }
  0xfa   : > { %v2015_v27 = vpop.permute.xlu2 %741  ;;  %v2041_v20 = vperm.slane %v839_v16, 0  ;;  %v2043_v21 = vperm.slane %v839_v16, 1 }
  0xfb   : > { %v2017_v28 = vpop.permute.xlu1 %691  ;;  %v687_v29 = vpop.permute.xlu0 %686  ;;  %v2045_v22 = vperm.slane %v608_v19, 0  ;;  %v2050_v24 = vperm.slane %v608_v19, 1  ;;  %v1202_v19 = vld [vmem:[#allocation2] sm:$0x3] }
  0xfd   : > { %vm804_vm3 = vcmp.eq.f32.partialorder %v687_v29, %v2045_v22  ;;  %vm805_vm4 = vcmp.eq.f32.partialorder %v687_v29, %v2050_v24  ;;  %vm802_vm6 = vcmp.eq.f32.partialorder %v1981_v58, %v2045_v22  ;;  %vm803_vm11 = vcmp.eq.f32.partialorder %v1981_v58, %v2050_v24 }
 0x100   : > { %922 = vperm.xlu2 %1651, %v591_v33  }
 0x101   : > { %847 = vperm.xlu1 %1650, %v576_v35   ;;  %842 = vperm.xlu0 %1649, %v575_v36   ;;  %v2413_v35 = vmov 0 }
 0x102   : > { %v2021_v41 = vpop.permute.xlu2 %761 }
 0x103   : > { %v2023_v42 = vpop.permute.xlu1 %706  ;;  %v2025_v43 = vpop.permute.xlu0 %701  ;;  %vm834_vm15 = vcmp.eq.f32.partialorder %v2021_v41, %v2045_v22 }
 0x109   : > { %927 = vperm.xlu0 %1649, %v592_v47  }
 0x10a   : > { %v918_v57 = vpop.permute.xlu2 %917 }
 0x10b   : > { %v2027_v51 = vpop.permute.xlu1 %721  ;;  %v2029_v55 = vpop.permute.xlu0 %716  ;;  %vm1035_vm1 = vcmp.eq.f32.partialorder %v918_v57, %v2041_v20  ;;  %vm1036_vm2 = vcmp.eq.f32.partialorder %v918_v57, %v2043_v21 }
 0x10c   : > { %vm1099_vm5 = vmand %vm804_vm3, %vm1035_vm1 }
 0x10d   : > { %vm1100_vm9 = vmand %vm805_vm4, %vm1036_vm2 }
 0x112   : > { %v2035_v11 = vpop.permute.xlu2 %756 }
 0x113   : > { %v2031_v4 = vpop.permute.xlu1 %736  ;;  %v2033_v5 = vpop.permute.xlu0 %731 }
 0x11a   : > { %v2048_v23 = vpop.permute.xlu2 %982 }
 0x11b   : > { %v2037_v17 = vpop.permute.xlu1 %751  ;;  %v2039_v18 = vpop.permute.xlu0 %746 }
 0x122   : > { %v898_v29 = vpop.permute.xlu2 %897 }
 0x123   : > { %v913_v25 = vpop.permute.xlu1 %912  ;;  %v767_v26 = vpop.permute.xlu0 %766 }
 0x124   : > { %vm1033_vm7 = vcmp.eq.f32.partialorder %v913_v25, %v2041_v20  ;;  %vm1034_vm8 = vcmp.eq.f32.partialorder %v913_v25, %v2043_v21  ;;  %vm836_vm3 = vcmp.eq.f32.partialorder %v767_v26, %v2045_v22 }
 0x125   : > { %vm1097_vm10 = vmand %vm802_vm6, %vm1033_vm7 }
 0x126   : > { %vm1503_vm12 = vmpackc.low %vm1099_vm5, %vm1097_vm10  ;;  %vm837_vm10 = vcmp.eq.f32.partialorder %v767_v26, %v2050_v24 }
 0x127   : > { %1504 = vmatpush.bf16.msk.msra.mxu0 %vm1503_vm12, %v1806_v30  ;;  %vm1098_vm13 = vmand %vm803_vm11, %vm1034_vm8  ;;  %vm835_vm8 = vcmp.eq.f32.partialorder %v2021_v41, %v2050_v24 }
 0x128   : > { %vm1535_vm14 = vmpackc.low %vm1100_vm9, %vm1098_vm13 }
 0x129   : > { %1536 = vmatpush.bf16.msk.msra.mxu2 %vm1535_vm14, %v1806_v30  ;;  %vm798_vm14 = vcmp.eq.f32.partialorder %v2003_v15, %v2045_v22 }
 0x12a   : > { %v2081_v34 = vpop.permute.xlu2 %882 }
 0x12b   : > { %v998_v31 = vpop.permute.xlu1 %997  ;;  %v993_v32 = vpop.permute.xlu0 %992 }
 0x12c   : > { %vm1067_vm1 = vcmp.eq.f32.partialorder %v998_v31, %v2041_v20  ;;  %vm1065_vm2 = vcmp.eq.f32.partialorder %v993_v32, %v2041_v20  ;;  %vm1066_vm4 = vcmp.eq.f32.partialorder %v993_v32, %v2043_v21  ;;  %vm1068_vm6 = vcmp.eq.f32.partialorder %v998_v31, %v2043_v21 }
 0x12d   : > { %vm1129_vm5 = vmand %vm834_vm15, %vm1065_vm2  ;;  %vm1061_vm15 = vcmp.eq.f32.partialorder %v2048_v23, %v2041_v20 }
 0x12e   : > { %vm1131_vm7 = vmand %vm836_vm3, %vm1067_vm1  ;;  %vm830_vm1 = vcmp.eq.f32.partialorder %v2037_v17, %v2045_v22 }
 0x12f   : > { %vm1519_vm9 = vmpackc.low %vm1131_vm7, %vm1129_vm5 }
 0x130   : > { %1520 = vmatpush.bf16.msk.msra.mxu1 %vm1519_vm9, %v1806_v30  ;;  %vm1130_vm11 = vmand %vm835_vm8, %vm1066_vm4  ;;  %vm800_vm4 = vcmp.eq.f32.partialorder %v2001_v14, %v2045_v22  ;;  %vm799_vm9 = vcmp.eq.f32.partialorder %v2003_v15, %v2050_v24 }
 0x131   : > { %vm1132_vm12 = vmand %vm837_vm10, %vm1068_vm6 }
 0x132   : > { %vm1551_vm13 = vmpackc.low %vm1132_vm12, %vm1130_vm11  ;;  %vm801_vm12 = vcmp.eq.f32.partialorder %v2001_v14, %v2050_v24 }
 0x133   : > { %1552 = vmatpush.bf16.msk.msra.mxu3 %vm1551_vm13, %v1806_v30  ;;  %v908_v58 = vpop.permute.xlu1 %907  ;;  %v903_v33 = vpop.permute.xlu0 %902  ;;  %vm2091_vm11 = vmand %vm830_vm1, %vm1061_vm15  ;;  %vm1062_vm13 = vcmp.eq.f32.partialorder %v2048_v23, %v2043_v21  ;;  %vm796_vm1 = vcmp.eq.f32.partialorder %v1975_v52, %v2045_v22 }
 0x134   : > { %vm1031_vm2 = vcmp.eq.f32.partialorder %v908_v58, %v2041_v20  ;;  %vm1029_vm3 = vcmp.eq.f32.partialorder %v903_v33, %v2041_v20  ;;  %vm1030_vm5 = vcmp.eq.f32.partialorder %v903_v33, %v2043_v21  ;;  %vm1032_vm7 = vcmp.eq.f32.partialorder %v908_v58, %v2043_v21 }
 0x135   : > { %vm1093_vm6 = vmand %vm798_vm14, %vm1029_vm3  ;;  %v2414_v35 = vsel %vm2091_vm11, 4294967295, %v2413_v35  ;;  %vm831_vm14 = vcmp.eq.f32.partialorder %v2037_v17, %v2050_v24  ;;  %vm1027_vm3 = vcmp.eq.f32.partialorder %v898_v29, %v2041_v20 }
 0x136   : > { %vm1095_vm8 = vmand %vm800_vm4, %vm1031_vm2  ;;  %vm1028_vm4 = vcmp.eq.f32.partialorder %v898_v29, %v2043_v21 }
 0x137   : > { %vm1505_vm10 = vmpackc.low %vm1095_vm8, %vm1093_vm6  ;;  %vm797_vm8 = vcmp.eq.f32.partialorder %v1975_v52, %v2050_v24  ;;  %v968_v52 = vpop.permute.xlu2 %967 }
 0x138   : > { %1506 = vmatpush.bf16.msk.msra.mxu0 %vm1505_vm10, %v1806_v30  ;;  %vm1094_vm2 = vmand %vm799_vm9, %vm1030_vm5  ;;  %vm794_vm5 = vcmp.eq.f32.partialorder %v1995_v8, %v2045_v22 }
 0x139   : > { %vm1096_vm15 = vmand %vm801_vm12, %vm1032_vm7 }
 0x13a   : > { %vm1537_vm6 = vmpackc.low %vm1096_vm15, %vm1094_vm2  ;;  %vm832_vm2 = vcmp.eq.f32.partialorder %v2035_v11, %v2045_v22  ;;  %vm795_vm15 = vcmp.eq.f32.partialorder %v1995_v8, %v2050_v24 }
 0x13b   : > { %1538 = vmatpush.bf16.msk.msra.mxu2 %vm1537_vm6, %v1806_v30  ;;  %v893_v14 = vpop.permute.xlu1 %892  ;;  %v988_v15 = vpop.permute.xlu0 %987  ;;  %vm1091_vm0 = vmand %vm796_vm1, %vm1027_vm3 }
 0x13c   : > { %vm2109_vm11 = vmand %vm831_vm14, %vm1062_vm13  ;;  %vm1025_vm7 = vcmp.eq.f32.partialorder %v893_v14, %v2041_v20  ;;  %vm1063_vm9 = vcmp.eq.f32.partialorder %v988_v15, %v2041_v20  ;;  %vm1026_vm13 = vcmp.eq.f32.partialorder %v893_v14, %v2043_v21  ;;  %vm1064_vm1 = vcmp.eq.f32.partialorder %v988_v15, %v2043_v21 }
 0x13d   : > { %vm2117_vm10 = vmand %vm797_vm8, %vm1028_vm4  ;;  %vm2419_vm4 = vnez %v2414_v35 }
 0x13e   : > { %vm1089_vm12 = vmand %vm794_vm5, %vm1025_vm7  ;;  %vm833_vm5 = vcmp.eq.f32.partialorder %v2035_v11, %v2050_v24 }
 0x13f   : > { %vm1507_vm14 = vmpackc.low %vm1091_vm0, %vm1089_vm12  ;;  %vm1021_vm0 = vcmp.eq.f32.partialorder %v2081_v34, %v2041_v20  ;;  %vm790_vm12 = vcmp.eq.f32.partialorder %v1973_v48, %v2045_v22  ;;  %v2167_v41 = vpop.permute.xlu2 %952 }
 0x140   : > { %1508 = vmatpush.bf16.msk.msra.mxu0 %vm1507_vm14, %v1806_v30  ;;  %vm1127_vm3 = vmand %vm832_vm2, %vm1063_vm9  ;;  %vm826_vm2 = vcmp.eq.f32.partialorder %v2015_v27, %v2045_v22 }
 0x141   : > { %vm1521_vm6 = vmpackc.low %vm1127_vm3, %vm2419_vm4 }
 0x142   : > { %1522 = vmatpush.bf16.msk.msra.mxu1 %vm1521_vm6, %v1806_v30  ;;  %vm1090_vm8 = vmand %vm795_vm15, %vm1026_vm13 }
 0x143   : > { %vm1539_vm7 = vmpackc.low %vm2117_vm10, %vm1090_vm8  ;;  %v978_v8 = vpop.permute.xlu1 %977  ;;  %v973_v38 = vpop.permute.xlu0 %972  ;;  %vm828_vm10 = vcmp.eq.f32.partialorder %v2039_v18, %v2045_v22 }
 0x144   : > { %1540 = vmatpush.bf16.msk.msra.mxu2 %vm1539_vm7, %v1806_v30  ;;  %vm1128_vm9 = vmand %vm833_vm5, %vm1064_vm1  ;;  %vm1059_vm14 = vcmp.eq.f32.partialorder %v978_v8, %v2041_v20  ;;  %vm1057_vm3 = vcmp.eq.f32.partialorder %v973_v38, %v2041_v20  ;;  %vm1058_vm15 = vcmp.eq.f32.partialorder %v973_v38, %v2043_v21  ;;  %vm1060_vm6 = vcmp.eq.f32.partialorder %v978_v8, %v2043_v21 }
 0x145   : > { %vm1553_vm13 = vmpackc.low %vm1128_vm9, %vm2109_vm11  ;;  %vm1022_vm11 = vcmp.eq.f32.partialorder %v2081_v34, %v2043_v21  ;;  %vm827_vm5 = vcmp.eq.f32.partialorder %v2015_v27, %v2050_v24  ;;  %vm791_vm9 = vcmp.eq.f32.partialorder %v1973_v48, %v2050_v24 }
 0x146   : > { %1554 = vmatpush.bf16.msk.msra.mxu3 %vm1553_vm13, %v1806_v30  ;;  %vm1121_vm1 = vmand %vm826_vm2, %vm1057_vm3  ;;  %vm829_vm2 = vcmp.eq.f32.partialorder %v2039_v18, %v2050_v24  ;;  %vm1056_vm13 = vcmp.eq.f32.partialorder %v968_v52, %v2043_v21 }
 0x147   : > { %vm2153_vm4 = vmand %vm790_vm12, %vm1021_vm0  ;;  %vm1055_vm0 = vcmp.eq.f32.partialorder %v968_v52, %v2041_v20  ;;  %v868_v47 = vpop.permute.xlu2 %867 }
 0x148   : > { %vm1123_vm8 = vmand %vm828_vm10, %vm1059_vm14  ;;  %vm824_vm10 = vcmp.eq.f32.partialorder %v2031_v4, %v2045_v22 }
 0x149   : > { %vm1523_vm7 = vmpackc.low %vm1123_vm8, %vm1121_vm1  ;;  %vm825_vm8 = vcmp.eq.f32.partialorder %v2031_v4, %v2050_v24 }
 0x14a   : > { %1524 = vmatpush.bf16.msk.msra.mxu1 %vm1523_vm7, %v1806_v30  ;;  %vm1122_vm12 = vmand %vm827_vm5, %vm1058_vm15  ;;  %vm792_vm15 = vcmp.eq.f32.partialorder %v1997_v9, %v2045_v22 }
 0x14b   : > { %vm1124_vm14 = vmand %vm829_vm2, %vm1060_vm6  ;;  %v963_v48 = vpop.permute.xlu1 %962  ;;  %v888_v27 = vpop.permute.xlu0 %887  ;;  %vm822_vm2 = vcmp.eq.f32.partialorder %v2033_v5, %v2045_v22 }
 0x14c   : > { %vm2171_vm3 = vmand %vm791_vm9, %vm1022_vm11  ;;  %vm1053_vm11 = vcmp.eq.f32.partialorder %v963_v48, %v2041_v20  ;;  %vm1023_vm6 = vcmp.eq.f32.partialorder %v888_v27, %v2041_v20 }
 0x14d   : > { %vm1555_vm1 = vmpackc.low %vm1124_vm14, %vm1122_vm12  ;;  %vm1024_vm12 = vcmp.eq.f32.partialorder %v888_v27, %v2043_v21 }
 0x14e   : > { %1556 = vmatpush.bf16.msk.msra.mxu3 %vm1555_vm1, %v1806_v30  ;;  %vm1119_vm7 = vmand %vm824_vm10, %vm1055_vm0  ;;  %vm793_vm10 = vcmp.eq.f32.partialorder %v1997_v9, %v2050_v24 }
 0x14f   : > { %vm2184_vm5 = vmand %vm825_vm8, %vm1056_vm13  ;;  %vm1054_vm13 = vcmp.eq.f32.partialorder %v963_v48, %v2043_v21  ;;  %v2245_v57 = vpop.permute.xlu2 %852 }
 0x150   : > { %vm1087_vm9 = vmand %vm792_vm15, %vm1023_vm6  ;;  %vm823_vm15 = vcmp.eq.f32.partialorder %v2033_v5, %v2050_v24 }
 0x151   : > { %vm1509_vm0 = vmpackc.low %vm1087_vm9, %vm2153_vm4 }
 0x152   : > { %1510 = vmatpush.bf16.msk.msra.mxu0 %vm1509_vm0, %v1806_v30  ;;  %vm1117_vm14 = vmand %vm822_vm2, %vm1053_vm11  ;;  %vm786_vm11 = vcmp.eq.f32.partialorder %v1991_v3, %v2045_v22 }
 0x153   : > { %vm1525_vm1 = vmpackc.low %vm1119_vm7, %vm1117_vm14  ;;  %v878_v49 = vpop.permute.xlu1 %877  ;;  %v873_v50 = vpop.permute.xlu0 %872 }
 0x154   : > { %1526 = vmatpush.bf16.msk.msra.mxu1 %vm1525_vm1, %v1806_v30  ;;  %vm1088_vm8 = vmand %vm793_vm10, %vm1024_vm12  ;;  %vm1019_vm9 = vcmp.eq.f32.partialorder %v878_v49, %v2041_v20  ;;  %vm1017_vm2 = vcmp.eq.f32.partialorder %v873_v50, %v2041_v20  ;;  %vm788_vm12 = vcmp.eq.f32.partialorder %v1989_v2, %v2045_v22  ;;  %vm1018_vm0 = vcmp.eq.f32.partialorder %v873_v50, %v2043_v21 }
 0x155   : > { %vm1541_vm6 = vmpackc.low %vm1088_vm8, %vm2171_vm3  ;;  %vm1049_vm3 = vcmp.eq.f32.partialorder %v2167_v41, %v2041_v20  ;;  %vm1020_vm10 = vcmp.eq.f32.partialorder %v878_v49, %v2043_v21  ;;  %vm818_vm1 = vcmp.eq.f32.partialorder %v2027_v51, %v2045_v22 }
 0x156   : > { %1542 = vmatpush.bf16.msk.msra.mxu2 %vm1541_vm6, %v1806_v30  ;;  %vm1118_vm4 = vmand %vm823_vm15, %vm1054_vm13  ;;  %vm789_vm15 = vcmp.eq.f32.partialorder %v1989_v2, %v2050_v24  ;;  %vm1015_vm6 = vcmp.eq.f32.partialorder %v868_v47, %v2041_v20 }
 0x157   : > { %vm1557_vm7 = vmpackc.low %vm2184_vm5, %vm1118_vm4  ;;  %vm787_vm5 = vcmp.eq.f32.partialorder %v1991_v3, %v2050_v24 }
 0x158   : > { %1558 = vmatpush.bf16.msk.msra.mxu3 %vm1557_vm7, %v1806_v30  ;;  %vm1081_vm14 = vmand %vm786_vm11, %vm1017_vm2  ;;  %vm1016_vm11 = vcmp.eq.f32.partialorder %v868_v47, %v2043_v21  ;;  %vm784_vm2 = vcmp.eq.f32.partialorder %v1971_v44, %v2045_v22 }
 0x159   : > { %vm1083_vm13 = vmand %vm788_vm12, %vm1019_vm9  ;;  %vm1050_vm12 = vcmp.eq.f32.partialorder %v2167_v41, %v2043_v21 }
 0x15a   : > { %vm1511_vm8 = vmpackc.low %vm1083_vm13, %vm1081_vm14  ;;  %vm785_vm13 = vcmp.eq.f32.partialorder %v1971_v44, %v2050_v24 }
 0x15b   : > { %1512 = vmatpush.bf16.msk.msra.mxu0 %vm1511_vm8, %v1806_v30  ;;  %vm1082_vm4 = vmand %vm787_vm5, %vm1018_vm0  ;;  %v863_v2 = vpop.permute.xlu1 %862  ;;  %v958_v3 = vpop.permute.xlu0 %957  ;;  %vm819_vm0 = vcmp.eq.f32.partialorder %v2027_v51, %v2050_v24 }
 0x15c   : > { %vm2224_vm7 = vmand %vm818_vm1, %vm1049_vm3  ;;  %vm782_vm1 = vcmp.eq.f32.partialorder %v1969_v40, %v2045_v22  ;;  %vm1051_vm8 = vcmp.eq.f32.partialorder %v958_v3, %v2041_v20 }
 0x15d   : > { %vm1084_vm9 = vmand %vm789_vm15, %vm1020_vm10  ;;  %vm1013_vm10 = vcmp.eq.f32.partialorder %v863_v2, %v2041_v20 }
 0x15e   : > { %vm1543_vm14 = vmpackc.low %vm1084_vm9, %vm1082_vm4  ;;  %vm820_vm4 = vcmp.eq.f32.partialorder %v1999_v13, %v2045_v22 }
 0x15f   : > { %1544 = vmatpush.bf16.msk.msra.mxu2 %vm1543_vm14, %v1806_v30  ;;  %vm1079_vm3 = vmand %vm784_vm2, %vm1015_vm6  ;;  %vm783_vm14 = vcmp.eq.f32.partialorder %v1969_v40, %v2050_v24  ;;  %v938_v40 = vpop.permute.xlu2 %937 }
 0x160   : > { %vm2239_vm5 = vmand %vm785_vm13, %vm1016_vm11  ;;  %vm1014_vm11 = vcmp.eq.f32.partialorder %v863_v2, %v2043_v21  ;;  %vm1052_vm13 = vcmp.eq.f32.partialorder %v958_v3, %v2043_v21 }
 0x161   : > { %vm2248_vm15 = vmand %vm819_vm0, %vm1050_vm12 }
 0x162   : > { %vm1077_vm6 = vmand %vm782_vm1, %vm1013_vm10  ;;  %vm821_vm10 = vcmp.eq.f32.partialorder %v1999_v13, %v2050_v24 }
 0x163   : > { %vm1513_vm9 = vmpackc.low %vm1079_vm3, %vm1077_vm6  ;;  %v948_v51 = vpop.permute.xlu1 %947  ;;  %v943_v61 = vpop.permute.xlu0 %942 }
 0x164   : > { %1514 = vmatpush.bf16.msk.msra.mxu0 %vm1513_vm9, %v1806_v30  ;;  %vm1115_vm2 = vmand %vm820_vm4, %vm1051_vm8  ;;  %vm1047_vm8 = vcmp.eq.f32.partialorder %v948_v51, %v2041_v20  ;;  %vm1045_vm6 = vcmp.eq.f32.partialorder %v943_v61, %v2041_v20 }
 0x165   : > { %vm1527_vm12 = vmpackc.low %vm1115_vm2, %vm2224_vm7  ;;  %vm814_vm7 = vcmp.eq.f32.partialorder %v1993_v7, %v2045_v22  ;;  %vm1048_vm2 = vcmp.eq.f32.partialorder %v948_v51, %v2043_v21 }
 0x166   : > { %1528 = vmatpush.bf16.msk.msra.mxu1 %vm1527_vm12, %v1806_v30  ;;  %vm1078_vm0 = vmand %vm783_vm14, %vm1014_vm11  ;;  %vm816_vm11 = vcmp.eq.f32.partialorder %v2029_v55, %v2045_v22 }
 0x167   : > { %vm1545_vm3 = vmpackc.low %vm2239_vm5, %vm1078_vm0  ;;  %vm1046_vm5 = vcmp.eq.f32.partialorder %v943_v61, %v2043_v21  ;;  %vm817_vm0 = vcmp.eq.f32.partialorder %v2029_v55, %v2050_v24 }
 0x168   : > { %1546 = vmatpush.bf16.msk.msra.mxu2 %vm1545_vm3, %v1806_v30  ;;  %vm1116_vm1 = vmand %vm821_vm10, %vm1052_vm13  ;;  %vm815_vm13 = vcmp.eq.f32.partialorder %v1993_v7, %v2050_v24  ;;  %v923_v7 = vpop.permute.xlu2 %922 }
 0x169   : > { %vm1559_vm4 = vmpackc.low %vm1116_vm1, %vm2248_vm15  ;;  %vm1009_vm15 = vcmp.eq.f32.partialorder %v2245_v57, %v2041_v20  ;;  %vm778_vm1 = vcmp.eq.f32.partialorder %v1977_v53, %v2045_v22 }
 0x16a   : > { %1560 = vmatpush.bf16.msk.msra.mxu3 %vm1559_vm4, %v1806_v30  ;;  %vm1109_vm9 = vmand %vm814_vm7, %vm1045_vm6 }
 0x16b   : > { %vm1111_vm14 = vmand %vm816_vm11, %vm1047_vm8  ;;  %v933_v13 = vpop.permute.xlu1 %932  ;;  %v858_v62 = vpop.permute.xlu0 %857  ;;  %vm780_vm8 = vcmp.eq.f32.partialorder %v1983_v59, %v2045_v22 }
 0x16c   : > { %vm1529_vm12 = vmpackc.low %vm1111_vm14, %vm1109_vm9  ;;  %vm1041_vm7 = vcmp.eq.f32.partialorder %v933_v13, %v2041_v20  ;;  %vm1011_vm4 = vcmp.eq.f32.partialorder %v858_v62, %v2041_v20  ;;  %vm1043_vm9 = vcmp.eq.f32.partialorder %v938_v40, %v2041_v20 }
 0x16d   : > { %1530 = vmatpush.bf16.msk.msra.mxu1 %vm1529_vm12, %v1806_v30  ;;  %vm1110_vm10 = vmand %vm815_vm13, %vm1046_vm5  ;;  %vm812_vm13 = vcmp.eq.f32.partialorder %v2023_v42, %v2045_v22  ;;  %vm1010_vm12 = vcmp.eq.f32.partialorder %v2245_v57, %v2043_v21 }
 0x16e   : > { %vm1112_vm3 = vmand %vm817_vm0, %vm1048_vm2  ;;  %vm810_vm2 = vcmp.eq.f32.partialorder %v2025_v43, %v2045_v22 }
 0x16f   : > { %vm1561_vm6 = vmpackc.low %vm1112_vm3, %vm1110_vm10  ;;  %vm1012_vm10 = vcmp.eq.f32.partialorder %v858_v62, %v2043_v21 }
 0x170   : > { %1562 = vmatpush.bf16.msk.msra.mxu3 %vm1561_vm6, %v1806_v30  ;;  %vm1073_vm11 = vmand %vm778_vm1, %vm1009_vm15  ;;  %vm779_vm15 = vcmp.eq.f32.partialorder %v1977_v53, %v2050_v24  ;;  %vm781_vm6 = vcmp.eq.f32.partialorder %v1983_v59, %v2050_v24  ;;  %v1201_v53 = vld [vmem:[%s2432_s7] sm:$0x3] }
 0x171   : > { %vm1075_vm5 = vmand %vm780_vm8, %vm1011_vm4  ;;  %vm1042_vm8 = vcmp.eq.f32.partialorder %v933_v13, %v2043_v21  ;;  %v1205_v4 = vperm.slane %v1201_v53, 1 }
 0x172   : > { %vm1515_vm14 = vmpackc.low %vm1075_vm5, %vm1073_vm11  ;;  %vm1044_vm11 = vcmp.eq.f32.partialorder %v938_v40, %v2043_v21  ;;  %vm1037_vm5 = vcmp.eq.f32.partialorder %v923_v7, %v2041_v20 }
 0x173   : > { %1516 = vmatpush.bf16.msk.msra.mxu0 %vm1515_vm14, %v1806_v30  ;;  %vm1105_vm0 = vmand %vm810_vm2, %vm1041_vm7  ;;  %v848_v55 = vpop.permute.xlu1 %847  ;;  %v843_v63 = vpop.permute.xlu0 %842  ;;  %vm813_vm14 = vcmp.eq.f32.partialorder %v2023_v42, %v2050_v24 }
 0x174   : > { %vm1107_vm3 = vmand %vm812_vm13, %vm1043_vm9  ;;  %vm811_vm9 = vcmp.eq.f32.partialorder %v2025_v43, %v2050_v24  ;;  %vm1038_vm13 = vcmp.eq.f32.partialorder %v923_v7, %v2043_v21  ;;  %v1204_v43 = vperm.slane %v1201_v53, 0 }
 0x175   : > { %vm1531_vm1 = vmpackc.low %vm1107_vm3, %vm1105_vm0  ;;  %vm1007_vm0 = vcmp.eq.f32.partialorder %v848_v55, %v2041_v20 }
 0x176   : > { %1532 = vmatpush.bf16.msk.msra.mxu1 %vm1531_vm1, %v1806_v30  ;;  %vm1074_vm4 = vmand %vm779_vm15, %vm1010_vm12  ;;  %vm1008_vm15 = vcmp.eq.f32.partialorder %v848_v55, %v2043_v21  ;;  %vm776_vm1 = vcmp.eq.f32.partialorder %v1985_v60, %v2045_v22  ;;  %v1208_v5 = vpack.c.bf16 %v1204_v43, %v1204_v43 }
 0x177   : > { %vm1076_vm7 = vmand %vm781_vm6, %vm1012_vm10  ;;  %vm806_vm10 = vcmp.eq.f32.partialorder %v2017_v28, %v2045_v22  ;;  %vm807_vm6 = vcmp.eq.f32.partialorder %v2017_v28, %v2050_v24 }
 0x178   : > { %vm1547_vm2 = vmpackc.low %vm1076_vm7, %vm1074_vm4  ;;  %vm1005_vm7 = vcmp.eq.f32.partialorder %v843_v63, %v2041_v20 }
 0x179   : > { %1548 = vmatpush.bf16.msk.msra.mxu2 %vm1547_vm2, %v1806_v30  ;;  %vm1106_vm12 = vmand %vm811_vm9, %vm1042_vm8  ;;  %vm777_vm9 = vcmp.eq.f32.partialorder %v1985_v60, %v2050_v24 }
 0x17a   : > { %vm1108_vm3 = vmand %vm813_vm14, %vm1044_vm11  ;;  %vm774_vm14 = vcmp.eq.f32.partialorder %v1979_v54, %v2045_v22 }
 0x17b   : > { %vm2324_vm4 = vmand %vm806_vm10, %vm1037_vm5  ;;  %v928_v60 = vpop.permute.xlu0 %927 }
 0x17c   : > { %vm1563_vm8 = vmpackc.low %vm1108_vm3, %vm1106_vm12  ;;  %vm1006_vm12 = vcmp.eq.f32.partialorder %v843_v63, %v2043_v21 }
 0x17d   : > { %vm2331_vm11 = vmand %vm807_vm6, %vm1038_vm13  ;;  %1564 = vmatpush.bf16.msk.msra.mxu3 %vm1563_vm8, %v1806_v30  ;;  %vm775_vm13 = vcmp.eq.f32.partialorder %v1979_v54, %v2050_v24  ;;  %v1209_v54 = vpack.c.bf16 %v1205_v4, %v1205_v4 }
 0x17e   : > { %vm1071_vm2 = vmand %vm776_vm1, %vm1007_vm0  ;;  %vm1039_vm0 = vcmp.eq.f32.partialorder %v928_v60, %v2041_v20  ;;  %vm1040_vm1 = vcmp.eq.f32.partialorder %v928_v60, %v2043_v21 }
 0x17f   : > { %vm2338_vm5 = vmand %vm777_vm9, %vm1008_vm15  ;;  %vm808_vm15 = vcmp.eq.f32.partialorder %v1987_v0, %v2045_v22 }
 0x180   : > { %vm1069_vm10 = vmand %vm774_vm14, %vm1005_vm7  ;;  %vm809_vm7 = vcmp.eq.f32.partialorder %v1987_v0, %v2050_v24 }
 0x181   : > { %vm1517_vm3 = vmpackc.low %vm1071_vm2, %vm1069_vm10 }
 0x182   : > { %1518 = vmatpush.bf16.msk.msra.mxu0 %vm1517_vm3, %v1806_v30  ;;  %vm1070_vm6 = vmand %vm775_vm13, %vm1006_vm12 }
 0x183   : > { %vm1549_vm8 = vmpackc.low %vm2338_vm5, %vm1070_vm6  ;;  %vm1297_vm5 = vcmask 1040384  }
 0x184   : > { %1550 = vmatpush.bf16.msk.msra.mxu2 %vm1549_vm8, %v1806_v30  ;;  %vm1103_vm9 = vmand %vm808_vm15, %vm1039_vm0 }
 0x185   : > { %vm1104_vm2 = vmand %vm809_vm7, %vm1040_vm1  ;;  %1250 = vmatmul.bf16.vlgmr.msra.gmra.mxu0 %v1208_v5 }
 0x186   : > { %vm1533_vm14 = vmpackc.low %vm1103_vm9, %vm2324_vm4  ;;  %vm2439_vm4 = vnez %v2406_v1 }
 0x187   : > { %1276 = vmatmul.bf16.vlgmr.msra.gmra.mxu2 %v1208_v5  ;;  %1534 = vmatpush.bf16.msk.msra.mxu1 %vm1533_vm14, %v1806_v30  ;;  %vm1565_vm12 = vmpackc.low %vm1104_vm2, %vm2331_vm11 }
 0x188   : > { %1566 = vmatpush.bf16.msk.msra.mxu3 %vm1565_vm12, %v1806_v30 }
 0x18a   : > { %1263 = vmatmul.bf16.vlgmr.msra.gmra.mxu1 %v1209_v54 }
 0x18b   : > { %1289 = vmatmul.bf16.vlgmr.msra.gmra.mxu3 %v1209_v54 }
 0x202   : > { %v1251_v0 = vpop.f32.mrf.mxu0 }
 0x207   : > { %v1264_v6 = vpop.f32.mrf.mxu1 }
 0x208   : > { %v1265_v18 = vadd.f32 %v1264_v6, %v1251_v0 }
 0x20a   : > { %v1277_v10 = vpop.f32.mrf.mxu2  ;;  %v1253_v11 = vpop.f32.mrf.mxu0 }
 0x20e   : > { %v1290_v12 = vpop.f32.mrf.mxu3 }
 0x20f   : > { %v1291_v16 = vadd.f32 %v1290_v12, %v1277_v10  ;;  %v1266_v17 = vpop.f32.mrf.mxu1 }
 0x211   : > { %v1296_v20 = vrot.slane %v1291_v16, 7 }
 0x212   : > { %v1279_v21 = vpop.f32.mrf.mxu2 }
 0x213   : > { %v1298_v22 = vsel %vm1297_vm5, %v1265_v18, %v1296_v20 }
 0x214   : > { %v1300_v23 = vadd.f32 %v1298_v22, %v1202_v19 }
 0x216   : > { %1305 = vst.msk [vmem:[#allocation2] sm:$0x3] %vm2439_vm4, %v1300_v23  ;;  %v1292_v24 = vpop.f32.mrf.mxu3 }
 0x217 PF: > { %vm2440_vm11 = vnez %v2406_v1  ;;  %s2441_s8 = sld [smem:[#allocation20_spill]] }
 0x21d   : > { %v1309_v25 = vld [vmem:[#allocation2] sm:$0x3] }
 0x21e   : > { %1314 = vst.msk [vmem:[%s2441_s8] sm:$0x3] %vm2440_vm11, %v1309_v25 }
 0x21f PF: > { %s2442_s28 = sld [smem:[#allocation17_spill]] }
 0x220   : > { %s2443_s27 = sld [smem:[#allocation16_spill]] }
 0x225   : > { %s22_s29 = sadd.s32 1, %s2442_s28   ;;  %s2444_s28 = sld [smem:[#allocation18_spill]] }
 0x226   : > { %p19_p11 = scmp.ge.s32.totalorder %s22_s29, 4  }
 0x228   :  { %21 = sbr.rel (!%p19_p11) target bundleno = 13 (0xd), region = 125 }
 0x22d   :  { %1343 = vsyncpa [#allocation4], 1 }
 0x22e   :  { %1345 = vsyncpa [#allocation4 + $0x1], 1 }
 0x22f   :  { %1346 = vsyncpa [#allocation11], 1 }
 0x230   :  { %1347 = vsyncpa [#allocation5], 1 }
 0x231   :  { %1349 = vsyncpa [#allocation5 + $0x1], 1 }
 0x232   :  { %1350 = vsyncpa [#allocation7], 1 }

</bundles_post_ra>
